<compile_context>
chip_gen: v6e
topology: v6e:2x2x1
jax: 0.10.0
libtpu: 0.0.40
codegen_flags: <defaults>
</compile_context>

<pallas_src>
import functools

import jax
import jax.numpy as jnp
from jax import lax
from jax.experimental import pallas as pl
from jax.experimental.pallas import tpu as pltpu

LANE = 128


def _round_up(v, m):
    return (v + m - 1) // m * m


# ---------------------------------------------------------------------------
# In-kernel implicit im2col: taps stacked along lanes, one matmul per batch elem
# ---------------------------------------------------------------------------
def _im2col_lanes(x, k, n_do, hb, wcp):
    """x: (Din, Hb, WCp) bf16.  Returns (n_do*Hb, k*k*WCp) LHS such that
    lhs[do*Hb + r, (kd*k+kh)*WCp + l] == x[do+kd, r+kh, l] for r+kh < Hb.
    Rows with r >= (valid H - k + 1) pick up wrapped values -> garbage-only rows that are
    never read as valid output (and are masked out in the pooling epilogue)."""
    # k H-shifted copies (k-1 sublane shifts per block total, not per (do, kd)).
    shifted = [x]
    for kh in range(1, k):
        shifted.append(jnp.concatenate([x[:, kh:, :], x[:, :kh, :]], axis=1))
    # Stack the k*k taps side by side on the lane axis; each piece is a whole number of
    # 128-lane tiles (WCp % 128 == 0), so the concat is tile-aligned.
    cols = jnp.concatenate(
        [shifted[kh][kd:kd + n_do] for kd in range(k) for kh in range(k)],
        axis=-1)                                   # (n_do, Hb, k*k*WCp)
    return cols.reshape(n_do * hb, k * k * wcp)


def _conv_relu_kernel(x_ref, t_ref, b_ref, o_ref, *, k, n_do, hb, wcp):
    """One Conv3d + bias + ReLU layer for one batch element: a single MXU matmul."""
    lhs = _im2col_lanes(x_ref[...], k, n_do, hb, wcp)        # (n_do*Hb, k*k*WCp) bf16
    y = jnp.dot(lhs, t_ref[...], preferred_element_type=jnp.float32)
    y = jnp.maximum(y + b_ref[...], 0.0)
    o_ref[...] = y.reshape(n_do, hb, -1).astype(o_ref.dtype)


def _conv_relu_pool_kernel(x_ref, t_ref, b_ref, o_ref, *, k, n_do, hb, wcp,
                           ho_valid, method):
    """Last Conv3d + bias + ReLU with the (D, H) adaptive max/avg pool fused as an
    epilogue (the full conv output of the last layer never touches HBM)."""
    lhs = _im2col_lanes(x_ref[...], k, n_do, hb, wcp)
    y = jnp.dot(lhs, t_ref[...], preferred_element_type=jnp.float32)   # (n_do*Hb, Np) f32
    y = jnp.maximum(y + b_ref[...], 0.0)
    # Only rows r < ho_valid of each depth block are valid conv outputs.
    r = lax.broadcasted_iota(jnp.int32, (n_do * hb, 1), 0) % hb
    valid = r < ho_valid
    if method == "max":
        red = jnp.max(jnp.where(valid, y, -jnp.inf), axis=0, keepdims=True)
    else:
        red = (jnp.sum(jnp.where(valid, y, 0.0), axis=0, keepdims=True)
               * (1.0 / (n_do * ho_valid)))
    o_ref[...] = red.astype(o_ref.dtype)


# ---------------------------------------------------------------------------
# Wrapper: one conv layer (optionally with fused pool) as a pallas_call
# ---------------------------------------------------------------------------
def conv3d_relu_pallas(x, t_full, b_pad, *, k, h_valid, pool=None):
    """x: (N, Din, Hb, WCp) channels-last-flattened, lane-padded bf16 activations
    (rows >= h_valid along the H axis are don't-care).  Returns:
      pool is None -> (N, Din-k+1, Hb, Np) bf16 (rows >= h_valid-k+1 are don't-care)
      else         -> (N, 1, Np) f32 with the (D, H) max/avg pool fused in."""
    N, Din, Hb, WCp = x.shape
    KK, Np = t_full.shape
    assert KK == k * k * WCp, (KK, k, WCp)
    n_do = Din - k + 1
    ho_valid = h_valid - k + 1

    in_specs = [
        # whole per-batch activation block (tiny) -> each plane read exactly once
        pl.BlockSpec((None, Din, Hb, WCp), lambda n: (n, 0, 0, 0)),
        # banded weight & bias: constant index map -> fetched once, VMEM-resident
        pl.BlockSpec((KK, Np), lambda n: (0, 0)),
        pl.BlockSpec((1, Np), lambda n: (0, 0)),
    ]
    if pool is None:
        kernel = functools.partial(_conv_relu_kernel, k=k, n_do=n_do, hb=Hb, wcp=WCp)
        out_shape = jax.ShapeDtypeStruct((N, n_do, Hb, Np), x.dtype)
        out_specs = pl.BlockSpec((None, n_do, Hb, Np), lambda n: (n, 0, 0, 0))
    else:
        kernel = functools.partial(_conv_relu_pool_kernel, k=k, n_do=n_do, hb=Hb,
                                   wcp=WCp, ho_valid=ho_valid, method=pool)
        out_shape = jax.ShapeDtypeStruct((N, 1, Np), jnp.float32)
        out_specs = pl.BlockSpec((None, 1, Np), lambda n: (n, 0, 0))

    out = pl.pallas_call(
        kernel,
        out_shape=out_shape,
        grid_spec=pltpu.PrefetchScalarGridSpec(
            num_scalar_prefetch=0,
            grid=(N,),
            in_specs=in_specs,
            out_specs=out_specs),
        compiler_params=pltpu.CompilerParams(dimension_semantics=("parallel",)),
    )(x, t_full, b_pad)
    return out, ho_valid


# ---------------------------------------------------------------------------
# Hoisted weight preparation (once per weight update, not per forward)
# ---------------------------------------------------------------------------
def _build_layer_tables(w, b, W):
    """(Cout, Cin, k, k, k) torch-layout weight -> (k*k*WCp, Np) banded matrix T_full with
    T_full[(kd*k+kh)*WCp + w_i*Cin + ci, wo*Cout + co] = w[co, ci, kd, kh, w_i - wo]
    when 0 <= w_i - wo < k, else 0 (pad rows/cols are zero).  Plus the wo-tiled bias."""
    cout, cin, k = int(w.shape[0]), int(w.shape[1]), int(w.shape[2])
    wo = W - k + 1
    wcp = _round_up(W * cin, LANE)
    np_ = _round_up(wo * cout, LANE)

    wt = jnp.transpose(w, (2, 3, 4, 1, 0))                       # (kd, kh, kw, Cin, Cout)
    kw_idx = jnp.arange(W)[:, None] - jnp.arange(wo)[None, :]    # (W, Wo)
    valid = (kw_idx >= 0) & (kw_idx < k)
    t6 = wt[:, :, jnp.clip(kw_idx, 0, k - 1)]                    # (kd, kh, W, Wo, Cin, Cout)
    t6 = jnp.where(valid[None, None, :, :, None, None], t6, 0.0)
    t6 = jnp.transpose(t6, (0, 1, 2, 4, 3, 5))                   # (kd, kh, W, Cin, Wo, Cout)
    t = t6.reshape(k * k, W * cin, wo * cout)
    t = jnp.pad(t, ((0, 0), (0, wcp - W * cin), (0, np_ - wo * cout)))
    t_full = t.reshape(k * k * wcp, np_).astype(jnp.bfloat16)

    b_pad = jnp.pad(jnp.tile(b, wo), (0, np_ - wo * cout)).reshape(1, np_)
    return t_full, b_pad.astype(jnp.float32)


def prepare_params(params, input_shape):
    """Precompute banded weights / padded biases for every layer."""
    _, _, _, _, W = input_shape
    tables, w_cur = [], W
    for (w, b) in params:
        k = int(w.shape[2])
        tables.append(_build_layer_tables(w, b, w_cur))
        w_cur = w_cur - k + 1
    return tables


# ---------------------------------------------------------------------------
# Module forward + parameter init (matches nn.init.xavier_uniform_, bias=0.1)
# ---------------------------------------------------------------------------
def init_params(channels_list, filter_sizes, key):
    params = []
    for i, k in enumerate(filter_sizes):
        cin, cout = channels_list[i], channels_list[i + 1]
        key, sub = jax.random.split(key)
        fan_in = cin * k ** 3
        fan_out = cout * k ** 3
        bound = (6.0 / (fan_in + fan_out)) ** 0.5
        w = jax.random.uniform(sub, (cout, cin, k, k, k), jnp.float32, -bound, bound)
        b = jnp.full((cout,), 0.1, dtype=jnp.float32)
        params.append((w, b))
    return params


def graph_feat_convolution(x_ncdhw, tables, *, filter_sizes, channels_list,
                           pool_method="max"):
    """Forward. x: (N, C, D, H, W). Returns (N, C_last, W_out), matching torch
    out.squeeze() for N > 1.
    # TODO(synk): torch's .squeeze() would also drop the batch dim when N == 1."""
    N, C, D, H, W = x_ncdhw.shape
    wcp0 = _round_up(W * C, LANE)
    x = jnp.transpose(x_ncdhw, (0, 2, 3, 4, 1)).reshape(N, D, H, W * C)
    x = jnp.pad(x, ((0, 0), (0, 0), (0, 0), (0, wcp0 - W * C))).astype(jnp.bfloat16)

    h_valid, w_cur = H, W
    for i, ((t_full, b_pad), k) in enumerate(zip(tables, filter_sizes)):
        last = i == len(tables) - 1
        x, h_valid = conv3d_relu_pallas(x, t_full, b_pad, k=k, h_valid=h_valid,
                                        pool=pool_method if last else None)
        w_cur = w_cur - k + 1

    cout = channels_list[-1]
    out = x[:, 0, :w_cur * cout].reshape(N, w_cur, cout)   # (N, 1, Np) -> (N, Wo, C)
    return jnp.transpose(out, (0, 2, 1))                   # (N, C, W)


# ---------------------------------------------------------------------------
# Pure-JAX reference (correctness check only)
# ---------------------------------------------------------------------------
def reference(x_ncdhw, params, pool_method="max"):
    out = x_ncdhw
    for (w, b) in params:
        out = lax.conv_general_dilated(
            out, w, (1, 1, 1), "VALID",
            dimension_numbers=("NCDHW", "OIDHW", "NCDHW"))
        out = jax.nn.relu(out + b.reshape(1, -1, 1, 1, 1))
    if pool_method == "max":
        return jnp.max(out, axis=(2, 3))        # (N, C, W)
    return jnp.mean(out, axis=(2, 3))


if __name__ == "__main__":
    key = jax.random.PRNGKey(0)
    channels_list = [4, 8, 16]
    filter_sizes = [3, 3]
    N, D, H, W = 2, 16, 16, 16

    kx, kp = jax.random.split(key)
    x = jax.random.normal(kx, (N, channels_list[0], D, H, W), dtype=jnp.float32)
    params = init_params(channels_list, filter_sizes, kp)

    # Hoisted: banded weights built once per weight update, not per forward.
    tables = prepare_params(params, x.shape)

    fwd = jax.jit(functools.partial(graph_feat_convolution,
                                    filter_sizes=tuple(filter_sizes),
                                    channels_list=tuple(channels_list),
                                    pool_method="max"))
    out = jax.block_until_ready(fwd(x, tables))

    ref = reference(x, params, pool_method="max")
    assert out.shape == ref.shape, (out.shape, ref.shape)
    # bf16 activations/weights with f32 accumulation -> loosened tolerance.
    assert float(jnp.max(jnp.abs(out.astype(jnp.float32) - ref))) < 5e-2

    print("KERNEL_OK")
</pallas_src>

<mosaic_0001>
module attributes {stable_mosaic.version = 11 : i64} {
  func.func @_conv_relu_kernel(%arg0: i32, %arg1: memref<1x16x16x128xbf16, #tpu.memory_space<vmem>>, %arg2: memref<1152x128xbf16, #tpu.memory_space<vmem>>, %arg3: memref<1x128xf32, #tpu.memory_space<vmem>>, %arg4: memref<1x14x16x128xbf16, #tpu.memory_space<vmem>>) attributes {dimension_semantics = [#tpu.dimension_semantics<parallel>], iteration_bounds = array<i64: 2>, scalar_prefetch = 0 : i64, scratch_operands = 0 : i64, tpu.core_type = #tpu.core_type<tc>, window_params = [{transform_indices = @transform_0, window_bounds = array<i64: 1, 16, 16, 128>}, {pipeline_mode = #tpu.pipeline_mode<synchronous>, transform_indices = @transform_1, window_bounds = array<i64: 1152, 128>}, {pipeline_mode = #tpu.pipeline_mode<synchronous>, transform_indices = @transform_2, window_bounds = array<i64: 1, 128>}, {transform_indices = @transform_3, window_bounds = array<i64: 1, 14, 16, 128>}]} {
    %c0 = arith.constant 0 : index
    %c0_0 = arith.constant 0 : index
    %c0_1 = arith.constant 0 : index
    %c0_2 = arith.constant 0 : index
    %0 = vector.load %arg1[%c0, %c0_0, %c0_1, %c0_2] : memref<1x16x16x128xbf16, #tpu.memory_space<vmem>>, vector<1x16x16x128xbf16>
    %1 = vector.shape_cast %0 : vector<1x16x16x128xbf16> to vector<16x16x128xbf16>
    %2 = vector.extract_strided_slice %1 {offsets = [0, 1, 0], sizes = [16, 15, 128], strides = [1, 1, 1]} : vector<16x16x128xbf16> to vector<16x15x128xbf16>
    %3 = vector.extract_strided_slice %1 {offsets = [0, 0, 0], sizes = [16, 1, 128], strides = [1, 1, 1]} : vector<16x16x128xbf16> to vector<16x1x128xbf16>
    %4 = tpu.concatenate %2, %3 in 1 : vector<16x15x128xbf16>, vector<16x1x128xbf16> -> vector<16x16x128xbf16>
    %5 = vector.extract_strided_slice %1 {offsets = [0, 2, 0], sizes = [16, 14, 128], strides = [1, 1, 1]} : vector<16x16x128xbf16> to vector<16x14x128xbf16>
    %6 = vector.extract_strided_slice %1 {offsets = [0, 0, 0], sizes = [16, 2, 128], strides = [1, 1, 1]} : vector<16x16x128xbf16> to vector<16x2x128xbf16>
    %7 = tpu.concatenate %5, %6 in 1 : vector<16x14x128xbf16>, vector<16x2x128xbf16> -> vector<16x16x128xbf16>
    %8 = vector.extract_strided_slice %1 {offsets = [0, 0, 0], sizes = [14, 16, 128], strides = [1, 1, 1]} : vector<16x16x128xbf16> to vector<14x16x128xbf16>
    %9 = vector.extract_strided_slice %4 {offsets = [0, 0, 0], sizes = [14, 16, 128], strides = [1, 1, 1]} : vector<16x16x128xbf16> to vector<14x16x128xbf16>
    %10 = vector.extract_strided_slice %7 {offsets = [0, 0, 0], sizes = [14, 16, 128], strides = [1, 1, 1]} : vector<16x16x128xbf16> to vector<14x16x128xbf16>
    %11 = vector.extract_strided_slice %1 {offsets = [1, 0, 0], sizes = [14, 16, 128], strides = [1, 1, 1]} : vector<16x16x128xbf16> to vector<14x16x128xbf16>
    %12 = vector.extract_strided_slice %4 {offsets = [1, 0, 0], sizes = [14, 16, 128], strides = [1, 1, 1]} : vector<16x16x128xbf16> to vector<14x16x128xbf16>
    %13 = vector.extract_strided_slice %7 {offsets = [1, 0, 0], sizes = [14, 16, 128], strides = [1, 1, 1]} : vector<16x16x128xbf16> to vector<14x16x128xbf16>
    %14 = vector.extract_strided_slice %1 {offsets = [2, 0, 0], sizes = [14, 16, 128], strides = [1, 1, 1]} : vector<16x16x128xbf16> to vector<14x16x128xbf16>
    %15 = vector.extract_strided_slice %4 {offsets = [2, 0, 0], sizes = [14, 16, 128], strides = [1, 1, 1]} : vector<16x16x128xbf16> to vector<14x16x128xbf16>
    %16 = vector.extract_strided_slice %7 {offsets = [2, 0, 0], sizes = [14, 16, 128], strides = [1, 1, 1]} : vector<16x16x128xbf16> to vector<14x16x128xbf16>
    %17 = tpu.concatenate %8, %9, %10, %11, %12, %13, %14, %15, %16 in 2 : vector<14x16x128xbf16>, vector<14x16x128xbf16>, vector<14x16x128xbf16>, vector<14x16x128xbf16>, vector<14x16x128xbf16>, vector<14x16x128xbf16>, vector<14x16x128xbf16>, vector<14x16x128xbf16>, vector<14x16x128xbf16> -> vector<14x16x1152xbf16>
    %18 = vector.shape_cast %17 : vector<14x16x1152xbf16> to vector<224x1152xbf16>
    %c0_3 = arith.constant 0 : index
    %c0_4 = arith.constant 0 : index
    %19 = vector.load %arg2[%c0_3, %c0_4] : memref<1152x128xbf16, #tpu.memory_space<vmem>>, vector<1152x128xbf16>
    %cst = arith.constant dense<0.000000e+00> : vector<224x128xf32>
    %20 = tpu.matmul %18, %19, %cst {dimension_numbers = #tpu.dot_dimension_numbers<[1], [0], [0], [1], [0, 0, 1, 1], [], []>} : vector<224x1152xbf16>, vector<1152x128xbf16>, vector<224x128xf32> -> vector<224x128xf32>
    %c0_5 = arith.constant 0 : index
    %c0_6 = arith.constant 0 : index
    %21 = vector.load %arg3[%c0_5, %c0_6] : memref<1x128xf32, #tpu.memory_space<vmem>>, vector<1x128xf32>
    %22 = vector.broadcast %21 : vector<1x128xf32> to vector<224x128xf32>
    %23 = arith.addf %20, %22 : vector<224x128xf32>
    %cst_7 = arith.constant 0.000000e+00 : f32
    %24 = vector.broadcast %cst_7 : f32 to vector<224x128xf32>
    %25 = arith.maximumf %23, %24 : vector<224x128xf32>
    %26 = vector.shape_cast %25 : vector<224x128xf32> to vector<14x16x128xf32>
    %27 = arith.truncf %26 : vector<14x16x128xf32> to vector<14x16x128xbf16>
    %c0_8 = arith.constant 0 : index
    %c0_9 = arith.constant 0 : index
    %c0_10 = arith.constant 0 : index
    %c0_11 = arith.constant 0 : index
    %28 = vector.load %arg4[%c0_8, %c0_9, %c0_10, %c0_11] : memref<1x14x16x128xbf16, #tpu.memory_space<vmem>>, vector<1x14x16x128xbf16>
    %29 = vector.shape_cast %28 : vector<1x14x16x128xbf16> to vector<14x16x128xbf16>
    %30 = vector.shape_cast %27 : vector<14x16x128xbf16> to vector<1x14x16x128xbf16>
    tpu.vector_store %arg4[%c0_8, %c0_9, %c0_10, %c0_11], %30 {strides = array<i32>} : memref<1x14x16x128xbf16, #tpu.memory_space<vmem>>, vector<1x14x16x128xbf16>,
    return
  }
  func.func @transform_0(%arg0: i32) -> (i32, i32, i32, i32) {
    %c0_i32 = arith.constant 0 : i32
    %c0_i32_0 = arith.constant 0 : i32
    %c0_i32_1 = arith.constant 0 : i32
    %c0_i32_2 = arith.constant 0 : i32
    return %arg0, %c0_i32, %c0_i32_0, %c0_i32_1 : i32, i32, i32, i32
  }
  func.func @transform_1(%arg0: i32) -> (i32, i32) {
    %c0_i32 = arith.constant 0 : i32
    %c0_i32_0 = arith.constant 0 : i32
    %c0_i32_1 = arith.constant 0 : i32
    return %c0_i32, %c0_i32_0 : i32, i32
  }
  func.func @transform_2(%arg0: i32) -> (i32, i32) {
    %c0_i32 = arith.constant 0 : i32
    %c0_i32_0 = arith.constant 0 : i32
    %c0_i32_1 = arith.constant 0 : i32
    return %c0_i32, %c0_i32_0 : i32, i32
  }
  func.func @transform_3(%arg0: i32) -> (i32, i32, i32, i32) {
    %c0_i32 = arith.constant 0 : i32
    %c0_i32_0 = arith.constant 0 : i32
    %c0_i32_1 = arith.constant 0 : i32
    %c0_i32_2 = arith.constant 0 : i32
    return %arg0, %c0_i32, %c0_i32_0, %c0_i32_1 : i32, i32, i32, i32
  }
}

module attributes {stable_mosaic.version = 11 : i64} {
  func.func @_conv_relu_pool_kernel(%arg0: i32, %arg1: memref<1x14x16x128xbf16, #tpu.memory_space<vmem>>, %arg2: memref<1152x256xbf16, #tpu.memory_space<vmem>>, %arg3: memref<1x256xf32, #tpu.memory_space<vmem>>, %arg4: memref<1x1x256xf32, #tpu.memory_space<vmem>>) attributes {dimension_semantics = [#tpu.dimension_semantics<parallel>], iteration_bounds = array<i64: 2>, scalar_prefetch = 0 : i64, scratch_operands = 0 : i64, tpu.core_type = #tpu.core_type<tc>, window_params = [{transform_indices = @transform_0, window_bounds = array<i64: 1, 14, 16, 128>}, {pipeline_mode = #tpu.pipeline_mode<synchronous>, transform_indices = @transform_1, window_bounds = array<i64: 1152, 256>}, {pipeline_mode = #tpu.pipeline_mode<synchronous>, transform_indices = @transform_2, window_bounds = array<i64: 1, 256>}, {transform_indices = @transform_3, window_bounds = array<i64: 1, 1, 256>}]} {
    %c0 = arith.constant 0 : index
    %c0_0 = arith.constant 0 : index
    %c0_1 = arith.constant 0 : index
    %c0_2 = arith.constant 0 : index
    %0 = vector.load %arg1[%c0, %c0_0, %c0_1, %c0_2] : memref<1x14x16x128xbf16, #tpu.memory_space<vmem>>, vector<1x14x16x128xbf16>
    %1 = vector.shape_cast %0 : vector<1x14x16x128xbf16> to vector<14x16x128xbf16>
    %2 = vector.extract_strided_slice %1 {offsets = [0, 1, 0], sizes = [14, 15, 128], strides = [1, 1, 1]} : vector<14x16x128xbf16> to vector<14x15x128xbf16>
    %3 = vector.extract_strided_slice %1 {offsets = [0, 0, 0], sizes = [14, 1, 128], strides = [1, 1, 1]} : vector<14x16x128xbf16> to vector<14x1x128xbf16>
    %4 = tpu.concatenate %2, %3 in 1 : vector<14x15x128xbf16>, vector<14x1x128xbf16> -> vector<14x16x128xbf16>
    %5 = vector.extract_strided_slice %1 {offsets = [0, 2, 0], sizes = [14, 14, 128], strides = [1, 1, 1]} : vector<14x16x128xbf16> to vector<14x14x128xbf16>
    %6 = vector.extract_strided_slice %1 {offsets = [0, 0, 0], sizes = [14, 2, 128], strides = [1, 1, 1]} : vector<14x16x128xbf16> to vector<14x2x128xbf16>
    %7 = tpu.concatenate %5, %6 in 1 : vector<14x14x128xbf16>, vector<14x2x128xbf16> -> vector<14x16x128xbf16>
    %8 = vector.extract_strided_slice %1 {offsets = [0, 0, 0], sizes = [12, 16, 128], strides = [1, 1, 1]} : vector<14x16x128xbf16> to vector<12x16x128xbf16>
    %9 = vector.extract_strided_slice %4 {offsets = [0, 0, 0], sizes = [12, 16, 128], strides = [1, 1, 1]} : vector<14x16x128xbf16> to vector<12x16x128xbf16>
    %10 = vector.extract_strided_slice %7 {offsets = [0, 0, 0], sizes = [12, 16, 128], strides = [1, 1, 1]} : vector<14x16x128xbf16> to vector<12x16x128xbf16>
    %11 = vector.extract_strided_slice %1 {offsets = [1, 0, 0], sizes = [12, 16, 128], strides = [1, 1, 1]} : vector<14x16x128xbf16> to vector<12x16x128xbf16>
    %12 = vector.extract_strided_slice %4 {offsets = [1, 0, 0], sizes = [12, 16, 128], strides = [1, 1, 1]} : vector<14x16x128xbf16> to vector<12x16x128xbf16>
    %13 = vector.extract_strided_slice %7 {offsets = [1, 0, 0], sizes = [12, 16, 128], strides = [1, 1, 1]} : vector<14x16x128xbf16> to vector<12x16x128xbf16>
    %14 = vector.extract_strided_slice %1 {offsets = [2, 0, 0], sizes = [12, 16, 128], strides = [1, 1, 1]} : vector<14x16x128xbf16> to vector<12x16x128xbf16>
    %15 = vector.extract_strided_slice %4 {offsets = [2, 0, 0], sizes = [12, 16, 128], strides = [1, 1, 1]} : vector<14x16x128xbf16> to vector<12x16x128xbf16>
    %16 = vector.extract_strided_slice %7 {offsets = [2, 0, 0], sizes = [12, 16, 128], strides = [1, 1, 1]} : vector<14x16x128xbf16> to vector<12x16x128xbf16>
    %17 = tpu.concatenate %8, %9, %10, %11, %12, %13, %14, %15, %16 in 2 : vector<12x16x128xbf16>, vector<12x16x128xbf16>, vector<12x16x128xbf16>, vector<12x16x128xbf16>, vector<12x16x128xbf16>, vector<12x16x128xbf16>, vector<12x16x128xbf16>, vector<12x16x128xbf16>, vector<12x16x128xbf16> -> vector<12x16x1152xbf16>
    %18 = vector.shape_cast %17 : vector<12x16x1152xbf16> to vector<192x1152xbf16>
    %c0_3 = arith.constant 0 : index
    %c0_4 = arith.constant 0 : index
    %19 = vector.load %arg2[%c0_3, %c0_4] : memref<1152x256xbf16, #tpu.memory_space<vmem>>, vector<1152x256xbf16>
    %cst = arith.constant dense<0.000000e+00> : vector<192x256xf32>
    %20 = tpu.matmul %18, %19, %cst {dimension_numbers = #tpu.dot_dimension_numbers<[1], [0], [0], [1], [0, 0, 1, 1], [], []>} : vector<192x1152xbf16>, vector<1152x256xbf16>, vector<192x256xf32> -> vector<192x256xf32>
    %c0_5 = arith.constant 0 : index
    %c0_6 = arith.constant 0 : index
    %21 = vector.load %arg3[%c0_5, %c0_6] : memref<1x256xf32, #tpu.memory_space<vmem>>, vector<1x256xf32>
    %22 = vector.broadcast %21 : vector<1x256xf32> to vector<192x256xf32>
    %23 = arith.addf %20, %22 : vector<192x256xf32>
    %cst_7 = arith.constant 0.000000e+00 : f32
    %24 = vector.broadcast %cst_7 : f32 to vector<192x256xf32>
    %25 = arith.maximumf %23, %24 : vector<192x256xf32>
    %26 = tpu.iota {dimensions = array<i32: 0>} : vector<192x1xi32>
    %c16_i32 = arith.constant 16 : i32
    %c0_i32 = arith.constant 0 : i32
    %27 = arith.cmpi eq, %c16_i32, %c0_i32 : i32
    %c1_i32 = arith.constant 1 : i32
    %28 = arith.select %27, %c1_i32, %c16_i32 : i32
    %29 = vector.broadcast %28 : i32 to vector<192x1xi32>
    %30 = arith.remsi %26, %29 : vector<192x1xi32>
    %c0_i32_8 = arith.constant 0 : i32
    %31 = vector.broadcast %c0_i32_8 : i32 to vector<192x1xi32>
    %32 = arith.cmpi ne, %30, %31 : vector<192x1xi32>
    %c0_i32_9 = arith.constant 0 : i32
    %33 = vector.broadcast %c0_i32_9 : i32 to vector<192x1xi32>
    %34 = arith.cmpi slt, %30, %33 : vector<192x1xi32>
    %c0_i32_10 = arith.constant 0 : i32
    %35 = arith.cmpi slt, %28, %c0_i32_10 : i32
    %36 = vector.broadcast %35 : i1 to vector<192x1xi1>
    %37 = vector.broadcast %36 : vector<192x1xi1> to vector<192x1xi1>
    %38 = arith.xori %34, %37 : vector<192x1xi1>
    %39 = arith.andi %38, %32 : vector<192x1xi1>
    %40 = vector.broadcast %28 : i32 to vector<192x1xi32>
    %41 = arith.addi %30, %40 : vector<192x1xi32>
    %42 = arith.select %39, %41, %30 : vector<192x1xi1>, vector<192x1xi32>
    %c12_i32 = arith.constant 12 : i32
    %43 = vector.broadcast %c12_i32 : i32 to vector<192x1xi32>
    %44 = arith.cmpi slt, %42, %43 : vector<192x1xi32>
    %cst_11 = arith.constant 0xFF800000 : f32
    %45 = vector.shape_cast %44 : vector<192x1xi1> to vector<192x1xi1>
    %46 = vector.broadcast %45 : vector<192x1xi1> to vector<192x256xi1>
    %47 = vector.broadcast %cst_11 : f32 to vector<192x256xf32>
    %48 = arith.select %46, %25, %47 : vector<192x256xi1>, vector<192x256xf32>
    %cst_12 = arith.constant dense<0xFF800000> : vector<256xf32>
    %49 = vector.multi_reduction <maximumf>, %48, %cst_12 [0] : vector<192x256xf32> to vector<256xf32>
    %50 = vector.shape_cast %49 : vector<256xf32> to vector<1x256xf32>
    %c0_13 = arith.constant 0 : index
    %c0_14 = arith.constant 0 : index
    %c0_15 = arith.constant 0 : index
    %51 = vector.load %arg4[%c0_13, %c0_14, %c0_15] : memref<1x1x256xf32, #tpu.memory_space<vmem>>, vector<1x1x256xf32>
    %52 = vector.shape_cast %51 : vector<1x1x256xf32> to vector<1x256xf32>
    %53 = vector.shape_cast %50 : vector<1x256xf32> to vector<1x1x256xf32>
    tpu.vector_store %arg4[%c0_13, %c0_14, %c0_15], %53 {strides = array<i32>} : memref<1x1x256xf32, #tpu.memory_space<vmem>>, vector<1x1x256xf32>,
    return
  }
  func.func @transform_0(%arg0: i32) -> (i32, i32, i32, i32) {
    %c0_i32 = arith.constant 0 : i32
    %c0_i32_0 = arith.constant 0 : i32
    %c0_i32_1 = arith.constant 0 : i32
    %c0_i32_2 = arith.constant 0 : i32
    return %arg0, %c0_i32, %c0_i32_0, %c0_i32_1 : i32, i32, i32, i32
  }
  func.func @transform_1(%arg0: i32) -> (i32, i32) {
    %c0_i32 = arith.constant 0 : i32
    %c0_i32_0 = arith.constant 0 : i32
    %c0_i32_1 = arith.constant 0 : i32
    return %c0_i32, %c0_i32_0 : i32, i32
  }
  func.func @transform_2(%arg0: i32) -> (i32, i32) {
    %c0_i32 = arith.constant 0 : i32
    %c0_i32_0 = arith.constant 0 : i32
    %c0_i32_1 = arith.constant 0 : i32
    return %c0_i32, %c0_i32_0 : i32, i32
  }
  func.func @transform_3(%arg0: i32) -> (i32, i32, i32) {
    %c0_i32 = arith.constant 0 : i32
    %c0_i32_0 = arith.constant 0 : i32
    %c0_i32_1 = arith.constant 0 : i32
    return %arg0, %c0_i32, %c0_i32_0 : i32, i32, i32
  }
}

</mosaic_0001>

<bundles_post_ra>
// kernel: graph_feat_convolution.2
= control target key start
LH: loop header
LB: loop body
LE: loop exit
PB: predicated region body
PF: predicated region fallthrough
CT: control target
= control target key end

     0   :  { %s3049_s12 = smov 0   ;;  %s3858_s0 = inlined_call_operand.vmem [shape: bf16[2,16,16,128], index: 0, kind: input, shape index: {}]   ;;  %s3859_s1 = inlined_call_operand.vmem [shape: bf16[1152,128], index: 1, kind: input, shape index: {}]   ;;  %s3860_s2 = inlined_call_operand.vmem [shape: f32[1,128], index: 2, kind: input, shape index: {}]   ;;  %s3861_s3 = inlined_call_operand.vmem [shape: bf16[2,14,16,128], index: 3, kind: output, shape index: {}]  }
   0x1 LB: > { %s2171_s13 = sadd.s32 4294967295, %s3027_s12   ;;  %p2175_p0 = scmp.ge.s32.totalorder %s3027_s12, 1  ;;  %s3027_s12 = sphi %s3049_s12, %s13_s12  }
   0x2   : > { %p137_p1 = scmp.lt.s32.totalorder %s3027_s12, 3 }
   0x4   : > { %p138_p2 = pnand %p2175_p0, %p137_p1 }
   0x6   : > { %141 = sbr.rel (%p138_p2) target bundleno = 499 (0x1f3), region = 32 }
   0xb   : > { %v2917_v0 = vld [vmem:[%s3859_s1 + $0x78] sm:$0xff]   ;;  %v2921_v4 = vld [vmem:[%s3859_s1 + $0x70] sm:$0xff]   ;;  %v2925_v8 = vld [vmem:[%s3859_s1 + $0x68] sm:$0xff]   ;;  %p161_p3 = scmp.lt.s32.totalorder %s2171_s13, 1  ;;  %vm508_vm0 = vcmask 1047552   ;;  %vm559_vm2 = vcmask 1046528  }
   0xc   : > { %v2918_v1 = vld [vmem:[%s3859_s1 + $0xf8] sm:$0xff]   ;;  %2426 = vmatprep.subr.bf16.mxu0 %v2917_v0  ;;  %v2922_v5 = vld [vmem:[%s3859_s1 + $0xf0] sm:$0xff]   ;;  %v2926_v9 = vld [vmem:[%s3859_s1 + $0xe8] sm:$0xff]   ;;  %vm509_vm1 = vsmask.f32 7424 }
   0xd   : > { %v2919_v2 = vld [vmem:[%s3859_s1 + $0x38] sm:$0xff]   ;;  %2526 = vmatprep.subr.bf16.mxu1 %v2918_v1  ;;  %v2923_v6 = vld [vmem:[%s3859_s1 + $0x30] sm:$0xff]   ;;  %v2927_v10 = vld [vmem:[%s3859_s1 + $0x28] sm:$0xff]   ;;  %s3903_s13 = smov (!%p161_p3, %s2171_s13), 1 }
   0xe   : > { %v2920_v3 = vld [vmem:[%s3859_s1 + $0xb8] sm:$0xff]   ;;  %2427 = vmatpush3.bf16.msra.mxu0 %v2919_v2  ;;  %v2924_v7 = vld [vmem:[%s3859_s1 + $0xb0] sm:$0xff]   ;;  %v2928_v11 = vld [vmem:[%s3859_s1 + $0xa8] sm:$0xff]   ;;  %s2314_s18 = sshll.u32 %s3903_s13, 7  ;;  %s2908_s16 = smul.u32 112, %s3903_s13 }
   0xf   : > { %2527 = vmatpush3.bf16.msra.mxu1 %v2920_v3  ;;  %2428 = vmatprep.subr.bf16.mxu0 %v2921_v4  ;;  %v2929_v12 = vld [vmem:[%s3859_s1 + $0x60] sm:$0xff]   ;;  %v2933_v16 = vld [vmem:[%s3859_s1 + $0x58] sm:$0xff]   ;;  %v2937_v20 = vld [vmem:[%s3859_s1 + $0x50] sm:$0xff]   ;;  %s3157_s27 = scalar_lea.vmem %s3858_s0, %s2314_s18 }
  0x10   : > { %2528 = vmatprep.subr.bf16.mxu1 %v2922_v5  ;;  %v2930_v13 = vld [vmem:[%s3859_s1 + $0xe0] sm:$0xff]   ;;  %v2934_v17 = vld [vmem:[%s3859_s1 + $0xd8] sm:$0xff]   ;;  %v2938_v21 = vld [vmem:[%s3859_s1 + $0xd0] sm:$0xff]   ;;  %s3808_s18 = scalar_lea.vmem %s3861_s3, %s2908_s16 }
  0x11   : > { %v2931_v14 = vld [vmem:[%s3859_s1 + $0x20] sm:$0xff]   ;;  %v2935_v18 = vld [vmem:[%s3859_s1 + $0x18] sm:$0xff]   ;;  %v2939_v22 = vld [vmem:[%s3859_s1 + $0x10] sm:$0xff]  }
  0x12   : > { %2429 = vmatpush3.bf16.msra.mxu0 %v2923_v6  ;;  %v2932_v15 = vld [vmem:[%s3859_s1 + $0xa0] sm:$0xff]   ;;  %v2936_v19 = vld [vmem:[%s3859_s1 + $0x98] sm:$0xff]   ;;  %v2940_v23 = vld [vmem:[%s3859_s1 + $0x90] sm:$0xff]  }
  0x13   : > { %2529 = vmatpush3.bf16.msra.mxu1 %v2924_v7  ;;  %2430 = vmatprep.subr.bf16.mxu0 %v2925_v8  ;;  %v2941_v24 = vld [vmem:[%s3859_s1 + $0x48] sm:$0xff]   ;;  %v2945_v28 = vld [vmem:[%s3859_s1 + $0x40] sm:$0xff]   ;;  %v2952_v39 = vld [vmem:[%s3859_s1 + $0x178] sm:$0xff]  }
  0x14   : > { %2530 = vmatprep.subr.bf16.mxu1 %v2926_v9  ;;  %v2942_v25 = vld [vmem:[%s3859_s1 + $0xc8] sm:$0xff]   ;;  %v2946_v29 = vld [vmem:[%s3859_s1 + $0xc0] sm:$0xff]   ;;  %v176_v51 = vld [vmem:[%s3157_s27 + $0x10] sm:$0xf] }
  0x15   : > { %v2943_v26 = vld [vmem:[%s3859_s1 + $0x8] sm:$0xff]   ;;  %v2947_v30 = vld [vmem:[%s3859_s1] sm:$0xff]   ;;  %vm3180_vm3 = vmand %vm508_vm0, %vm509_vm1  ;;  %v2197_v58 = vcombine.low %v176_v51, %v176_v51 }
  0x16   : > { %2431 = vmatpush3.bf16.msra.mxu0 %v2927_v10  ;;  %v2944_v27 = vld [vmem:[%s3859_s1 + $0x88] sm:$0xff]   ;;  %v2948_v31 = vld [vmem:[%s3859_s1 + $0x80] sm:$0xff]   ;;  %v2953_v54 = vld [vmem:[%s3859_s1 + $0x138] sm:$0xff]  }
  0x17   : > { %2531 = vmatpush3.bf16.msra.mxu1 %v2928_v11  ;;  %2432 = vmatprep.subr.bf16.mxu0 %v2929_v12  ;;  %v172_v32 = vld [vmem:[%s3157_s27] sm:$0xf]  ;;  %v173_v33 = vld [vmem:[%s3157_s27 + $0x4] sm:$0xf]  ;;  %v174_v36 = vld [vmem:[%s3157_s27 + $0x8] sm:$0xf] }
  0x18   : > { %2532 = vmatprep.subr.bf16.mxu1 %v2930_v13  ;;  %v2179_v34 = vcombine.low %v172_v32, %v173_v33  ;;  %v2195_v35 = vcombine.low %v172_v32, %v172_v32  ;;  %v175_v37 = vld [vmem:[%s3157_s27 + $0xc] sm:$0xf]  ;;  %v2196_v40 = vcombine.low %v174_v36, %v174_v36  ;;  %v177_v56 = vld [vmem:[%s3157_s27 + $0x14] sm:$0xf]  ;;  %v2956_v62 = vld [vmem:[%s3859_s1 + $0x1f8] sm:$0xff]   ;;  %v437_v6 = vshll.u32 %v2197_v58, 16 }
  0x19   : > { %v3169_v38 = vcombine.low %v174_v36, %v175_v37  ;;  %v3190_v61 = vcombine.low %v176_v51, %v177_v56  ;;  %v2957_v1 = vld [vmem:[%s3859_s1 + $0x1b8] sm:$0xff]   ;;  %v2958_v3 = vld [vmem:[%s3859_s1 + $0x170] sm:$0xff]   ;;  %v2971_v32 = vld [vmem:[%s3859_s1 + $0x1a8] sm:$0xff]  }
  0x1a   : > { %2433 = vmatpush3.bf16.msra.mxu0 %v2931_v14  ;;  %v285_v41 = vshrl.u32 %v2179_v34, 16  ;;  %v287_v42 = vshll.u32 %v2179_v34, 16  ;;  %v429_v43 = vshll.u32 %v2195_v35, 16  ;;  %v527_v44 = vrot.slane %v2179_v34, 1  ;;  %v178_v8 = vld [vmem:[%s3157_s27 + $0x18] sm:$0xf] }
  0x1b   : > { %2533 = vmatpush3.bf16.msra.mxu1 %v2932_v15  ;;  %2434 = vmatprep.subr.bf16.mxu0 %v2933_v16  ;;  %v543_v45 = vrot.slane %v2195_v35, 1  ;;  %v292_v46 = vshrl.u32 %v3169_v38, 16  ;;  %v294_v47 = vshll.u32 %v3169_v38, 16  ;;  %v433_v50 = vshll.u32 %v2196_v40, 16  ;;  %v179_v9 = vld [vmem:[%s3157_s27 + $0x1c] sm:$0xf] }
  0x1c   : > { %2534 = vmatprep.subr.bf16.mxu1 %v2934_v17  ;;  %1400 = vmatprep.mubr.bf16.mxu1 %v3169_v38  ;;  %v289_v48 = vrot.slane %v287_v42, 1  ;;  %v431_v49 = vrot.slane %v429_v43, 1  ;;  %v528_v57 = vrot.slane %v3169_v38, 1  ;;  %v544_v0 = vrot.slane %v2196_v40, 1  ;;  %v2961_v12 = vld [vmem:[%s3859_s1 + $0x130] sm:$0xff]   ;;  %v2982_v51 = vld [vmem:[%s3859_s1 + $0x158] sm:$0xff]  }
  0x1d   : > { %v562_v53 = vsel %vm559_vm2, %v527_v44, %v543_v45  ;;  %v296_v55 = vrot.slane %v294_v47, 1  ;;  %v435_v60 = vrot.slane %v433_v50, 1  ;;  %v299_v4 = vshrl.u32 %v3190_v61, 16  ;;  %v2962_v14 = vld [vmem:[%s3859_s1 + $0x1f0] sm:$0xff]   ;;  %v183_v40 = vld [vmem:[%s3157_s27 + $0x2c] sm:$0xf] }
  0x1e   : > { %2435 = vmatpush3.bf16.msra.mxu0 %v2935_v18  ;;  %v290_v59 = vor.u32 %v289_v48, %v285_v41  ;;  %v301_v5 = vshll.u32 %v3190_v61, 16  ;;  %v3212_v11 = vcombine.low %v178_v8, %v179_v9  ;;  %v3219_v13 = vsel %vm559_vm2, %v528_v57, %v544_v0  ;;  %v2975_v41 = vld [vmem:[%s3859_s1 + $0x120] sm:$0xff]   ;;  %v2983_v57 = vld [vmem:[%s3859_s1 + $0x118] sm:$0xff]  }
  0x1f   : > { %2535 = vmatpush3.bf16.msra.mxu1 %v2936_v19  ;;  %2436 = vmatprep.subr.bf16.mxu0 %v2937_v20  ;;  %v297_v63 = vor.u32 %v296_v55, %v292_v46  ;;  %v439_v16 = vrot.slane %v437_v6, 1  ;;  %v2198_v18 = vcombine.low %v178_v8, %v178_v8  ;;  %v180_v19 = vld [vmem:[%s3157_s27 + $0x20] sm:$0xf]  ;;  %v181_v20 = vld [vmem:[%s3157_s27 + $0x24] sm:$0xf]  ;;  %v2987_v6 = vld [vmem:[%s3859_s1 + $0x198] sm:$0xff]  }
  0x20   : > { %2536 = vmatprep.subr.bf16.mxu1 %v2938_v21  ;;  %v511_v2 = vsel %vm3180_vm3, %v290_v59, %v431_v49  ;;  %v303_v10 = vrot.slane %v301_v5, 1  ;;  %v308_v17 = vshll.u32 %v3212_v11, 16  ;;  %v2965_v21 = vld [vmem:[%s3859_s1 + $0x1b0] sm:$0xff]   ;;  %v530_v42 = vrot.slane %v3212_v11, 1  ;;  %v2978_v49 = vld [vmem:[%s3859_s1 + $0x1e0] sm:$0xff]  }
  0x21   : > { %1255 = vmatprep.mubr.bf16.mxu0 %v511_v2  ;;  %v3208_v7 = vsel %vm3180_vm3, %v297_v63, %v435_v60  ;;  %v546_v43 = vrot.slane %v2198_v18, 1  ;;  %v2979_v50 = vld [vmem:[%s3859_s1 + $0x1a0] sm:$0xff]   ;;  %v184_v59 = vld [vmem:[%s3157_s27 + $0x30] sm:$0xf]  ;;  %v185_v60 = vld [vmem:[%s3157_s27 + $0x34] sm:$0xf] }
  0x22   : > { %2437 = vmatpush3.bf16.msra.mxu0 %v2939_v22  ;;  %v304_v15 = vor.u32 %v303_v10, %v299_v4  ;;  %v529_v22 = vrot.slane %v3190_v61, 1  ;;  %v3300_v2 = vcombine.low %v184_v59, %v185_v60  ;;  %v2988_v8 = vld [vmem:[%s3859_s1 + $0x150] sm:$0xff]  }
  0x23   : > { %2537 = vmatpush3.bf16.msra.mxu1 %v2940_v23  ;;  %2438 = vmatprep.subr.bf16.mxu0 %v2941_v24  ;;  %v545_v23 = vrot.slane %v2197_v58, 1  ;;  %v2966_v24 = vld [vmem:[%s3859_s1 + $0x168] sm:$0xff]  }
  0x24   : > { %2538 = vmatprep.subr.bf16.mxu1 %v2942_v25  ;;  %v306_v25 = vshrl.u32 %v3212_v11, 16 }
  0x25   : > { %v3255_v33 = vsel %vm559_vm2, %v529_v22, %v545_v23 }
  0x26   : > { %2439 = vmatpush3.bf16.msra.mxu0 %v2943_v26  ;;  %v2967_v26 = vld [vmem:[%s3859_s1 + $0x128] sm:$0xff]  }
  0x27   : > { %2539 = vmatpush3.bf16.msra.mxu1 %v2944_v27  ;;  %2440 = vmatprep.subr.bf16.mxu0 %v2945_v28  ;;  %v3242_v27 = vsel %vm3180_vm3, %v304_v15, %v439_v16  ;;  %v310_v28 = vrot.slane %v308_v17, 1  ;;  %v186_v15 = vld [vmem:[%s3157_s27 + $0x38] sm:$0xf]  ;;  %v2991_v16 = vld [vmem:[%s3859_s1 + $0x110] sm:$0xff]  }
  0x28   : > { %2540 = vmatprep.subr.bf16.mxu1 %v2946_v29  ;;  %v441_v29 = vshll.u32 %v2198_v18, 16  ;;  %v187_v18 = vld [vmem:[%s3157_s27 + $0x3c] sm:$0xf] }
  0x29   : > { %v311_v35 = vor.u32 %v310_v28, %v306_v25  ;;  %v3332_v23 = vcombine.low %v186_v15, %v187_v18  ;;  %v327_v25 = vshrl.u32 %v3300_v2, 16  ;;  %v2995_v28 = vld [vmem:[%s3859_s1 + $0x190] sm:$0xff]  }
  0x2a   : > { %2441 = vmatpush3.bf16.msra.mxu0 %v2947_v30  ;;  %v3244_v30 = vcombine.low %v180_v19, %v181_v20  ;;  %v443_v36 = vrot.slane %v441_v29, 1  ;;  %v2992_v20 = vld [vmem:[%s3859_s1 + $0x1d0] sm:$0xff]   ;;  %v2996_v29 = vld [vmem:[%s3859_s1 + $0x148] sm:$0xff]  }
  0x2b   : > { %2541 = vmatpush3.bf16.msra.mxu1 %v2948_v31  ;;  %2626 = vmatprep.subr.bf16.mxu0 %v2952_v39  ;;  %v2970_v31 = vld [vmem:[%s3859_s1 + $0x1e8] sm:$0xff]  }
  0x2c   : > { %2726 = vmatprep.subr.bf16.mxu1 %v2956_v62  ;;  %v315_v37 = vshll.u32 %v3244_v30, 16  ;;  %v182_v39 = vld [vmem:[%s3157_s27 + $0x28] sm:$0xf]  ;;  %v3273_v46 = vsel %vm3180_vm3, %v311_v35, %v443_v36  ;;  %v313_v47 = vshrl.u32 %v3244_v30, 16  ;;  %v531_v62 = vrot.slane %v3244_v30, 1 }
  0x2d   : > { %1256 = vmatmul.mubr.bf16.vlgmr.msra.gmra.mxu0 %v2179_v34  ;;  %v2199_v34 = vcombine.low %v180_v19, %v180_v19  ;;  %v3269_v45 = vcombine.low %v182_v39, %v183_v40  ;;  %v2200_v56 = vcombine.low %v182_v39, %v182_v39  ;;  %v336_v36 = vshll.u32 %v3332_v23, 16  ;;  %v189_v40 = vld [vmem:[%s3157_s27 + $0x44] sm:$0xf] }
  0x2e   : > { %1401 = vmatmul.mubr.bf16.vlgmr.msra.gmra.mxu1 %v562_v53  ;;  %2627 = vmatpush3.bf16.msra.mxu0 %v2953_v54  ;;  %v317_v48 = vrot.slane %v315_v37, 1  ;;  %v3288_v53 = vsel %vm559_vm2, %v530_v42, %v546_v43  ;;  %v188_v37 = vld [vmem:[%s3157_s27 + $0x40] sm:$0xf]  ;;  %v3001_v42 = vld [vmem:[%s3859_s1 + $0x188] sm:$0xff]   ;;  %v533_v43 = vrot.slane %v3300_v2, 1 }
  0x2f   : > { %1408 = vmatprep.mubr.bf16.mxu1 %v3190_v61  ;;  %2727 = vmatpush3.bf16.msra.mxu1 %v2957_v1  ;;  %v445_v44 = vshll.u32 %v2199_v34, 16  ;;  %v322_v55 = vshll.u32 %v3269_v45, 16  ;;  %v547_v63 = vrot.slane %v2199_v34, 1  ;;  %v320_v0 = vshrl.u32 %v3269_v45, 16 }
  0x30   : > { %1263 = vmatprep.mubr.bf16.mxu0 %v3208_v7  ;;  %2628 = vmatprep.subr.bf16.mxu0 %v2958_v3  ;;  %v318_v58 = vor.u32 %v317_v48, %v313_v47  ;;  %v449_v1 = vshll.u32 %v2200_v56, 16  ;;  %v2986_v3 = vld [vmem:[%s3859_s1 + $0x1d8] sm:$0xff]   ;;  %v532_v19 = vrot.slane %v3269_v45, 1  ;;  %v334_v47 = vshrl.u32 %v3332_v23, 16 }
  0x31   : > { %2728 = vmatprep.subr.bf16.mxu1 %v2962_v14  ;;  %v447_v54 = vrot.slane %v445_v44, 1  ;;  %v324_v5 = vrot.slane %v322_v55, 1  ;;  %v3318_v9 = vsel %vm559_vm2, %v531_v62, %v547_v63  ;;  %v2201_v14 = vcombine.low %v184_v59, %v184_v59  ;;  %v191_v59 = vld [vmem:[%s3157_s27 + $0x4c] sm:$0xf]  ;;  %v3008_v63 = vld [vmem:[%s3859_s1 + $0x1c0] sm:$0xff]  }
  0x32   : > { %2629 = vmatpush3.bf16.msra.mxu0 %v2961_v12  ;;  %v451_v10 = vrot.slane %v449_v1, 1  ;;  %v329_v12 = vshll.u32 %v3300_v2, 16  ;;  %v534_v1 = vrot.slane %v3332_v23, 1 }
  0x33   : > { %2729 = vmatpush3.bf16.msra.mxu1 %v2965_v21  ;;  %2630 = vmatprep.subr.bf16.mxu0 %v2966_v24  ;;  %v3307_v4 = vsel %vm3180_vm3, %v318_v58, %v447_v54  ;;  %v325_v17 = vor.u32 %v324_v5, %v320_v0  ;;  %v548_v21 = vrot.slane %v2200_v56, 1  ;;  %v453_v22 = vshll.u32 %v2201_v14, 16  ;;  %v3005_v54 = vld [vmem:[%s3859_s1 + $0x100] sm:$0xff]   ;;  %v190_v58 = vld [vmem:[%s3157_s27 + $0x48] sm:$0xf] }
  0x34   : > { %2730 = vmatprep.subr.bf16.mxu1 %v2970_v31  ;;  %v2202_v31 = vcombine.low %v186_v15, %v186_v15  ;;  %v549_v44 = vrot.slane %v2201_v14, 1  ;;  %v3009_v0 = vld [vmem:[%s3859_s1 + $0x180] sm:$0xff]   ;;  %v3405_v14 = vcombine.low %v190_v58, %v191_v59 }
  0x35   : > { %1264 = vmatmul.mubr.bf16.gmra.mxu0 %v3169_v38  ;;  %v2974_v38 = vld [vmem:[%s3859_s1 + $0x160] sm:$0xff]   ;;  %v3336_v24 = vsel %vm3180_vm3, %v325_v17, %v451_v10  ;;  %v3351_v34 = vsel %vm559_vm2, %v532_v19, %v548_v21  ;;  %v455_v35 = vrot.slane %v453_v22, 1  ;;  %v2204_v19 = vcombine.low %v190_v58, %v190_v58  ;;  %v193_v21 = vld [vmem:[%s3157_s27 + $0x54] sm:$0xf] }
  0x36   : > { %1409 = vmatmul.mubr.bf16.gmra.mxu1 %v3219_v13  ;;  %1271 = vmatprep.mubr.bf16.mxu0 %v3242_v27  ;;  %v3381_v56 = vsel %vm559_vm2, %v533_v43, %v549_v44  ;;  %v550_v5 = vrot.slane %v2202_v31, 1  ;;  %v350_v18 = vshll.u32 %v3405_v14, 16 }
  0x37   : > { %1416 = vmatprep.mubr.bf16.mxu1 %v3212_v11  ;;  %2631 = vmatpush3.bf16.msra.mxu0 %v2967_v26  ;;  %v331_v26 = vrot.slane %v329_v12, 1  ;;  %v552_v43 = vrot.slane %v2204_v19, 1 }
  0x38   : > { %2731 = vmatpush3.bf16.msra.mxu1 %v2971_v32  ;;  %2632 = vmatprep.subr.bf16.mxu0 %v2974_v38  ;;  %v2997_v32 = vld [vmem:[%s3859_s1 + $0x108] sm:$0xff]   ;;  %v3412_v15 = vsel %vm559_vm2, %v534_v1, %v550_v5 }
  0x39   : > { %2732 = vmatprep.subr.bf16.mxu1 %v2978_v49  ;;  %v332_v39 = vor.u32 %v331_v26, %v327_v25  ;;  %v3000_v38 = vld [vmem:[%s3859_s1 + $0x1c8] sm:$0xff]   ;;  %v338_v49 = vrot.slane %v336_v36, 1  ;;  %v348_v26 = vshrl.u32 %v3405_v14, 16 }
  0x3b   : > { %2633 = vmatpush3.bf16.msra.mxu0 %v2975_v41  ;;  %v457_v41 = vshll.u32 %v2202_v31, 16  ;;  %v3368_v48 = vsel %vm3180_vm3, %v332_v39, %v455_v35  ;;  %v339_v60 = vor.u32 %v338_v49, %v334_v47  ;;  %v465_v31 = vshll.u32 %v2204_v19, 16 }
  0x3c   : > { %2733 = vmatpush3.bf16.msra.mxu1 %v2979_v50  ;;  %2634 = vmatprep.subr.bf16.mxu0 %v2982_v51  ;;  %v3370_v50 = vcombine.low %v188_v37, %v189_v40  ;;  %v3004_v51 = vld [vmem:[%s3859_s1 + $0x140] sm:$0xff]  }
  0x3d   : > { %1272 = vmatmul.mubr.bf16.gmra.mxu0 %v3190_v61  ;;  %2734 = vmatprep.subr.bf16.mxu1 %v2986_v3  ;;  %v459_v55 = vrot.slane %v457_v41, 1  ;;  %v3397_v3 = vld [vmem:[%s3859_s1 + $0x238] sm:$0xff]  }
  0x3e   : > { %1417 = vmatmul.mubr.bf16.gmra.mxu1 %v3255_v33  ;;  %1279 = vmatprep.mubr.bf16.mxu0 %v3273_v46  ;;  %v343_v62 = vshll.u32 %v3370_v50, 16  ;;  %v341_v10 = vshrl.u32 %v3370_v50, 16  ;;  %v535_v22 = vrot.slane %v3370_v50, 1  ;;  %v195_v41 = vld [vmem:[%s3157_s27 + $0x5c] sm:$0xf] }
  0x3f   : > { %1424 = vmatprep.mubr.bf16.mxu1 %v3244_v30  ;;  %2635 = vmatpush3.bf16.msra.mxu0 %v2983_v57  ;;  %v2203_v57 = vcombine.low %v188_v37, %v188_v37  ;;  %v467_v37 = vrot.slane %v465_v31, 1 }
  0x40   : > { %2735 = vmatpush3.bf16.msra.mxu1 %v2987_v6  ;;  %2636 = vmatprep.subr.bf16.mxu0 %v2988_v8  ;;  %v3402_v8 = vsel %vm3180_vm3, %v339_v60, %v459_v55  ;;  %v345_v12 = vrot.slane %v343_v62, 1  ;;  %v196_v62 = vld [vmem:[%s3157_s27 + $0x60] sm:$0xf] }
  0x41   : > { %2736 = vmatprep.subr.bf16.mxu1 %v2992_v20  ;;  %v461_v6 = vshll.u32 %v2203_v57, 16  ;;  %v192_v20 = vld [vmem:[%s3157_s27 + $0x50] sm:$0xf]  ;;  %v551_v25 = vrot.slane %v2203_v57, 1 }
  0x42   : > { %v2205_v40 = vcombine.low %v192_v20, %v192_v20 }
  0x43   : > { %2637 = vmatpush3.bf16.msra.mxu0 %v2991_v16  ;;  %v346_v16 = vor.u32 %v345_v12, %v341_v10  ;;  %v463_v17 = vrot.slane %v461_v6, 1  ;;  %v3430_v35 = vsel %vm559_vm2, %v535_v22, %v551_v25  ;;  %v198_v22 = vld [vmem:[%s3157_s27 + $0x68] sm:$0xf]  ;;  %v199_v25 = vld [vmem:[%s3157_s27 + $0x6c] sm:$0xf] }
  0x44   : > { %2737 = vmatpush3.bf16.msra.mxu1 %v2995_v28  ;;  %2638 = vmatprep.subr.bf16.mxu0 %v2996_v29  ;;  %v352_v29 = vrot.slane %v350_v18, 1  ;;  %v553_v1 = vrot.slane %v2205_v40, 1 }
  0x45   : > { %1280 = vmatmul.mubr.bf16.gmra.mxu0 %v3212_v11  ;;  %2738 = vmatprep.subr.bf16.mxu1 %v3000_v38  ;;  %v3423_v28 = vsel %vm3180_vm3, %v346_v16, %v463_v17  ;;  %v194_v38 = vld [vmem:[%s3157_s27 + $0x58] sm:$0xf] }
  0x46   : > { %1425 = vmatmul.mubr.bf16.gmra.mxu1 %v3288_v53  ;;  %1287 = vmatprep.mubr.bf16.mxu0 %v3307_v4  ;;  %v353_v36 = vor.u32 %v352_v29, %v348_v26  ;;  %v2206_v60 = vcombine.low %v194_v38, %v194_v38 }
  0x47   : > { %1432 = vmatprep.mubr.bf16.mxu1 %v3269_v45  ;;  %2639 = vmatpush3.bf16.msra.mxu0 %v2997_v32  ;;  %v3425_v32 = vcombine.low %v192_v20, %v193_v21  ;;  %v2207_v21 = vcombine.low %v196_v62, %v196_v62 }
  0x48   : > { %2739 = vmatpush3.bf16.msra.mxu1 %v3001_v42  ;;  %2640 = vmatprep.subr.bf16.mxu0 %v3004_v51  ;;  %v536_v42 = vrot.slane %v3405_v14, 1  ;;  %v3441_v47 = vsel %vm3180_vm3, %v353_v36, %v467_v37  ;;  %v469_v51 = vshll.u32 %v2205_v40, 16  ;;  %v473_v12 = vshll.u32 %v2206_v60, 16 }
  0x49   : > { %2740 = vmatprep.subr.bf16.mxu1 %v3008_v63  ;;  %v357_v39 = vshll.u32 %v3425_v32, 16  ;;  %v355_v44 = vshrl.u32 %v3425_v32, 16  ;;  %v197_v63 = vld [vmem:[%s3157_s27 + $0x64] sm:$0xf]  ;;  %v554_v29 = vrot.slane %v2206_v60, 1  ;;  %v3479_v40 = vcombine.low %v198_v22, %v199_v25 }
  0x4a   : > { %v3448_v55 = vsel %vm559_vm2, %v536_v42, %v552_v43  ;;  %v471_v58 = vrot.slane %v469_v51, 1  ;;  %v3461_v16 = vcombine.low %v196_v62, %v197_v63  ;;  %v475_v19 = vrot.slane %v473_v12, 1  ;;  %v3496_v62 = vld [vmem:[%s3157_s27 + $0x70] sm:$0xf]  ;;  %v201_v63 = vld [vmem:[%s3157_s27 + $0x74] sm:$0xf] }
  0x4b   : > { %2641 = vmatpush3.bf16.msra.mxu0 %v3005_v54  ;;  %v359_v49 = vrot.slane %v357_v39, 1  ;;  %v3443_v54 = vcombine.low %v194_v38, %v195_v41  ;;  %v477_v39 = vshll.u32 %v2207_v21, 16  ;;  %v2208_v41 = vcombine.low %v198_v22, %v198_v22  ;;  %v3012_v22 = vld [vmem:[%s3859_s1 + $0x228] sm:$0xff]  }
  0x4c   : > { %2741 = vmatpush3.bf16.msra.mxu1 %v3009_v0  ;;  %2848 = vmatprep.subr.bf16.mxu0 %v3397_v3  ;;  %v537_v0 = vrot.slane %v3425_v32, 1  ;;  %v371_v20 = vshll.u32 %v3461_v16, 16  ;;  %v369_v31 = vshrl.u32 %v3461_v16, 16  ;;  %v555_v51 = vrot.slane %v2207_v21, 1  ;;  %v3011_v21 = vld [vmem:[%s3859_s1 + $0x230] sm:$0xff]  }
  0x4d   : > { %1288 = vmatmul.mubr.bf16.gmra.mxu0 %v3244_v30  ;;  %2892 = vmatprep.subr.bf16.mxu1 %v3397_v3  ;;  %v360_v57 = vor.u32 %v359_v49, %v355_v44  ;;  %v364_v59 = vshll.u32 %v3443_v54, 16  ;;  %v362_v5 = vshrl.u32 %v3443_v54, 16  ;;  %v538_v26 = vrot.slane %v3443_v54, 1 }
  0x4e   : > { %1433 = vmatmul.mubr.bf16.gmra.mxu1 %v3318_v9  ;;  %1295 = vmatprep.mubr.bf16.mxu0 %v3336_v24  ;;  %v3466_v17 = vsel %vm559_vm2, %v537_v0, %v553_v1  ;;  %v373_v37 = vrot.slane %v371_v20, 1  ;;  %v479_v43 = vrot.slane %v477_v39, 1  ;;  %v378_v44 = vshll.u32 %v3479_v40, 16 }
  0x4f   : > { %1440 = vmatprep.mubr.bf16.mxu1 %v3300_v2  ;;  %v3459_v6 = vsel %vm3180_vm3, %v360_v57, %v471_v58  ;;  %v366_v10 = vrot.slane %v364_v59, 1  ;;  %v3484_v38 = vsel %vm559_vm2, %v538_v26, %v554_v29  ;;  %v539_v49 = vrot.slane %v3461_v16, 1 }
  0x50   : > { %v374_v42 = vor.u32 %v373_v37, %v369_v31  ;;  %v481_v57 = vshll.u32 %v2208_v41, 16  ;;  %v376_v59 = vshrl.u32 %v3479_v40, 16  ;;  %v380_v60 = vrot.slane %v378_v44, 1 }
  0x51   : > { %v367_v18 = vor.u32 %v366_v10, %v362_v5  ;;  %v3502_v0 = vsel %vm559_vm2, %v539_v49, %v555_v51  ;;  %v3505_v1 = vcombine.low %v3496_v62, %v201_v63  ;;  %v540_v12 = vrot.slane %v3479_v40, 1 }
  0x52   : > { %v3492_v58 = vsel %vm3180_vm3, %v374_v42, %v479_v43  ;;  %v381_v5 = vor.u32 %v380_v60, %v376_v59  ;;  %v483_v10 = vrot.slane %v481_v57, 1 }
  0x53   : > { %v3477_v36 = vsel %vm3180_vm3, %v367_v18, %v475_v19  ;;  %v556_v18 = vrot.slane %v2208_v41, 1 }
  0x54   : > { %v3512_v19 = vsel %vm3180_vm3, %v381_v5, %v483_v10 }
  0x55   : > { %1296 = vmatmul.mubr.bf16.gmra.mxu0 %v3269_v45  ;;  %v3517_v20 = vsel %vm559_vm2, %v540_v12, %v556_v18 }
  0x56   : > { %1441 = vmatmul.mubr.bf16.gmra.mxu1 %v3351_v34  ;;  %1303 = vmatprep.mubr.bf16.mxu0 %v3368_v48 }
  0x57   : > { %1448 = vmatprep.mubr.bf16.mxu1 %v3332_v23 }
  0x5d   : > { %1304 = vmatmul.mubr.bf16.gmra.mxu0 %v3300_v2 }
  0x5e   : > { %1449 = vmatmul.mubr.bf16.gmra.mxu1 %v3381_v56  ;;  %1311 = vmatprep.mubr.bf16.mxu0 %v3402_v8 }
  0x5f   : > { %1456 = vmatprep.mubr.bf16.mxu1 %v3370_v50 }
  0x65   : > { %1312 = vmatmul.mubr.bf16.gmra.mxu0 %v3332_v23 }
  0x66   : > { %1457 = vmatmul.mubr.bf16.gmra.mxu1 %v3412_v15  ;;  %1319 = vmatprep.mubr.bf16.mxu0 %v3423_v28 }
  0x67   : > { %1464 = vmatprep.mubr.bf16.mxu1 %v3405_v14 }
  0x6d   : > { %1320 = vmatmul.mubr.bf16.gmra.mxu0 %v3370_v50 }
  0x6e   : > { %1465 = vmatmul.mubr.bf16.gmra.mxu1 %v3430_v35  ;;  %1327 = vmatprep.mubr.bf16.mxu0 %v3441_v47 }
  0x6f   : > { %1472 = vmatprep.mubr.bf16.mxu1 %v3425_v32 }
  0x75   : > { %1328 = vmatmul.mubr.bf16.gmra.mxu0 %v3405_v14 }
  0x76   : > { %1473 = vmatmul.mubr.bf16.gmra.mxu1 %v3448_v55  ;;  %1335 = vmatprep.mubr.bf16.mxu0 %v3459_v6 }
  0x77   : > { %1480 = vmatprep.mubr.bf16.mxu1 %v3443_v54 }
  0x7d   : > { %1336 = vmatmul.mubr.bf16.gmra.mxu0 %v3425_v32 }
  0x7e   : > { %1481 = vmatmul.mubr.bf16.gmra.mxu1 %v3466_v17  ;;  %1343 = vmatprep.mubr.bf16.mxu0 %v3477_v36 }
  0x7f   : > { %1488 = vmatprep.mubr.bf16.mxu1 %v3461_v16 }
  0x85   : > { %1344 = vmatmul.mubr.bf16.gmra.mxu0 %v3443_v54 }
  0x86   : > { %1489 = vmatmul.mubr.bf16.gmra.mxu1 %v3484_v38  ;;  %1351 = vmatprep.mubr.bf16.mxu0 %v3492_v58 }
  0x87   : > { %1496 = vmatprep.mubr.bf16.mxu1 %v3479_v40 }
  0x8d   : > { %1352 = vmatmul.mubr.bf16.gmra.mxu0 %v3461_v16 }
  0x8e   : > { %1497 = vmatmul.mubr.bf16.gmra.mxu1 %v3502_v0  ;;  %1359 = vmatprep.mubr.bf16.mxu0 %v3512_v19 }
  0x8f   : > { %1504 = vmatprep.mubr.bf16.mxu1 %v3505_v1 }
  0x95   : > { %1360 = vmatmul.mubr.bf16.gmra.mxu0 %v3479_v40 }
  0x96   : > { %1505 = vmatmul.mubr.bf16.gmra.mxu1 %v3517_v20  ;;  %1545 = vmatprep.mubr.bf16.mxu0 %v3219_v13  ;;  %v3016_v13 = vld [vmem:[%s3859_s1 + $0x208] sm:$0xff]  }
  0x97   : > { %1690 = vmatprep.mubr.bf16.mxu1 %v3242_v27 }
  0x9d   : > { %1546 = vmatmul.mubr.bf16.vlgmr.msra.gmra.mxu0 %v3208_v7  ;;  %v3014_v7 = vld [vmem:[%s3859_s1 + $0x218] sm:$0xff]  }
  0x9e   : > { %1691 = vmatmul.mubr.bf16.vlgmr.msra.gmra.mxu1 %v3190_v61  ;;  %2849 = vmatpush3.bf16.msra.mxu0 %v3397_v3  ;;  %v3013_v61 = vld [vmem:[%s3859_s1 + $0x220] sm:$0xff]  }
  0x9f   : > { %1698 = vmatprep.mubr.bf16.mxu1 %v3273_v46  ;;  %2900 = vmatpush3.bf16.msra.mxu1 %v3397_v3 }
  0xa0   : > { %2893 = vmatprep.subr.bf16.mxu1 %v3011_v21  ;;  %1553 = vmatprep.mubr.bf16.mxu0 %v3255_v33 }
  0xa1   : > { %2850 = vmatprep.subr.bf16.mxu0 %v3011_v21 }
  0xa2   : > { %2851 = vmatpush3.bf16.msra.mxu0 %v3011_v21 }
  0xa3   : > { %2901 = vmatpush3.bf16.msra.mxu1 %v3011_v21  ;;  %2852 = vmatprep.subr.bf16.mxu0 %v3012_v22  ;;  %v541_v21 = vrot.slane %v3505_v1, 1 }
  0xa4   : > { %2894 = vmatprep.subr.bf16.mxu1 %v3012_v22 }
  0xa5   : > { %1554 = vmatmul.mubr.bf16.gmra.mxu0 %v3242_v27  ;;  %v3018_v27 = vld [vmem:[%s3859_s1 + $0x200] sm:$0xff]  }
  0xa6   : > { %1699 = vmatmul.mubr.bf16.gmra.mxu1 %v3212_v11  ;;  %1561 = vmatprep.mubr.bf16.mxu0 %v3288_v53  ;;  %v3015_v11 = vld [vmem:[%s3859_s1 + $0x210] sm:$0xff]  }
  0xa7   : > { %1706 = vmatprep.mubr.bf16.mxu1 %v3307_v4  ;;  %2902 = vmatpush3.bf16.msra.mxu1 %v3012_v22 }
  0xa8   : > { %2895 = vmatprep.subr.bf16.mxu1 %v3013_v61  ;;  %2853 = vmatpush3.bf16.msra.mxu0 %v3012_v22 }
  0xa9   : > { %2854 = vmatprep.subr.bf16.mxu0 %v3013_v61 }
  0xab   : > { %2903 = vmatpush3.bf16.msra.mxu1 %v3013_v61 }
  0xac   : > { %2896 = vmatprep.subr.bf16.mxu1 %v3014_v7  ;;  %2855 = vmatpush3.bf16.msra.mxu0 %v3013_v61 }
  0xad   : > { %2856 = vmatprep.subr.bf16.mxu0 %v3014_v7  ;;  %1562 = vmatmul.mubr.bf16.gmra.mxu0 %v3273_v46  ;;  %v202_v46 = vld [vmem:[%s3157_s27 + $0x78] sm:$0xf] }
  0xae   : > { %1707 = vmatmul.mubr.bf16.gmra.mxu1 %v3244_v30  ;;  %1569 = vmatprep.mubr.bf16.mxu0 %v3318_v9  ;;  %v385_v30 = vshll.u32 %v3505_v1, 16 }
  0xaf   : > { %1714 = vmatprep.mubr.bf16.mxu1 %v3336_v24  ;;  %2904 = vmatpush3.bf16.msra.mxu1 %v3014_v7 }
  0xb0   : > { %2897 = vmatprep.subr.bf16.mxu1 %v3015_v11  ;;  %2857 = vmatpush3.bf16.msra.mxu0 %v3014_v7 }
  0xb1   : > { %2858 = vmatprep.subr.bf16.mxu0 %v3015_v11 }
  0xb3   : > { %2905 = vmatpush3.bf16.msra.mxu1 %v3015_v11 }
  0xb4   : > { %2898 = vmatprep.subr.bf16.mxu1 %v3016_v13  ;;  %2859 = vmatpush3.bf16.msra.mxu0 %v3015_v11 }
  0xb5   : > { %2860 = vmatprep.subr.bf16.mxu0 %v3016_v13  ;;  %1570 = vmatmul.mubr.bf16.gmra.mxu0 %v3307_v4  ;;  %v383_v4 = vshrl.u32 %v3505_v1, 16 }
  0xb6   : > { %1715 = vmatmul.mubr.bf16.gmra.mxu1 %v3269_v45  ;;  %1577 = vmatprep.mubr.bf16.mxu0 %v3351_v34  ;;  %v3587_v45 = vcombine.low %v3496_v62, %v3496_v62 }
  0xb7   : > { %1722 = vmatprep.mubr.bf16.mxu1 %v3368_v48  ;;  %2906 = vmatpush3.bf16.msra.mxu1 %v3016_v13 }
  0xb8   : > { %2899 = vmatprep.subr.bf16.mxu1 %v3018_v27  ;;  %2861 = vmatpush3.bf16.msra.mxu0 %v3016_v13  ;;  %v557_v22 = vrot.slane %v3587_v45, 1 }
  0xb9   : > { %2862 = vmatprep.subr.bf16.mxu0 %v3018_v27 }
  0xbb   : > { %2907 = vmatpush3.bf16.msra.mxu1 %v3018_v27 }
  0xbc   : > { %2863 = vmatpush3.bf16.msra.mxu0 %v3018_v27 }
  0xbd   : > { %1578 = vmatmul.mubr.bf16.gmra.mxu0 %v3336_v24  ;;  %v485_v24 = vshll.u32 %v3587_v45, 16 }
  0xbe   : > { %1723 = vmatmul.mubr.bf16.gmra.mxu1 %v3300_v2  ;;  %1585 = vmatprep.mubr.bf16.mxu0 %v3381_v56  ;;  %v203_v2 = vld [vmem:[%s3157_s27 + $0x7c] sm:$0xf] }
  0xbf   : > { %1730 = vmatprep.mubr.bf16.mxu1 %v3402_v8 }
  0xc5   : > { %1586 = vmatmul.mubr.bf16.gmra.mxu0 %v3368_v48  ;;  %v3595_v48 = vcombine.low %v202_v46, %v203_v2 }
  0xc6   : > { %1731 = vmatmul.mubr.bf16.gmra.mxu1 %v3332_v23  ;;  %1593 = vmatprep.mubr.bf16.mxu0 %v3412_v15  ;;  %v387_v23 = vrot.slane %v385_v30, 1 }
  0xc7   : > { %1738 = vmatprep.mubr.bf16.mxu1 %v3423_v28  ;;  %v390_v31 = vshrl.u32 %v3595_v48, 16 }
  0xcd   : > { %1594 = vmatmul.mubr.bf16.gmra.mxu0 %v3402_v8  ;;  %v388_v8 = vor.u32 %v387_v23, %v383_v4  ;;  %v618_v4 = vsel %vm559_vm2, %v541_v21, %v557_v22 }
  0xce   : > { %1739 = vmatmul.mubr.bf16.gmra.mxu1 %v3370_v50  ;;  %1601 = vmatprep.mubr.bf16.mxu0 %v3430_v35 }
  0xcf   : > { %1746 = vmatprep.mubr.bf16.mxu1 %v3441_v47 }
  0xd5   : > { %1602 = vmatmul.mubr.bf16.gmra.mxu0 %v3423_v28  ;;  %v392_v28 = vshll.u32 %v3595_v48, 16 }
  0xd6   : > { %1747 = vmatmul.mubr.bf16.gmra.mxu1 %v3405_v14  ;;  %1609 = vmatprep.mubr.bf16.mxu0 %v3448_v55  ;;  %v487_v14 = vrot.slane %v485_v24, 1 }
  0xd7   : > { %1754 = vmatprep.mubr.bf16.mxu1 %v3459_v6  ;;  %v394_v37 = vrot.slane %v392_v28, 1 }
  0xd8   : > { %v525_v29 = vsel %vm3180_vm3, %v388_v8, %v487_v14 }
  0xd9   : > { %v395_v57 = vor.u32 %v394_v37, %v390_v31 }
  0xdd   : > { %1610 = vmatmul.mubr.bf16.gmra.mxu0 %v3441_v47 }
  0xde   : > { %1755 = vmatmul.mubr.bf16.gmra.mxu1 %v3425_v32  ;;  %1617 = vmatprep.mubr.bf16.mxu0 %v3466_v17  ;;  %v3600_v32 = vcombine.low %v202_v46, %v202_v46 }
  0xdf   : > { %1762 = vmatprep.mubr.bf16.mxu1 %v3477_v36 }
  0xe0   : > { %v489_v39 = vshll.u32 %v3600_v32, 16 }
  0xe2   : > { %v491_v59 = vrot.slane %v489_v39, 1 }
  0xe4   : > { %v526_v61 = vsel %vm3180_vm3, %v395_v57, %v491_v59 }
  0xe5   : > { %1618 = vmatmul.mubr.bf16.gmra.mxu0 %v3459_v6 }
  0xe6   : > { %1763 = vmatmul.mubr.bf16.gmra.mxu1 %v3443_v54  ;;  %1625 = vmatprep.mubr.bf16.mxu0 %v3484_v38 }
  0xe7   : > { %1770 = vmatprep.mubr.bf16.mxu1 %v3492_v58 }
  0xed   : > { %v2442_v54 = vpop.f32.mrf.mxu0  ;;  %1626 = vmatmul.mubr.bf16.gmra.mxu0 %v3477_v36 }
  0xee   : > { %v2542_v50 = vpop.f32.mrf.mxu1  ;;  %1771 = vmatmul.mubr.bf16.gmra.mxu1 %v3461_v16  ;;  %1633 = vmatprep.mubr.bf16.mxu0 %v3502_v0  ;;  %v3607_v16 = vld [vmem:[%s3860_s2] ss:$0 sm:$0xff] }
  0xef   : > { %1778 = vmatprep.mubr.bf16.mxu1 %v3512_v19  ;;  %v2443_v25 = vpop.f32.mrf.mxu0 }
  0xf0   : > { %v2543_v3 = vpop.f32.mrf.mxu1  ;;  %v2444_v41 = vadd.f32 %v2443_v25, %v2442_v54 }
  0xf1   : > { %v2544_v47 = vadd.f32 %v2543_v3, %v2542_v50  ;;  %v2445_v42 = vpop.f32.mrf.mxu0 }
  0xf2   : > { %v2545_v6 = vpop.f32.mrf.mxu1  ;;  %v1258_v44 = vadd.f32 %v2444_v41, %v3607_v16 }
  0xf3   : > { %v2446_v49 = vpop.f32.mrf.mxu0 }
  0xf4   : > { %v2546_v26 = vpop.f32.mrf.mxu1  ;;  %v3615_v60 = vadd.f32 %v2544_v47, %v1258_v44  ;;  %v2447_v62 = vadd.f32 %v2446_v49, %v2445_v42 }
  0xf5   : > { %v2547_v36 = vadd.f32 %v2546_v26, %v2545_v6  ;;  %v2448_v5 = vpop.f32.mrf.mxu0  ;;  %1634 = vmatmul.mubr.bf16.gmra.mxu0 %v3492_v58 }
  0xf6   : > { %v2548_v43 = vpop.f32.mrf.mxu1  ;;  %1779 = vmatmul.mubr.bf16.gmra.mxu1 %v3479_v40  ;;  %v1261_v12 = vadd.f32 %v2447_v62, %v3607_v16  ;;  %1641 = vmatprep.mubr.bf16.mxu0 %v3517_v20 }
  0xf7   : > { %1786 = vmatprep.mubr.bf16.mxu1 %v525_v29  ;;  %v2449_v40 = vpop.f32.mrf.mxu0 }
  0xf8   : > { %v2549_v51 = vpop.f32.mrf.mxu1  ;;  %v3624_v7 = vadd.f32 %v2547_v36, %v1261_v12  ;;  %v2450_v11 = vadd.f32 %v2449_v40, %v2448_v5 }
  0xf9   : > { %v2550_v63 = vadd.f32 %v2549_v51, %v2548_v43  ;;  %v2451_v27 = vpop.f32.mrf.mxu0 }
  0xfa   : > { %v2551_v10 = vpop.f32.mrf.mxu1  ;;  %v1266_v30 = vadd.f32 %v2450_v11, %v3607_v16 }
  0xfb   : > { %v2452_v46 = vpop.f32.mrf.mxu0 }
  0xfc   : > { %v2552_v18 = vpop.f32.mrf.mxu1  ;;  %v3629_v23 = vadd.f32 %v2550_v63, %v1266_v30  ;;  %v2453_v45 = vadd.f32 %v2452_v46, %v2451_v27 }
  0xfd   : > { %v2553_v13 = vadd.f32 %v2552_v18, %v2551_v10  ;;  %v2454_v24 = vpop.f32.mrf.mxu0  ;;  %1642 = vmatmul.mubr.bf16.gmra.mxu0 %v3512_v19 }
  0xfe   : > { %v2554_v58 = vpop.f32.mrf.mxu1  ;;  %1787 = vmatmul.mubr.bf16.gmra.mxu1 %v3505_v1  ;;  %v1269_v3 = vadd.f32 %v2453_v45, %v3607_v16  ;;  %1649 = vmatprep.mubr.bf16.mxu0 %v618_v4 }
  0xff   : > { %1794 = vmatprep.mubr.bf16.mxu1 %v526_v61  ;;  %v2455_v8 = vpop.f32.mrf.mxu0 }
 0x100   : > { %v2555_v2 = vpop.f32.mrf.mxu1  ;;  %v3633_v14 = vadd.f32 %v2553_v13, %v1269_v3  ;;  %v2456_v28 = vadd.f32 %v2455_v8, %v2454_v24 }
 0x101   : > { %v2556_v52 = vadd.f32 %v2555_v2, %v2554_v58  ;;  %v2457_v54 = vpop.f32.mrf.mxu0  ;;  %v558_v58 = vrot.slane %v3600_v32, 1 }
 0x102   : > { %v2557_v50 = vpop.f32.mrf.mxu1  ;;  %v1274_v25 = vadd.f32 %v2456_v28, %v3607_v16 }
 0x103   : > { %v2458_v26 = vpop.f32.mrf.mxu0 }
 0x104   : > { %v2558_v1 = vpop.f32.mrf.mxu1  ;;  %v3638_v31 = vadd.f32 %v2556_v52, %v1274_v25  ;;  %v2459_v37 = vadd.f32 %v2458_v26, %v2457_v54 }
 0x105   : > { %v2559_v47 = vadd.f32 %v2558_v1, %v2557_v50  ;;  %v2460_v41 = vpop.f32.mrf.mxu0  ;;  %1650 = vmatmul.mubr.bf16.gmra.mxu0 %v525_v29 }
 0x106   : > { %v2560_v6 = vpop.f32.mrf.mxu1  ;;  %1795 = vmatmul.mubr.bf16.gmra.mxu1 %v3595_v48  ;;  %v1277_v42 = vadd.f32 %v2459_v37, %v3607_v16  ;;  %2864 = vmatprep.mubr.bf16.mxu0 %v3255_v33 }
 0x107   : > { %2880 = vmatprep.mubr.bf16.mxu1 %v3466_v17  ;;  %v2461_v43 = vpop.f32.mrf.mxu0 }
 0x108   : > { %v2561_v19 = vpop.f32.mrf.mxu1  ;;  %v3642_v49 = vadd.f32 %v2559_v47, %v1277_v42  ;;  %v2462_v51 = vadd.f32 %v2461_v43, %v2460_v41 }
 0x109   : > { %v2562_v39 = vadd.f32 %v2561_v19, %v2560_v6  ;;  %v2463_v17 = vpop.f32.mrf.mxu0 }
 0x10a   : > { %v2563_v36 = vpop.f32.mrf.mxu1  ;;  %v1282_v62 = vadd.f32 %v2462_v51, %v3607_v16 }
 0x10b   : > { %v2464_v29 = vpop.f32.mrf.mxu0 }
 0x10c   : > { %v2564_v44 = vpop.f32.mrf.mxu1  ;;  %v3647_v5 = vadd.f32 %v2562_v39, %v1282_v62  ;;  %v2465_v10 = vadd.f32 %v2464_v29, %v2463_v17 }
 0x10d   : > { %v2565_v57 = vadd.f32 %v2564_v44, %v2563_v36  ;;  %v2466_v12 = vpop.f32.mrf.mxu0  ;;  %2865 = vmatmul.mubr.bf16.vlgmr.msra.gmra.mxu0 %v3288_v53  ;;  %v542_v53 = vrot.slane %v3595_v48, 1 }
 0x10e   : > { %v2566_v59 = vpop.f32.mrf.mxu1  ;;  %2881 = vmatmul.mubr.bf16.vlgmr.msra.gmra.mxu1 %v3484_v38  ;;  %v1285_v18 = vadd.f32 %v2465_v10, %v3607_v16  ;;  %2868 = vmatprep.mubr.bf16.mxu0 %v3318_v9 }
 0x10f   : > { %2884 = vmatprep.mubr.bf16.mxu1 %v3502_v0  ;;  %v2467_v21 = vpop.f32.mrf.mxu0 }
 0x110   : > { %v2567_v63 = vpop.f32.mrf.mxu1  ;;  %v3652_v22 = vadd.f32 %v2565_v57, %v1285_v18  ;;  %v2468_v61 = vadd.f32 %v2467_v21, %v2466_v12 }
 0x111   : > { %v2568_v33 = vadd.f32 %v2567_v63, %v2566_v59  ;;  %v2469_v11 = vpop.f32.mrf.mxu0 }
 0x112   : > { %v2569_v40 = vpop.f32.mrf.mxu1  ;;  %v1290_v27 = vadd.f32 %v2468_v61, %v3607_v16 }
 0x113   : > { %v2470_v30 = vpop.f32.mrf.mxu0 }
 0x114   : > { %v2570_v38 = vpop.f32.mrf.mxu1  ;;  %v3658_v9 = vadd.f32 %v2568_v33, %v1290_v27  ;;  %v2471_v2 = vadd.f32 %v2470_v30, %v2469_v11 }
 0x115   : > { %v2571_v0 = vadd.f32 %v2570_v38, %v2569_v40  ;;  %v2472_v52 = vpop.f32.mrf.mxu0  ;;  %2869 = vmatmul.mubr.bf16.gmra.mxu0 %v3351_v34 }
 0x116   : > { %v2572_v13 = vpop.f32.mrf.mxu1  ;;  %2885 = vmatmul.mubr.bf16.gmra.mxu1 %v3517_v20  ;;  %v1293_v50 = vadd.f32 %v2471_v2, %v3607_v16  ;;  %2872 = vmatprep.mubr.bf16.mxu0 %v3381_v56  ;;  %v622_v20 = vsel %vm559_vm2, %v542_v53, %v558_v58 }
 0x117   : > { %2888 = vmatprep.mubr.bf16.mxu1 %v618_v4  ;;  %v2473_v4 = vpop.f32.mrf.mxu0 }
 0x118   : > { %v2573_v46 = vpop.f32.mrf.mxu1  ;;  %v3664_v3 = vadd.f32 %v2571_v0, %v1293_v50  ;;  %v2474_v32 = vadd.f32 %v2473_v4, %v2472_v52 }
 0x119   : > { %v2574_v45 = vadd.f32 %v2573_v46, %v2572_v13  ;;  %v2475_v1 = vpop.f32.mrf.mxu0 }
 0x11a   : > { %v2575_v24 = vpop.f32.mrf.mxu1  ;;  %v1298_v47 = vadd.f32 %v2474_v32, %v3607_v16 }
 0x11b   : > { %v2476_v54 = vpop.f32.mrf.mxu0 }
 0x11c   : > { %v2576_v48 = vpop.f32.mrf.mxu1  ;;  %v3667_v6 = vadd.f32 %v2574_v45, %v1298_v47  ;;  %v2477_v25 = vadd.f32 %v2476_v54, %v2475_v1 }
 0x11d   : > { %v2577_v8 = vadd.f32 %v2576_v48, %v2575_v24  ;;  %v2478_v56 = vpop.f32.mrf.mxu0  ;;  %2873 = vmatmul.mubr.bf16.gmra.mxu0 %v3412_v15 }
 0x11e   : > { %v2578_v28 = vpop.f32.mrf.mxu1  ;;  %2889 = vmatmul.mubr.bf16.gmra.mxu1 %v622_v20  ;;  %v1301_v37 = vadd.f32 %v2477_v25, %v3607_v16  ;;  %2876 = vmatprep.mubr.bf16.mxu0 %v3430_v35 }
 0x11f   : > { %v2479_v39 = vpop.f32.mrf.mxu0 }
 0x120   : > { %v2579_v34 = vpop.f32.mrf.mxu1  ;;  %v3672_v36 = vadd.f32 %v2577_v8, %v1301_v37  ;;  %v2480_v42 = vadd.f32 %v2479_v39, %v2478_v56 }
 0x121   : > { %v2580_v26 = vadd.f32 %v2579_v34, %v2578_v28  ;;  %v2481_v44 = vpop.f32.mrf.mxu0 }
 0x122   : > { %v2581_v19 = vpop.f32.mrf.mxu1  ;;  %v1306_v57 = vadd.f32 %v2480_v42, %v3607_v16 }
 0x123   : > { %v2482_v17 = vpop.f32.mrf.mxu0 }
 0x124   : > { %v2582_v41 = vpop.f32.mrf.mxu1  ;;  %v3675_v62 = vadd.f32 %v2580_v26, %v1306_v57  ;;  %v2483_v15 = vadd.f32 %v2482_v17, %v2481_v44 }
 0x125   : > { %v2583_v43 = vadd.f32 %v2582_v41, %v2581_v19  ;;  %v2484_v63 = vpop.f32.mrf.mxu0  ;;  %2877 = vmatmul.mubr.bf16.gmra.mxu0 %v3448_v55 }
 0x126   : > { %v2584_v51 = vpop.f32.mrf.mxu1  ;;  %v1309_v10 = vadd.f32 %v2483_v15, %v3607_v16 }
 0x127   : > { %v2485_v33 = vpop.f32.mrf.mxu0 }
 0x128   : > { %v2585_v59 = vpop.f32.mrf.mxu1  ;;  %v3679_v40 = vadd.f32 %v2583_v43, %v1309_v10  ;;  %v2486_v18 = vadd.f32 %v2485_v33, %v2484_v63 }
 0x129   : > { %v2586_v29 = vadd.f32 %v2585_v59, %v2584_v51  ;;  %v2487_v38 = vpop.f32.mrf.mxu0 }
 0x12a   : > { %v2587_v35 = vpop.f32.mrf.mxu1  ;;  %v1314_v0 = vadd.f32 %v2486_v18, %v3607_v16 }
 0x12b   : > { %v2488_v11 = vpop.f32.mrf.mxu0 }
 0x12c   : > { %v2588_v12 = vpop.f32.mrf.mxu1  ;;  %v3682_v27 = vadd.f32 %v2586_v29, %v1314_v0  ;;  %v2489_v53 = vadd.f32 %v2488_v11, %v2487_v38 }
 0x12d   : > { %v2589_v21 = vadd.f32 %v2588_v12, %v2587_v35  ;;  %v2490_v55 = vpop.f32.mrf.mxu0 }
 0x12e   : > { %v2590_v61 = vpop.f32.mrf.mxu1  ;;  %v1317_v46 = vadd.f32 %v2489_v53, %v3607_v16 }
 0x12f   : > { %v2491_v2 = vpop.f32.mrf.mxu0 }
 0x130   : > { %v2591_v13 = vpop.f32.mrf.mxu1  ;;  %v3685_v52 = vadd.f32 %v2589_v21, %v1317_v46  ;;  %v2492_v24 = vadd.f32 %v2491_v2, %v2490_v55 }
 0x131   : > { %v2592_v58 = vadd.f32 %v2591_v13, %v2590_v61  ;;  %v2493_v20 = vpop.f32.mrf.mxu0 }
 0x132   : > { %v2593_v30 = vpop.f32.mrf.mxu1  ;;  %v1322_v48 = vadd.f32 %v2492_v24, %v3607_v16 }
 0x133   : > { %v2494_v32 = vpop.f32.mrf.mxu0 }
 0x134   : > { %v2594_v45 = vpop.f32.mrf.mxu1  ;;  %v3688_v1 = vadd.f32 %v2592_v58, %v1322_v48  ;;  %v2495_v28 = vadd.f32 %v2494_v32, %v2493_v20 }
 0x135   : > { %v2595_v50 = vadd.f32 %v2594_v45, %v2593_v30  ;;  %v2496_v54 = vpop.f32.mrf.mxu0 }
 0x136   : > { %v2596_v4 = vpop.f32.mrf.mxu1  ;;  %v1325_v25 = vadd.f32 %v2495_v28, %v3607_v16 }
 0x137   : > { %v2497_v26 = vpop.f32.mrf.mxu0 }
 0x138   : > { %v2597_v8 = vpop.f32.mrf.mxu1  ;;  %v3691_v19 = vadd.f32 %v2595_v50, %v1325_v25  ;;  %v2498_v37 = vadd.f32 %v2497_v26, %v2496_v54 }
 0x139   : > { %v2598_v47 = vadd.f32 %v2597_v8, %v2596_v4  ;;  %v2499_v41 = vpop.f32.mrf.mxu0 }
 0x13a   : > { %v2599_v34 = vpop.f32.mrf.mxu1  ;;  %v1330_v43 = vadd.f32 %v2498_v37, %v3607_v16 }
 0x13b   : > { %v2500_v44 = vpop.f32.mrf.mxu0 }
 0x13c   : > { %v2600_v56 = vpop.f32.mrf.mxu1  ;;  %v3694_v57 = vadd.f32 %v2598_v47, %v1330_v43  ;;  %v2501_v17 = vadd.f32 %v2500_v44, %v2499_v41 }
 0x13d   : > { %v2601_v39 = vadd.f32 %v2600_v56, %v2599_v34  ;;  %v2502_v15 = vpop.f32.mrf.mxu0 }
 0x13e   : > { %v2602_v42 = vpop.f32.mrf.mxu1  ;;  %v1333_v63 = vadd.f32 %v2501_v17, %v3607_v16 }
 0x13f   : > { %v2503_v35 = vpop.f32.mrf.mxu0 }
 0x140   : > { %v2603_v51 = vpop.f32.mrf.mxu1  ;;  %v3697_v33 = vadd.f32 %v2601_v39, %v1333_v63  ;;  %v2504_v12 = vadd.f32 %v2503_v35, %v2502_v15 }
 0x141   : > { %v2604_v59 = vadd.f32 %v2603_v51, %v2602_v42  ;;  %v2505_v21 = vpop.f32.mrf.mxu0 }
 0x142   : > { %v2605_v29 = vpop.f32.mrf.mxu1  ;;  %v1338_v61 = vadd.f32 %v2504_v12, %v3607_v16 }
 0x143   : > { %v2506_v0 = vpop.f32.mrf.mxu0 }
 0x144   : > { %v2606_v10 = vpop.f32.mrf.mxu1  ;;  %v3700_v13 = vadd.f32 %v2604_v59, %v1338_v61  ;;  %v2507_v53 = vadd.f32 %v2506_v0, %v2505_v21 }
 0x145   : > { %v2607_v18 = vadd.f32 %v2606_v10, %v2605_v29  ;;  %v2508_v55 = vpop.f32.mrf.mxu0 }
 0x146   : > { %v2608_v38 = vpop.f32.mrf.mxu1  ;;  %v1341_v46 = vadd.f32 %v2507_v53, %v3607_v16 }
 0x147   : > { %v2509_v2 = vpop.f32.mrf.mxu0 }
 0x148   : > { %v2609_v11 = vpop.f32.mrf.mxu1  ;;  %v3703_v24 = vadd.f32 %v2607_v18, %v1341_v46  ;;  %v2510_v50 = vadd.f32 %v2509_v2, %v2508_v55 }
 0x149   : > { %v2610_v58 = vadd.f32 %v2609_v11, %v2608_v38  ;;  %v2511_v4 = vpop.f32.mrf.mxu0 }
 0x14a   : > { %v2611_v30 = vpop.f32.mrf.mxu1  ;;  %v1346_v32 = vadd.f32 %v2510_v50, %v3607_v16 }
 0x14b   : > { %v2512_v8 = vpop.f32.mrf.mxu0 }
 0x14c   : > { %v2612_v45 = vpop.f32.mrf.mxu1  ;;  %v3706_v47 = vadd.f32 %v2610_v58, %v1346_v32  ;;  %v2513_v54 = vadd.f32 %v2512_v8, %v2511_v4 }
 0x14d   : > { %v2613_v20 = vadd.f32 %v2612_v45, %v2611_v30  ;;  %v2514_v25 = vpop.f32.mrf.mxu0 }
 0x14e   : > { %v2614_v48 = vpop.f32.mrf.mxu1  ;;  %v1349_v56 = vadd.f32 %v2513_v54, %v3607_v16 }
 0x14f   : > { %v2515_v37 = vpop.f32.mrf.mxu0 }
 0x150   : > { %v2615_v28 = vpop.f32.mrf.mxu1  ;;  %v3709_v41 = vadd.f32 %v2613_v20, %v1349_v56  ;;  %v2516_v42 = vadd.f32 %v2515_v37, %v2514_v25 }
 0x151   : > { %v2616_v34 = vadd.f32 %v2615_v28, %v2614_v48  ;;  %v2517_v44 = vpop.f32.mrf.mxu0 }
 0x152   : > { %v2617_v26 = vpop.f32.mrf.mxu1  ;;  %v1354_v17 = vadd.f32 %v2516_v42, %v3607_v16 }
 0x153   : > { %v2518_v59 = vpop.f32.mrf.mxu0 }
 0x154   : > { %v2618_v39 = vpop.f32.mrf.mxu1  ;;  %v3712_v29 = vadd.f32 %v2616_v34, %v1354_v17  ;;  %v2519_v63 = vadd.f32 %v2518_v59, %v2517_v44 }
 0x155   : > { %v2619_v43 = vadd.f32 %v2618_v39, %v2617_v26  ;;  %v2520_v10 = vpop.f32.mrf.mxu0 }
 0x156   : > { %v2620_v51 = vpop.f32.mrf.mxu1  ;;  %3864 = vst [vmem:[#allocation2_spill] sm:$0xff] %v3712_v29  ;;  %v1357_v18 = vadd.f32 %v2519_v63, %v3607_v16 }
 0x157   : > { %v2521_v21 = vpop.f32.mrf.mxu0 }
 0x158   : > { %v2621_v15 = vpop.f32.mrf.mxu1  ;;  %v3715_v61 = vadd.f32 %v2619_v43, %v1357_v18  ;;  %v2522_v0 = vadd.f32 %v2521_v21, %v2520_v10 }
 0x159   : > { %v2622_v35 = vadd.f32 %v2621_v15, %v2620_v51  ;;  %v2523_v53 = vpop.f32.mrf.mxu0 }
 0x15a   : > { %v2623_v12 = vpop.f32.mrf.mxu1  ;;  %3865 = vst [vmem:[#allocation3_spill] sm:$0xff] %v3715_v61  ;;  %v1362_v55 = vadd.f32 %v2522_v0, %v3607_v16 }
 0x15b   : > { %v2524_v30 = vpop.f32.mrf.mxu0 }
 0x15c   : > { %v2624_v38 = vpop.f32.mrf.mxu1  ;;  %v3718_v2 = vadd.f32 %v2622_v35, %v1362_v55  ;;  %v2525_v45 = vadd.f32 %v2524_v30, %v2523_v53 }
 0x15d   : > { %v2625_v11 = vadd.f32 %v2624_v38, %v2623_v12  ;;  %v2642_v20 = vpop.f32.mrf.mxu0 }
 0x15e   : > { %v2742_v58 = vpop.f32.mrf.mxu1  ;;  %v1365_v48 = vadd.f32 %v2525_v45, %v3607_v16 }
 0x15f   : > { %v2643_v32 = vpop.f32.mrf.mxu0 }
 0x160   : > { %v2743_v46 = vpop.f32.mrf.mxu1  ;;  %v3721_v28 = vadd.f32 %v2625_v11, %v1365_v48  ;;  %v2644_v54 = vadd.f32 %v2643_v32, %v2642_v20 }
 0x161   : > { %v2744_v50 = vadd.f32 %v2743_v46, %v2742_v58  ;;  %v2645_v25 = vpop.f32.mrf.mxu0 }
 0x162   : > { %v2745_v4 = vpop.f32.mrf.mxu1  ;;  %3866 = vst [vmem:[#allocation4_spill] sm:$0xff] %v3721_v28  ;;  %v1548_v56 = vadd.f32 %v2644_v54, %v3615_v60 }
 0x163   : > { %v2646_v37 = vpop.f32.mrf.mxu0 }
 0x164   : > { %v2746_v8 = vpop.f32.mrf.mxu1  ;;  %v2647_v42 = vadd.f32 %v2646_v37, %v2645_v25  ;;  %v3724_v44 = vadd.f32 %v2744_v50, %v1548_v56 }
 0x165   : > { %v2747_v34 = vadd.f32 %v2746_v8, %v2745_v4  ;;  %v2648_v51 = vpop.f32.mrf.mxu0 }
 0x166   : > { %v2748_v26 = vpop.f32.mrf.mxu1  ;;  %v1551_v16 = vadd.f32 %v2647_v42, %v3624_v7 }
 0x167   : > { %v2649_v59 = vpop.f32.mrf.mxu0 }
 0x168   : > { %v2749_v39 = vpop.f32.mrf.mxu1  ;;  %v2650_v63 = vadd.f32 %v2649_v59, %v2648_v51  ;;  %v3727_v10 = vadd.f32 %v2747_v34, %v1551_v16 }
 0x169   : > { %v2750_v43 = vadd.f32 %v2749_v39, %v2748_v26  ;;  %v2651_v12 = vpop.f32.mrf.mxu0 }
 0x16a   : > { %v2751_v17 = vpop.f32.mrf.mxu1  ;;  %v1556_v60 = vadd.f32 %v2650_v63, %v3629_v23 }
 0x16b   : > { %v2652_v21 = vpop.f32.mrf.mxu0 }
 0x16c   : > { %v2752_v15 = vpop.f32.mrf.mxu1  ;;  %v2653_v0 = vadd.f32 %v2652_v21, %v2651_v12  ;;  %v3730_v53 = vadd.f32 %v2750_v43, %v1556_v60 }
 0x16d   : > { %v2753_v35 = vadd.f32 %v2752_v15, %v2751_v17  ;;  %v2654_v58 = vpop.f32.mrf.mxu0 }
 0x16e   : > { %v2754_v18 = vpop.f32.mrf.mxu1  ;;  %v1559_v7 = vadd.f32 %v2653_v0, %v3633_v14 }
 0x16f   : > { %v2655_v30 = vpop.f32.mrf.mxu0 }
 0x170   : > { %v2755_v38 = vpop.f32.mrf.mxu1  ;;  %v2656_v45 = vadd.f32 %v2655_v30, %v2654_v58  ;;  %v3733_v20 = vadd.f32 %v2753_v35, %v1559_v7 }
 0x171   : > { %v2756_v11 = vadd.f32 %v2755_v38, %v2754_v18  ;;  %v2657_v4 = vpop.f32.mrf.mxu0 }
 0x172   : > { %v2757_v55 = vpop.f32.mrf.mxu1  ;;  %v1564_v23 = vadd.f32 %v2656_v45, %v3638_v31 }
 0x173   : > { %v2658_v32 = vpop.f32.mrf.mxu0 }
 0x174   : > { %v2758_v46 = vpop.f32.mrf.mxu1  ;;  %v2659_v54 = vadd.f32 %v2658_v32, %v2657_v4  ;;  %v3736_v25 = vadd.f32 %v2756_v11, %v1564_v23 }
 0x175   : > { %v2759_v50 = vadd.f32 %v2758_v46, %v2757_v55  ;;  %v2660_v26 = vpop.f32.mrf.mxu0 }
 0x176   : > { %v2760_v48 = vpop.f32.mrf.mxu1  ;;  %3867 = vst [vmem:[#allocation5_spill] sm:$0xff] %v3736_v25  ;;  %v1567_v14 = vadd.f32 %v2659_v54, %v3642_v49 }
 0x177   : > { %v2661_v37 = vpop.f32.mrf.mxu0 }
 0x178   : > { %v2761_v8 = vpop.f32.mrf.mxu1  ;;  %v2662_v42 = vadd.f32 %v2661_v37, %v2660_v26  ;;  %v3739_v51 = vadd.f32 %v2759_v50, %v1567_v14 }
 0x179   : > { %v2762_v34 = vadd.f32 %v2761_v8, %v2760_v48  ;;  %v2663_v17 = vpop.f32.mrf.mxu0 }
 0x17a   : > { %v2763_v56 = vpop.f32.mrf.mxu1  ;;  %3868 = vst [vmem:[#allocation6_spill] sm:$0xff] %v3739_v51  ;;  %v1572_v31 = vadd.f32 %v2662_v42, %v3647_v5 }
 0x17b   : > { %v2664_v59 = vpop.f32.mrf.mxu0 }
 0x17c   : > { %v2764_v39 = vpop.f32.mrf.mxu1  ;;  %v2665_v63 = vadd.f32 %v2664_v59, %v2663_v17  ;;  %v3742_v12 = vadd.f32 %v2762_v34, %v1572_v31 }
 0x17d   : > { %v2765_v43 = vadd.f32 %v2764_v39, %v2763_v56  ;;  %v2666_v18 = vpop.f32.mrf.mxu0 }
 0x17e   : > { %v2766_v16 = vpop.f32.mrf.mxu1  ;;  %3869 = vst [vmem:[#allocation7_spill] sm:$0xff] %v3742_v12  ;;  %v1575_v49 = vadd.f32 %v2665_v63, %v3652_v22 }
 0x17f   : > { %v2667_v21 = vpop.f32.mrf.mxu0 }
 0x180   : > { %v2767_v15 = vpop.f32.mrf.mxu1  ;;  %v2668_v0 = vadd.f32 %v2667_v21, %v2666_v18  ;;  %v3745_v58 = vadd.f32 %v2765_v43, %v1575_v49 }
 0x181   : > { %v2768_v35 = vadd.f32 %v2767_v15, %v2766_v16  ;;  %v2669_v55 = vpop.f32.mrf.mxu0 }
 0x182   : > { %v2769_v60 = vpop.f32.mrf.mxu1  ;;  %3870 = vst [vmem:[#allocation8_spill] sm:$0xff] %v3745_v58  ;;  %v1580_v5 = vadd.f32 %v2668_v0, %v3658_v9 }
 0x183   : > { %v2670_v30 = vpop.f32.mrf.mxu0 }
 0x184   : > { %v2770_v38 = vpop.f32.mrf.mxu1  ;;  %v2671_v45 = vadd.f32 %v2670_v30, %v2669_v55  ;;  %v3748_v4 = vadd.f32 %v2768_v35, %v1580_v5 }
 0x185   : > { %v2771_v11 = vadd.f32 %v2770_v38, %v2769_v60  ;;  %v2672_v48 = vpop.f32.mrf.mxu0 }
 0x186   : > { %v2772_v7 = vpop.f32.mrf.mxu1  ;;  %3871 = vst [vmem:[#allocation9_spill] sm:$0xff] %v3748_v4  ;;  %v1583_v22 = vadd.f32 %v2671_v45, %v3664_v3 }
 0x187   : > { %v2673_v32 = vpop.f32.mrf.mxu0 }
 0x188   : > { %v2773_v46 = vpop.f32.mrf.mxu1  ;;  %v2674_v54 = vadd.f32 %v2673_v32, %v2672_v48  ;;  %v3751_v26 = vadd.f32 %v2771_v11, %v1583_v22 }
 0x189   : > { %v2774_v50 = vadd.f32 %v2773_v46, %v2772_v7  ;;  %v2675_v56 = vpop.f32.mrf.mxu0 }
 0x18a   : > { %v2775_v23 = vpop.f32.mrf.mxu1  ;;  %3872 = vst [vmem:[#allocation10_spill] sm:$0xff] %v3751_v26  ;;  %v1588_v9 = vadd.f32 %v2674_v54, %v3667_v6 }
 0x18b   : > { %v2676_v37 = vpop.f32.mrf.mxu0 }
 0x18c   : > { %v2776_v8 = vpop.f32.mrf.mxu1  ;;  %v2677_v42 = vadd.f32 %v2676_v37, %v2675_v56  ;;  %v3754_v17 = vadd.f32 %v2774_v50, %v1588_v9 }
 0x18d   : > { %v2777_v34 = vadd.f32 %v2776_v8, %v2775_v23  ;;  %v2678_v16 = vpop.f32.mrf.mxu0 }
 0x18e   : > { %v2778_v14 = vpop.f32.mrf.mxu1  ;;  %3873 = vst [vmem:[#allocation11_spill] sm:$0xff] %v3754_v17  ;;  %v1591_v3 = vadd.f32 %v2677_v42, %v3672_v36 }
 0x18f   : > { %v2679_v59 = vpop.f32.mrf.mxu0 }
 0x190   : > { %v2779_v39 = vpop.f32.mrf.mxu1  ;;  %v2680_v63 = vadd.f32 %v2679_v59, %v2678_v16  ;;  %v3757_v18 = vadd.f32 %v2777_v34, %v1591_v3 }
 0x191   : > { %v2780_v43 = vadd.f32 %v2779_v39, %v2778_v14  ;;  %v2681_v60 = vpop.f32.mrf.mxu0 }
 0x192   : > { %v2781_v31 = vpop.f32.mrf.mxu1  ;;  %3874 = vst [vmem:[#allocation12_spill] sm:$0xff] %v3757_v18  ;;  %v1596_v6 = vadd.f32 %v2680_v63, %v3675_v62 }
 0x193   : > { %v2682_v21 = vpop.f32.mrf.mxu0 }
 0x194   : > { %v2782_v15 = vpop.f32.mrf.mxu1  ;;  %v2683_v0 = vadd.f32 %v2682_v21, %v2681_v60  ;;  %v3760_v55 = vadd.f32 %v2780_v43, %v1596_v6 }
 0x195   : > { %v2783_v35 = vadd.f32 %v2782_v15, %v2781_v31  ;;  %v2684_v7 = vpop.f32.mrf.mxu0 }
 0x196   : > { %v2784_v49 = vpop.f32.mrf.mxu1  ;;  %3875 = vst [vmem:[#allocation13_spill] sm:$0xff] %v3760_v55  ;;  %v1599_v36 = vadd.f32 %v2683_v0, %v3679_v40 }
 0x197   : > { %v2685_v30 = vpop.f32.mrf.mxu0 }
 0x198   : > { %v2785_v38 = vpop.f32.mrf.mxu1  ;;  %v2686_v45 = vadd.f32 %v2685_v30, %v2684_v7  ;;  %v3763_v48 = vadd.f32 %v2783_v35, %v1599_v36 }
 0x199   : > { %v2786_v11 = vadd.f32 %v2785_v38, %v2784_v49  ;;  %v2687_v23 = vpop.f32.mrf.mxu0 }
 0x19a   : > { %v2787_v5 = vpop.f32.mrf.mxu1  ;;  %3876 = vst [vmem:[#allocation14_spill] sm:$0xff] %v3763_v48  ;;  %v1604_v62 = vadd.f32 %v2686_v45, %v3682_v27 }
 0x19b   : > { %v2688_v32 = vpop.f32.mrf.mxu0 }
 0x19c   : > { %v2788_v46 = vpop.f32.mrf.mxu1  ;;  %v2689_v54 = vadd.f32 %v2688_v32, %v2687_v23  ;;  %v3766_v34 = vadd.f32 %v2786_v11, %v1604_v62 }
 0x19d   : > { %v2789_v50 = vadd.f32 %v2788_v46, %v2787_v5  ;;  %v2690_v56 = vpop.f32.mrf.mxu0 }
 0x19e   : > { %v2790_v22 = vpop.f32.mrf.mxu1  ;;  %3877 = vst [vmem:[#allocation15_spill] sm:$0xff] %v3766_v34  ;;  %v1607_v9 = vadd.f32 %v2689_v54, %v3685_v52 }
 0x19f   : > { %v2691_v40 = vpop.f32.mrf.mxu0 }
 0x1a0   : > { %v2791_v8 = vpop.f32.mrf.mxu1  ;;  %v3769_v39 = vadd.f32 %v2789_v50, %v1607_v9  ;;  %v2692_v18 = vadd.f32 %v2691_v40, %v2690_v56 }
 0x1a1   : > { %v2693_v42 = vpop.f32.mrf.mxu0 }
 0x1a2   : > { %v2793_v14 = vpop.f32.mrf.mxu1  ;;  %3878 = vst [vmem:[#allocation16_spill] sm:$0xff] %v3769_v39 }
 0x1a3   : > { %v2694_v16 = vpop.f32.mrf.mxu0 }
 0x1a4   : > { %v2794_v37 = vpop.f32.mrf.mxu1  ;;  %v2695_v25 = vadd.f32 %v2694_v16, %v2693_v42 }
 0x1a5   : > { %v2696_v3 = vpop.f32.mrf.mxu0  ;;  %v2795_v42 = vadd.f32 %v2794_v37, %v2793_v14 }
 0x1a6   : > { %v2796_v43 = vpop.f32.mrf.mxu1 }
 0x1a7   : > { %v2697_v27 = vpop.f32.mrf.mxu0 }
 0x1a8   : > { %v2797_v31 = vpop.f32.mrf.mxu1  ;;  %v2698_v26 = vadd.f32 %v2697_v27, %v2696_v3 }
 0x1a9   : > { %v2699_v63 = vpop.f32.mrf.mxu0 }
 0x1aa   : > { %v2799_v59 = vpop.f32.mrf.mxu1  ;;  %v1620_v29 = vadd.f32 %v2698_v26, %v3694_v57 }
 0x1ab   : > { %v2700_v60 = vpop.f32.mrf.mxu0 }
 0x1ac   : > { %v2800_v15 = vpop.f32.mrf.mxu1  ;;  %v2701_v51 = vadd.f32 %v2700_v60, %v2699_v63  ;;  %v1615_v60 = vadd.f32 %v2695_v25, %v3691_v19 }
 0x1ad   : > { %v2702_v6 = vpop.f32.mrf.mxu0  ;;  %v2801_v40 = vadd.f32 %v2800_v15, %v2799_v59 }
 0x1ae   : > { %v2802_v35 = vpop.f32.mrf.mxu1  ;;  %v1623_v56 = vadd.f32 %v2701_v51, %v3697_v33  ;;  %v1760_v14 = vadd.f32 %v2795_v42, %v1615_v60 }
 0x1af   : > { %v2703_v38 = vpop.f32.mrf.mxu0 }
 0x1b0   : > { %v2803_v49 = vpop.f32.mrf.mxu1  ;;  %v2704_v3 = vadd.f32 %v2703_v38, %v2702_v6 }
 0x1b1   : > { %v2705_v0 = vpop.f32.mrf.mxu0 }
 0x1b2   : > { %v2805_v21 = vpop.f32.mrf.mxu1  ;;  %v1628_v33 = vadd.f32 %v2704_v3, %v3700_v13 }
 0x1b3   : > { %v2706_v7 = vpop.f32.mrf.mxu0 }
 0x1b4   : > { %v2806_v52 = vpop.f32.mrf.mxu1  ;;  %v2707_v27 = vadd.f32 %v2706_v7, %v2705_v0 }
 0x1b5   : > { %v2708_v36 = vpop.f32.mrf.mxu0  ;;  %v2807_v59 = vadd.f32 %v2806_v52, %v2805_v21 }
 0x1b6   : > { %v2808_v11 = vpop.f32.mrf.mxu1  ;;  %v1631_v51 = vadd.f32 %v2707_v27, %v3703_v24 }
 0x1b7   : > { %v2709_v46 = vpop.f32.mrf.mxu0 }
 0x1b8   : > { %v2809_v5 = vpop.f32.mrf.mxu1  ;;  %v2710_v57 = vadd.f32 %v2709_v46, %v2708_v36 }
 0x1b9   : > { %v2711_v50 = vpop.f32.mrf.mxu0  ;;  %v2810_v37 = vadd.f32 %v2809_v5, %v2808_v11 }
 0x1ba   : > { %v2811_v30 = vpop.f32.mrf.mxu1 }
 0x1bb   : > { %v2712_v62 = vpop.f32.mrf.mxu0 }
 0x1bc   : > { %v2812_v45 = vpop.f32.mrf.mxu1  ;;  %v2713_v26 = vadd.f32 %v2712_v62, %v2711_v50 }
 0x1bd   : > { %v3775_v54 = vpop.f32.mrf.mxu0  ;;  %v2813_v38 = vadd.f32 %v2812_v45, %v2811_v30 }
 0x1be   : > { %v3771_v23 = vpop.f32.mrf.mxu1 }
 0x1bf   : > { %3879 = vst [vmem:[#allocation17_spill] sm:$0xff] %v3771_v23  ;;  %v3779_v48 = vpop.f32.mrf.mxu0 }
 0x1c0   : > { %v3773_v32 = vpop.f32.mrf.mxu1 }
 0x1c1   : > { %3880 = vst [vmem:[#allocation18_spill] sm:$0xff] %v3773_v32  ;;  %v3783_v55 = vpop.f32.mrf.mxu0  ;;  %v2792_v32 = vadd.f32 %v2791_v8, %v2790_v22  ;;  %v2804_v22 = vadd.f32 %v2803_v49, %v2802_v35 }
 0x1c2   : > { %v3777_v9 = vpop.f32.mrf.mxu1 }
 0x1c3   : > { %3881 = vst [vmem:[#allocation19_spill] sm:$0xff] %v3777_v9  ;;  %v3787_v4 = vpop.f32.mrf.mxu0  ;;  %v2798_v9 = vadd.f32 %v2797_v31, %v2796_v43  ;;  %v1768_v31 = vadd.f32 %v2801_v40, %v1623_v56  ;;  %v1773_v11 = vadd.f32 %v2804_v22, %v1628_v33 }
 0x1c4   : > { %v3781_v39 = vpop.f32.mrf.mxu1 }
 0x1c5   : > { %3882 = vst [vmem:[#allocation20_spill] sm:$0xff] %v3781_v39  ;;  %v2720_v61 = vpop.f32.mrf.mxu0  ;;  %v1612_v39 = vadd.f32 %v2692_v18, %v3688_v1  ;;  %v1765_v16 = vadd.f32 %v2798_v9, %v1620_v29  ;;  %v1636_v29 = vadd.f32 %v2710_v57, %v3706_v47  ;;  %v3883_v57 = vld [vmem:[#allocation4_spill] sm:$0xff] }
 0x1c6   : > { %v3785_v34 = vpop.f32.mrf.mxu1 }
 0x1c7   : > { %v2721_v23 = vpop.f32.mrf.mxu0  ;;  %v1757_v1 = vadd.f32 %v2792_v32, %v1612_v39  ;;  %v1639_v39 = vadd.f32 %v2713_v26, %v3709_v41  ;;  %v1776_v41 = vadd.f32 %v2807_v59, %v1631_v51  ;;  %v3889_v59 = vld [vmem:[#allocation2_spill] sm:$0xff] }
 0x1c8   : > { %v3789_v17 = vpop.f32.mrf.mxu1  ;;  %v2722_v21 = vadd.f32 %v2721_v23, %v2720_v61  ;;  %v2716_v61 = vadd.f32 %v3779_v48, %v3775_v54  ;;  %v1781_v23 = vadd.f32 %v2810_v37, %v1636_v29 }
 0x1c9   : > { %v2723_v28 = vpop.f32.mrf.mxu0  ;;  %v1784_v32 = vadd.f32 %v2813_v38, %v1639_v39  ;;  %v2822_v48 = vadd.f32 %v3789_v17, %v3785_v34  ;;  %v3885_v34 = vld [vmem:[#allocation17_spill] sm:$0xff]  ;;  %v3891_v39 = vld [vmem:[#allocation8_spill] sm:$0xff] }
 0x1ca   : > { %v3791_v58 = vpop.f32.mrf.mxu1  ;;  %v3887_v22 = vld [vmem:[#allocation19_spill] sm:$0xff] }
 0x1cb   : > { %v2724_v43 = vpop.f32.mrf.mxu0 }
 0x1cc   : > { %v3795_v12 = vpop.f32.mrf.mxu1  ;;  %v2725_v45 = vadd.f32 %v2724_v43, %v2723_v28 }
 0x1cd   : > { %v2866_v15 = vpop.f32.mrf.mxu0  ;;  %v2825_v26 = vadd.f32 %v3795_v12, %v3791_v58 }
 0x1ce   : > { %v2882_v63 = vpop.f32.mrf.mxu1  ;;  %v1846_v0 = vadd.f32 %v2866_v15, %v3730_v53  ;;  %v1644_v15 = vadd.f32 %v2716_v61, %v3889_v59 }
 0x1cf   : > { %v1910_v8 = vadd.f32 %v2882_v63, %v1765_v16  ;;  %v1837_v35 = vpop.f32.mrf.mxu0 }
 0x1d0   : > { %v1901_v18 = vpop.f32.mrf.mxu1  ;;  %v1838_v5 = vadd.f32 %v1837_v35, %v3724_v44  ;;  %v1950_v9 = vmax.f32 %v1846_v0, 0.0  ;;  %v2719_v44 = vadd.f32 %v3787_v4, %v3783_v55  ;;  %v3884_v4 = vld [vmem:[#allocation7_spill] sm:$0xff] }
 0x1d1   : > { %v1902_v6 = vadd.f32 %v1901_v18, %v1757_v1  ;;  %v1966_v13 = vmax.f32 %v1910_v8, 0.0  ;;  %v2867_v36 = vpop.f32.mrf.mxu0  ;;  %v3886_v1 = vld [vmem:[#allocation18_spill] sm:$0xff]  ;;  %v3888_v8 = vld [vmem:[#allocation20_spill] sm:$0xff] }
 0x1d2   : > { %v2883_v19 = vpop.f32.mrf.mxu1  ;;  %v1849_v30 = vadd.f32 %v2867_v36, %v3733_v20  ;;  %v1652_v20 = vadd.f32 %v2722_v21, %v3718_v2  ;;  %v1948_v63 = vmax.f32 %v1838_v5, 0.0  ;;  %v2816_v18 = vadd.f32 %v3886_v1, %v3885_v34 }
 0x1d3   : > { %v1913_v25 = vadd.f32 %v2883_v19, %v1768_v31  ;;  %v1964_v52 = vmax.f32 %v1902_v6, 0.0  ;;  %v1840_v50 = vpop.f32.mrf.mxu0  ;;  %v2819_v31 = vadd.f32 %v3888_v8, %v3887_v22 }
 0x1d4   : > { %v1904_v49 = vpop.f32.mrf.mxu1  ;;  %v1951_v56 = vmax.f32 %v1849_v30, 0.0  ;;  %v1841_v40 = vadd.f32 %v1840_v50, %v3727_v10  ;;  %v1655_v10 = vadd.f32 %v2725_v45, %v3883_v57  ;;  %v1797_v58 = vadd.f32 %v2822_v48, %v1652_v20 }
 0x1d5   : > { %v1967_v7 = vmax.f32 %v1913_v25, 0.0  ;;  %v1905_v24 = vadd.f32 %v1904_v49, %v1760_v14  ;;  %v2870_v28 = vpop.f32.mrf.mxu0  ;;  %v3890_v14 = vld [vmem:[#allocation5_spill] sm:$0xff]  ;;  %v3892_v49 = vld [vmem:[#allocation3_spill] sm:$0xff] }
 0x1d6   : > { %v2886_v47 = vpop.f32.mrf.mxu1  ;;  %v2351_v60 = vpack.c.bf16 %v1951_v56, %v1950_v9  ;;  %v1949_v42 = vmax.f32 %v1841_v40, 0.0  ;;  %v1862_v2 = vadd.f32 %v2870_v28, %v3884_v4  ;;  %v1647_v0 = vadd.f32 %v2719_v44, %v3892_v49 }
 0x1d7   : > { %v2391_v53 = vpack.c.bf16 %v1967_v7, %v1966_v13  ;;  %v1965_v46 = vmax.f32 %v1905_v24, 0.0  ;;  %v1926_v54 = vadd.f32 %v2886_v47, %v1781_v23  ;;  %v1853_v55 = vpop.f32.mrf.mxu0  ;;  %v3893_v47 = vld [vmem:[#allocation6_spill] sm:$0xff] }
 0x1d8   : > { %v1917_v62 = vpop.f32.mrf.mxu1  ;;  %2413 = vst [vmem:[%s3808_s18 + $0x8] sm:$0xff] %v2351_v60   ;;  %v2346_v33 = vpack.c.bf16 %v1949_v42, %v1948_v63  ;;  %v1854_v29 = vadd.f32 %v1853_v55, %v3890_v14  ;;  %v1954_v13 = vmax.f32 %v1862_v2, 0.0  ;;  %v1792_v9 = vadd.f32 %v2819_v31, %v1647_v0  ;;  %v3896_v60 = vld [vmem:[#allocation12_spill] sm:$0xff]  ;;  %v3897_v55 = vld [vmem:[#allocation10_spill] sm:$0xff] }
 0x1d9   : > { %2421 = vst [vmem:[%s3808_s18 + $0x48] sm:$0xff] %v2391_v53   ;;  %v2386_v3 = vpack.c.bf16 %v1965_v46, %v1964_v52  ;;  %v1918_v16 = vadd.f32 %v1917_v62, %v1773_v11  ;;  %v1970_v6 = vmax.f32 %v1926_v54, 0.0  ;;  %v2871_v19 = vpop.f32.mrf.mxu0  ;;  %v1800_v52 = vadd.f32 %v2825_v26, %v1655_v10 }
 0x1da   : > { %v2887_v27 = vpop.f32.mrf.mxu1  ;;  %2347 = vst [vmem:[%s3808_s18] sm:$0xff] %v2346_v33   ;;  %v1865_v38 = vadd.f32 %v2871_v19, %v3891_v39  ;;  %v1789_v53 = vadd.f32 %v2816_v18, %v1644_v15  ;;  %v1952_v61 = vmax.f32 %v1854_v29, 0.0  ;;  %v3898_v33 = vld [vmem:[#allocation15_spill] sm:$0xff]  ;;  %v3899_v15 = vld [vmem:[#allocation13_spill] sm:$0xff]  ;;  %v3900_v19 = vld [vmem:[#allocation16_spill] sm:$0xff] }
 0x1db   : > { %2420 = vst [vmem:[%s3808_s18 + $0x40] sm:$0xff] %v2386_v3   ;;  %v1929_v43 = vadd.f32 %v2887_v27, %v1784_v32  ;;  %v1968_v37 = vmax.f32 %v1918_v16, 0.0  ;;  %v1856_v24 = vpop.f32.mrf.mxu0  ;;  %v3894_v3 = vld [vmem:[#allocation11_spill] sm:$0xff]  ;;  %v3895_v27 = vld [vmem:[#allocation9_spill] sm:$0xff]  ;;  %v3901_v29 = vld [vmem:[#allocation14_spill] sm:$0xff] }
 0x1dc   : > { %v1920_v17 = vpop.f32.mrf.mxu1  ;;  %v1955_v36 = vmax.f32 %v1865_v38, 0.0  ;;  %v1857_v11 = vadd.f32 %v1856_v24, %v3893_v47 }
 0x1dd   : > { %v1921_v51 = vadd.f32 %v1920_v17, %v1776_v41  ;;  %v1971_v12 = vmax.f32 %v1929_v43, 0.0  ;;  %v2874_v30 = vpop.f32.mrf.mxu0 }
 0x1de   : > { %v2890_v25 = vpop.f32.mrf.mxu1  ;;  %v2361_v45 = vpack.c.bf16 %v1955_v36, %v1954_v13  ;;  %v1953_v50 = vmax.f32 %v1857_v11, 0.0  ;;  %v1878_v44 = vadd.f32 %v2874_v30, %v3894_v3 }
 0x1df   : > { %v1969_v35 = vmax.f32 %v1921_v51, 0.0  ;;  %v2401_v7 = vpack.c.bf16 %v1971_v12, %v1970_v6  ;;  %v1942_v5 = vadd.f32 %v2890_v25, %v1797_v58  ;;  %v1869_v62 = vpop.f32.mrf.mxu0 }
 0x1e0   : > { %v1933_v21 = vpop.f32.mrf.mxu1  ;;  %2415 = vst [vmem:[%s3808_s18 + $0x18] sm:$0xff] %v2361_v45   ;;  %v2356_v40 = vpack.c.bf16 %v1953_v50, %v1952_v61  ;;  %v1870_v63 = vadd.f32 %v1869_v62, %v3895_v27  ;;  %v1958_v4 = vmax.f32 %v1878_v44, 0.0 }
 0x1e1   : > { %v2396_v41 = vpack.c.bf16 %v1969_v35, %v1968_v37  ;;  %2423 = vst [vmem:[%s3808_s18 + $0x58] sm:$0xff] %v2401_v7   ;;  %v1934_v32 = vadd.f32 %v1933_v21, %v1789_v53  ;;  %v1974_v20 = vmax.f32 %v1942_v5, 0.0  ;;  %v2875_v28 = vpop.f32.mrf.mxu0 }
 0x1e2   : > { %v2891_v46 = vpop.f32.mrf.mxu1  ;;  %2414 = vst [vmem:[%s3808_s18 + $0x10] sm:$0xff] %v2356_v40   ;;  %v1881_v42 = vadd.f32 %v2875_v28, %v3896_v60  ;;  %v1956_v1 = vmax.f32 %v1870_v63, 0.0 }
 0x1e3   : > { %2422 = vst [vmem:[%s3808_s18 + $0x50] sm:$0xff] %v2396_v41   ;;  %v1945_v23 = vadd.f32 %v2891_v46, %v1800_v52  ;;  %v1972_v57 = vmax.f32 %v1934_v32, 0.0  ;;  %v1872_v10 = vpop.f32.mrf.mxu0 }
 0x1e4   : > { %v1936_v56 = vpop.f32.mrf.mxu1  ;;  %v1959_v2 = vmax.f32 %v1881_v42, 0.0  ;;  %v1873_v43 = vadd.f32 %v1872_v10, %v3897_v55 }
 0x1e5   : > { %v1975_v48 = vmax.f32 %v1945_v23, 0.0  ;;  %v1937_v54 = vadd.f32 %v1936_v56, %v1792_v9  ;;  %v2878_v34 = vpop.f32.mrf.mxu0 }
 0x1e6   : > { %v2371_v18 = vpack.c.bf16 %v1959_v2, %v1958_v4  ;;  %v1957_v22 = vmax.f32 %v1873_v43, 0.0  ;;  %v1894_v51 = vadd.f32 %v2878_v34, %v3898_v33 }
 0x1e7   : > { %v2411_v16 = vpack.c.bf16 %v1975_v48, %v1974_v20  ;;  %v1973_v26 = vmax.f32 %v1937_v54, 0.0  ;;  %v1885_v8 = vpop.f32.mrf.mxu0 }
 0x1e8   : > { %2417 = vst [vmem:[%s3808_s18 + $0x28] sm:$0xff] %v2371_v18   ;;  %v2366_v31 = vpack.c.bf16 %v1957_v22, %v1956_v1  ;;  %v1886_v6 = vadd.f32 %v1885_v8, %v3899_v15  ;;  %v1962_v25 = vmax.f32 %v1894_v51, 0.0 }
 0x1e9   : > { %2425 = vst [vmem:[%s3808_s18 + $0x68] sm:$0xff] %v2411_v16   ;;  %v2406_v17 = vpack.c.bf16 %v1973_v26, %v1972_v57  ;;  %v2879_v59 = vpop.f32.mrf.mxu0 }
 0x1ea   : > { %2416 = vst [vmem:[%s3808_s18 + $0x20] sm:$0xff] %v2366_v31   ;;  %v1897_v12 = vadd.f32 %v2879_v59, %v3900_v19  ;;  %v1960_v39 = vmax.f32 %v1886_v6, 0.0 }
 0x1eb   : > { %2424 = vst [vmem:[%s3808_s18 + $0x60] sm:$0xff] %v2406_v17   ;;  %v1888_v58 = vpop.f32.mrf.mxu0 }
 0x1ec   : > { %v1963_v14 = vmax.f32 %v1897_v12, 0.0  ;;  %v1889_v37 = vadd.f32 %v1888_v58, %v3901_v29 }
 0x1ee   : > { %v2381_v38 = vpack.c.bf16 %v1963_v14, %v1962_v25  ;;  %v1961_v35 = vmax.f32 %v1889_v37, 0.0 }
 0x1f0   : > { %2419 = vst [vmem:[%s3808_s18 + $0x38] sm:$0xff] %v2381_v38   ;;  %v2376_v49 = vpack.c.bf16 %v1961_v35, %v1960_v39 }
 0x1f2   : > { %2418 = vst [vmem:[%s3808_s18 + $0x30] sm:$0xff] %v2376_v49  }
 0x1f3 PF: > { %s13_s12 = sadd.s32 1, %s3027_s12  }
 0x1f4   : > { %p10_p4 = scmp.ge.s32.totalorder %s13_s12, 4  }
 0x1f6   :  { %12 = sbr.rel (!%p10_p4) target bundleno = 1 (0x1), region = 62 }

// kernel: graph_feat_convolution.3
= control target key start
LH: loop header
LB: loop body
LE: loop exit
PB: predicated region body
PF: predicated region fallthrough
CT: control target
= control target key end

     0   :  { %s3318_s12 = smov 0   ;;  %s4691_s0 = inlined_call_operand.vmem [shape: bf16[2,14,16,128], index: 0, kind: input, shape index: {}]   ;;  %s4692_s1 = inlined_call_operand.vmem [shape: bf16[1152,256], index: 1, kind: input, shape index: {}]   ;;  %s4693_s2 = inlined_call_operand.vmem [shape: f32[1,256], index: 2, kind: input, shape index: {}]   ;;  %s4694_s3 = inlined_call_operand.vmem [shape: f32[2,1,256], index: 3, kind: output, shape index: {}]  }
   0x1 LB: > { %s2836_s13 = sadd.s32 4294967295, %s3294_s12   ;;  %p2840_p0 = scmp.ge.s32.totalorder %s3294_s12, 1  ;;  %s3294_s12 = sphi %s3318_s12, %s13_s12  }
   0x2   : > { %p137_p1 = scmp.lt.s32.totalorder %s3294_s12, 3 }
   0x4   : > { %p138_p2 = pnand %p2840_p0, %p137_p1 }
   0x6   : > { %141 = sbr.rel (%p138_p2) target bundleno = 539 (0x21b), region = 32 }
   0xb   : > { %v3044_v0 = vld [vmem:[%s4692_s1 + $0x74] ss:$8 sps:$4 sm:$0xff]   ;;  %v3048_v2 = vld [vmem:[%s4692_s1 + $0x70] ss:$8 sps:$4 sm:$0xff]   ;;  %v3050_v4 = vld [vmem:[%s4692_s1 + $0x64] ss:$8 sps:$4 sm:$0xff]  }
   0xc   : > { %v3046_v1 = vld [vmem:[%s4692_s1 + $0x174] ss:$8 sps:$4 sm:$0xff]   ;;  %1456 = vmatprep.subr.bf16.mxu0 %v3044_v0  ;;  %v3049_v3 = vld [vmem:[%s4692_s1 + $0x170] ss:$8 sps:$4 sm:$0xff]   ;;  %v3052_v5 = vld [vmem:[%s4692_s1 + $0x164] ss:$8 sps:$4 sm:$0xff]  }
   0xd   : > { %1609 = vmatprep.subr.bf16.mxu1 %v3046_v1  ;;  %1457 = vmatpush1.bf16.msra.mxu0 %v3048_v2  ;;  %v3054_v6 = vld [vmem:[%s4692_s1 + $0x60] ss:$8 sps:$4 sm:$0xff]   ;;  %v3056_v8 = vld [vmem:[%s4692_s1 + $0x54] ss:$8 sps:$4 sm:$0xff]   ;;  %v3060_v10 = vld [vmem:[%s4692_s1 + $0x50] ss:$8 sps:$4 sm:$0xff]  }
   0xe   : > { %1610 = vmatpush1.bf16.msra.mxu1 %v3049_v3  ;;  %1458 = vmatprep.subr.bf16.mxu0 %v3050_v4  ;;  %v3055_v7 = vld [vmem:[%s4692_s1 + $0x160] ss:$8 sps:$4 sm:$0xff]   ;;  %v3058_v9 = vld [vmem:[%s4692_s1 + $0x154] ss:$8 sps:$4 sm:$0xff]   ;;  %v3061_v11 = vld [vmem:[%s4692_s1 + $0x150] ss:$8 sps:$4 sm:$0xff]  }
   0xf   : > { %1611 = vmatprep.subr.bf16.mxu1 %v3052_v5  ;;  %v3062_v12 = vld [vmem:[%s4692_s1 + $0x44] ss:$8 sps:$4 sm:$0xff]   ;;  %v3066_v14 = vld [vmem:[%s4692_s1 + $0x40] ss:$8 sps:$4 sm:$0xff]   ;;  %v3068_v16 = vld [vmem:[%s4692_s1 + $0x34] ss:$8 sps:$4 sm:$0xff]  }
  0x10   : > { %v3064_v13 = vld [vmem:[%s4692_s1 + $0x144] ss:$8 sps:$4 sm:$0xff]   ;;  %v3067_v15 = vld [vmem:[%s4692_s1 + $0x140] ss:$8 sps:$4 sm:$0xff]   ;;  %v3070_v17 = vld [vmem:[%s4692_s1 + $0x134] ss:$8 sps:$4 sm:$0xff]  }
  0x11   : > { %1459 = vmatpush1.bf16.msra.mxu0 %v3054_v6  ;;  %v3072_v18 = vld [vmem:[%s4692_s1 + $0x30] ss:$8 sps:$4 sm:$0xff]   ;;  %v3074_v20 = vld [vmem:[%s4692_s1 + $0x24] ss:$8 sps:$4 sm:$0xff]   ;;  %v3078_v22 = vld [vmem:[%s4692_s1 + $0x20] ss:$8 sps:$4 sm:$0xff]  }
  0x12   : > { %1612 = vmatpush1.bf16.msra.mxu1 %v3055_v7  ;;  %1460 = vmatprep.subr.bf16.mxu0 %v3056_v8  ;;  %v3073_v19 = vld [vmem:[%s4692_s1 + $0x130] ss:$8 sps:$4 sm:$0xff]   ;;  %v3076_v21 = vld [vmem:[%s4692_s1 + $0x124] ss:$8 sps:$4 sm:$0xff]   ;;  %v3079_v23 = vld [vmem:[%s4692_s1 + $0x120] ss:$8 sps:$4 sm:$0xff]  }
  0x13   : > { %1613 = vmatprep.subr.bf16.mxu1 %v3058_v9  ;;  %v3080_v24 = vld [vmem:[%s4692_s1 + $0x14] ss:$8 sps:$4 sm:$0xff]   ;;  %v3084_v26 = vld [vmem:[%s4692_s1 + $0x10] ss:$8 sps:$4 sm:$0xff]   ;;  %v3086_v28 = vld [vmem:[%s4692_s1 + $0x4] ss:$8 sps:$4 sm:$0xff]  }
  0x14   : > { %v3082_v25 = vld [vmem:[%s4692_s1 + $0x114] ss:$8 sps:$4 sm:$0xff]   ;;  %v3085_v27 = vld [vmem:[%s4692_s1 + $0x110] ss:$8 sps:$4 sm:$0xff]   ;;  %v3088_v29 = vld [vmem:[%s4692_s1 + $0x104] ss:$8 sps:$4 sm:$0xff]  }
  0x15   : > { %1461 = vmatpush1.bf16.msra.mxu0 %v3060_v10  ;;  %v3090_v30 = vld [vmem:[%s4692_s1] ss:$8 sps:$4 sm:$0xff]   ;;  %p160_p3 = scmp.lt.s32.totalorder %s2836_s13, 1  ;;  %v3092_v32 = vld [vmem:[%s4692_s1 + $0xf4] ss:$8 sps:$4 sm:$0xff]   ;;  %vm464_vm0 = vcmask 1047552  }
  0x16   : > { %1614 = vmatpush1.bf16.msra.mxu1 %v3061_v11  ;;  %1462 = vmatprep.subr.bf16.mxu0 %v3062_v12  ;;  %v3091_v31 = vld [vmem:[%s4692_s1 + $0x100] ss:$8 sps:$4 sm:$0xff]   ;;  %v3094_v33 = vld [vmem:[%s4692_s1 + $0x1f4] ss:$8 sps:$4 sm:$0xff]   ;;  %v3096_v34 = vld [vmem:[%s4692_s1 + $0xf0] ss:$8 sps:$4 sm:$0xff]  }
  0x17   : > { %1615 = vmatprep.subr.bf16.mxu1 %v3064_v13  ;;  %v3097_v35 = vld [vmem:[%s4692_s1 + $0x1f0] ss:$8 sps:$4 sm:$0xff]   ;;  %s4823_s13 = smov (!%p160_p3, %s2836_s13), 1  ;;  %v3098_v36 = vld [vmem:[%s4692_s1 + $0xe4] ss:$8 sps:$4 sm:$0xff]   ;;  %vm509_vm3 = vcmask 1046528  }
  0x18   : > { %v3100_v37 = vld [vmem:[%s4692_s1 + $0x1e4] ss:$8 sps:$4 sm:$0xff]   ;;  %v3102_v38 = vld [vmem:[%s4692_s1 + $0xe0] ss:$8 sps:$4 sm:$0xff]   ;;  %s3033_s17 = smul.u32 112, %s4823_s13  ;;  %s2842_s15 = sshll.u32 %s4823_s13, 1 }
  0x19   : > { %1463 = vmatpush1.bf16.msra.mxu0 %v3066_v14  ;;  %v3103_v39 = vld [vmem:[%s4692_s1 + $0x1e0] ss:$8 sps:$4 sm:$0xff]   ;;  %v3104_v40 = vld [vmem:[%s4692_s1 + $0xd4] ss:$8 sps:$4 sm:$0xff]   ;;  %v3108_v42 = vld [vmem:[%s4692_s1 + $0xd0] ss:$8 sps:$4 sm:$0xff]   ;;  %s168_s18 = scalar_lea.vmem %s4694_s3, %s2842_s15 }
  0x1a   : > { %1616 = vmatpush1.bf16.msra.mxu1 %v3067_v15  ;;  %1464 = vmatprep.subr.bf16.mxu0 %v3068_v16  ;;  %v3106_v41 = vld [vmem:[%s4692_s1 + $0x1d4] ss:$8 sps:$4 sm:$0xff]   ;;  %v3109_v43 = vld [vmem:[%s4692_s1 + $0x1d0] ss:$8 sps:$4 sm:$0xff]   ;;  %s3468_s30 = scalar_lea.vmem %s4691_s0, %s3033_s17  ;;  %v3110_v44 = vld [vmem:[%s4692_s1 + $0xc4] ss:$8 sps:$4 sm:$0xff]  }
  0x1b   : > { %1617 = vmatprep.subr.bf16.mxu1 %v3070_v17  ;;  %v3112_v45 = vld [vmem:[%s4692_s1 + $0x1c4] ss:$8 sps:$4 sm:$0xff]   ;;  %v3114_v46 = vld [vmem:[%s4692_s1 + $0xc0] ss:$8 sps:$4 sm:$0xff]   ;;  %v3116_v54 = vld [vmem:[%s4692_s1 + $0xb4] ss:$8 sps:$4 sm:$0xff]  }
  0x1c   : > { %v170_v47 = vld [vmem:[%s3468_s30] sm:$0xf]  ;;  %v171_v49 = vld [vmem:[%s3468_s30 + $0x4] sm:$0xf]  ;;  %v172_v51 = vld [vmem:[%s3468_s30 + $0x8] sm:$0xf] }
  0x1d   : > { %1465 = vmatpush1.bf16.msra.mxu0 %v3072_v18  ;;  %v3115_v48 = vld [vmem:[%s4692_s1 + $0x1c0] ss:$8 sps:$4 sm:$0xff]   ;;  %v3484_v50 = vcombine.low %v170_v47, %v170_v47  ;;  %v3487_v52 = vcombine.low %v170_v47, %v171_v49  ;;  %v173_v53 = vld [vmem:[%s3468_s30 + $0xc] sm:$0xf]  ;;  %v3118_v55 = vld [vmem:[%s4692_s1 + $0x1b4] ss:$8 sps:$4 sm:$0xff]   ;;  %v3534_v10 = vcombine.low %v172_v51, %v172_v51 }
  0x1e   : > { %1618 = vmatpush1.bf16.msra.mxu1 %v3073_v19  ;;  %1466 = vmatprep.subr.bf16.mxu0 %v3074_v20  ;;  %v3497_v57 = vcombine.low %v172_v51, %v173_v53  ;;  %vm465_vm1 = vsmask.f32 7424  ;;  %v3120_v60 = vld [vmem:[%s4692_s1 + $0xb0] ss:$8 sps:$4 sm:$0xff]   ;;  %v3122_v62 = vld [vmem:[%s4692_s1 + $0xa4] ss:$8 sps:$4 sm:$0xff]  }
  0x1f   : > { %1619 = vmatprep.subr.bf16.mxu1 %v3076_v21  ;;  %v395_v56 = vshll.u32 %v3484_v50, 16  ;;  %v269_v58 = vshrl.u32 %v3487_v52, 16  ;;  %v271_v59 = vshll.u32 %v3487_v52, 16  ;;  %v3121_v61 = vld [vmem:[%s4692_s1 + $0x1b0] ss:$8 sps:$4 sm:$0xff]   ;;  %vm3515_vm2 = vmand %vm464_vm0, %vm465_vm1  ;;  %v399_v19 = vshll.u32 %v3534_v10, 16 }
  0x20   : > { %1641 = vmatprep.mubr.bf16.mxu1 %v3497_v57  ;;  %v3124_v63 = vld [vmem:[%s4692_s1 + $0x1a4] ss:$8 sps:$4 sm:$0xff]   ;;  %v3126_v4 = vld [vmem:[%s4692_s1 + $0xa0] ss:$8 sps:$4 sm:$0xff]   ;;  %v3128_v6 = vld [vmem:[%s4692_s1 + $0x94] ss:$8 sps:$4 sm:$0xff]  }
  0x21   : > { %1467 = vmatpush1.bf16.msra.mxu0 %v3078_v22  ;;  %v273_v0 = vrot.slane %v271_v59, 1  ;;  %v397_v1 = vrot.slane %v395_v56, 1  ;;  %v3127_v5 = vld [vmem:[%s4692_s1 + $0x1a0] ss:$8 sps:$4 sm:$0xff]   ;;  %v3130_v7 = vld [vmem:[%s4692_s1 + $0x194] ss:$8 sps:$4 sm:$0xff]  }
  0x22   : > { %1620 = vmatpush1.bf16.msra.mxu1 %v3079_v23  ;;  %1468 = vmatprep.subr.bf16.mxu0 %v3080_v24  ;;  %v278_v9 = vshll.u32 %v3497_v57, 16  ;;  %v174_v11 = vld [vmem:[%s3468_s30 + $0x10] sm:$0xf]  ;;  %v175_v12 = vld [vmem:[%s3468_s30 + $0x14] sm:$0xf]  ;;  %v276_v17 = vshrl.u32 %v3497_v57, 16 }
  0x23   : > { %1621 = vmatprep.subr.bf16.mxu1 %v3082_v25  ;;  %v274_v3 = vor.u32 %v273_v0, %v269_v58  ;;  %v3132_v13 = vld [vmem:[%s4692_s1 + $0x90] ss:$8 sps:$4 sm:$0xff]   ;;  %v3134_v15 = vld [vmem:[%s4692_s1 + $0x84] ss:$8 sps:$4 sm:$0xff]   ;;  %v3552_v20 = vcombine.low %v174_v11, %v175_v12  ;;  %v3138_v21 = vld [vmem:[%s4692_s1 + $0x80] ss:$8 sps:$4 sm:$0xff]  }
  0x24   : > { %v3133_v14 = vld [vmem:[%s4692_s1 + $0x190] ss:$8 sps:$4 sm:$0xff]   ;;  %v3136_v16 = vld [vmem:[%s4692_s1 + $0x184] ss:$8 sps:$4 sm:$0xff]   ;;  %v280_v18 = vrot.slane %v278_v9, 1  ;;  %v481_v23 = vrot.slane %v3487_v52, 1 }
  0x25   : > { %1469 = vmatpush1.bf16.msra.mxu0 %v3084_v26  ;;  %v467_v8 = vsel %vm3515_vm2, %v274_v3, %v397_v1  ;;  %v3139_v22 = vld [vmem:[%s4692_s1 + $0x180] ss:$8 sps:$4 sm:$0xff]   ;;  %v495_v24 = vrot.slane %v3484_v50, 1  ;;  %v3145_v25 = vld [vmem:[%s4692_s1 + $0x274] ss:$8 sps:$4 sm:$0xff]   ;;  %v3565_v26 = vcombine.low %v174_v11, %v174_v11  ;;  %v483_v1 = vrot.slane %v3552_v20, 1 }
  0x26   : > { %1622 = vmatpush1.bf16.msra.mxu1 %v3085_v27  ;;  %1470 = vmatprep.subr.bf16.mxu0 %v3086_v28  ;;  %v281_v27 = vor.u32 %v280_v18, %v276_v17  ;;  %v401_v28 = vrot.slane %v399_v19, 1  ;;  %v3162_v51 = vld [vmem:[%s4692_s1 + $0x360] ss:$8 sps:$4 sm:$0xff]   ;;  %v179_v53 = vld [vmem:[%s3468_s30 + $0x24] sm:$0xf] }
  0x27   : > { %1623 = vmatprep.subr.bf16.mxu1 %v3088_v29  ;;  %1488 = vmatprep.mubr.bf16.mxu0 %v467_v8  ;;  %v3156_v29 = vld [vmem:[%s4692_s1 + $0x374] ss:$8 sps:$4 sm:$0xff]   ;;  %v3161_v59 = vld [vmem:[%s4692_s1 + $0x244] ss:$8 sps:$4 sm:$0xff]   ;;  %v3170_v0 = vld [vmem:[%s4692_s1 + $0x350] ss:$8 sps:$4 sm:$0xff]  }
  0x28   : > { %v497_v3 = vrot.slane %v3565_v26, 1  ;;  %v181_v11 = vld [vmem:[%s3468_s30 + $0x2c] sm:$0xf] }
  0x29   : > { %1471 = vmatpush1.bf16.msra.mxu0 %v3090_v30  ;;  %v285_v30 = vshll.u32 %v3552_v20, 16 }
  0x2a   : > { %1624 = vmatpush1.bf16.msra.mxu1 %v3091_v31  ;;  %1472 = vmatprep.subr.bf16.mxu0 %v3092_v32  ;;  %v176_v31 = vld [vmem:[%s3468_s30 + $0x18] sm:$0xf]  ;;  %v177_v32 = vld [vmem:[%s3468_s30 + $0x1c] sm:$0xf]  ;;  %v3657_v12 = vsel %vm509_vm3, %v483_v1, %v497_v3 }
  0x2b   : > { %1625 = vmatprep.subr.bf16.mxu1 %v3094_v33  ;;  %v512_v33 = vsel %vm509_vm3, %v481_v23, %v495_v24  ;;  %v3606_v50 = vcombine.low %v176_v31, %v176_v31 }
  0x2d   : > { %1473 = vmatpush2.bf16.msra.mxu0 %v3096_v34  ;;  %v3143_v34 = vld [vmem:[%s4692_s1 + $0x270] ss:$8 sps:$4 sm:$0xff]   ;;  %v498_v24 = vrot.slane %v3606_v50, 1 }
  0x2e   : > { %1626 = vmatpush2.bf16.msra.mxu1 %v3097_v35  ;;  %1474 = vmatprep.subr.bf16.mxu0 %v3098_v36  ;;  %v403_v35 = vshll.u32 %v3565_v26, 16  ;;  %v3148_v36 = vld [vmem:[%s4692_s1 + $0x264] ss:$8 sps:$4 sm:$0xff]   ;;  %v3183_v26 = vld [vmem:[%s4692_s1 + $0x214] ss:$8 sps:$4 sm:$0xff]  }
  0x2f   : > { %1627 = vmatprep.subr.bf16.mxu1 %v3100_v37  ;;  %v3583_v37 = vsel %vm3515_vm2, %v281_v27, %v401_v28  ;;  %v3184_v27 = vld [vmem:[%s4692_s1 + $0x330] ss:$8 sps:$4 sm:$0xff]  }
  0x31   : > { %1475 = vmatpush2.bf16.msra.mxu0 %v3102_v38  ;;  %v283_v38 = vshrl.u32 %v3552_v20, 16 }
  0x32   : > { %1628 = vmatpush2.bf16.msra.mxu1 %v3103_v39  ;;  %1476 = vmatprep.subr.bf16.mxu0 %v3104_v40  ;;  %v287_v39 = vrot.slane %v285_v30, 1  ;;  %v3586_v40 = vcombine.low %v176_v31, %v177_v32 }
  0x33   : > { %1629 = vmatprep.subr.bf16.mxu1 %v3106_v41  ;;  %v3154_v41 = vld [vmem:[%s4692_s1 + $0x370] ss:$8 sps:$4 sm:$0xff]  }
  0x34   : > { %v288_v47 = vor.u32 %v287_v39, %v283_v38  ;;  %v292_v49 = vshll.u32 %v3586_v40, 16  ;;  %v290_v56 = vshrl.u32 %v3586_v40, 16  ;;  %v484_v23 = vrot.slane %v3586_v40, 1 }
  0x35   : > { %1477 = vmatpush2.bf16.msra.mxu0 %v3108_v42  ;;  %v3164_v42 = vld [vmem:[%s4692_s1 + $0x364] ss:$8 sps:$4 sm:$0xff]  }
  0x36   : > { %1630 = vmatpush2.bf16.msra.mxu1 %v3109_v43  ;;  %1478 = vmatprep.subr.bf16.mxu0 %v3110_v44  ;;  %v3146_v43 = vld [vmem:[%s4692_s1 + $0x260] ss:$8 sps:$4 sm:$0xff]   ;;  %v482_v44 = vrot.slane %v3497_v57, 1 }
  0x37   : > { %1631 = vmatprep.subr.bf16.mxu1 %v3112_v45  ;;  %v496_v45 = vrot.slane %v3534_v10, 1  ;;  %v180_v10 = vld [vmem:[%s3468_s30 + $0x28] sm:$0xf] }
  0x38   : > { %v3671_v19 = vcombine.low %v180_v10, %v181_v11  ;;  %v3694_v28 = vcombine.low %v180_v10, %v180_v10  ;;  %v3203_v10 = vld [vmem:[%s4692_s1 + $0x2e0] ss:$8 sps:$4 sm:$0xff]  }
  0x39   : > { %1479 = vmatpush2.bf16.msra.mxu0 %v3114_v46  ;;  %v3153_v46 = vld [vmem:[%s4692_s1 + $0x254] ss:$8 sps:$4 sm:$0xff]  }
  0x3a   : > { %1632 = vmatpush2.bf16.msra.mxu1 %v3115_v48  ;;  %1480 = vmatprep.subr.bf16.mxu0 %v3116_v54  ;;  %v405_v48 = vrot.slane %v403_v35, 1  ;;  %v3614_v54 = vsel %vm509_vm3, %v482_v44, %v496_v45  ;;  %v306_v32 = vshll.u32 %v3671_v19, 16  ;;  %v3703_v35 = vsel %vm509_vm3, %v484_v23, %v498_v24  ;;  %v3192_v44 = vld [vmem:[%s4692_s1 + $0x320] ss:$8 sps:$4 sm:$0xff]   ;;  %v3191_v45 = vld [vmem:[%s4692_s1 + $0x204] ss:$8 sps:$4 sm:$0xff]  }
  0x3b   : > { %1633 = vmatprep.subr.bf16.mxu1 %v3118_v55  ;;  %v3151_v55 = vld [vmem:[%s4692_s1 + $0x250] ss:$8 sps:$4 sm:$0xff]   ;;  %v415_v38 = vshll.u32 %v3694_v28, 16  ;;  %v500_v11 = vrot.slane %v3694_v28, 1  ;;  %v3213_v23 = vld [vmem:[%s4692_s1 + $0x2d4] ss:$8 sps:$4 sm:$0xff]  }
  0x3c   : > { %v3622_v58 = vsel %vm3515_vm2, %v288_v47, %v405_v48  ;;  %v3224_v24 = vld [vmem:[%s4692_s1 + $0x3e4] ss:$8 sps:$4 sm:$0xff]  }
  0x3d   : > { %1481 = vmatpush2.bf16.msra.mxu0 %v3120_v60  ;;  %v294_v60 = vrot.slane %v292_v49, 1  ;;  %v3189_v49 = vld [vmem:[%s4692_s1 + $0x200] ss:$8 sps:$4 sm:$0xff]  }
  0x3e   : > { %1634 = vmatpush2.bf16.msra.mxu1 %v3121_v61  ;;  %1482 = vmatprep.subr.bf16.mxu0 %v3122_v62  ;;  %v407_v61 = vshll.u32 %v3606_v50, 16  ;;  %v417_v50 = vrot.slane %v415_v38, 1 }
  0x3f   : > { %1635 = vmatprep.subr.bf16.mxu1 %v3124_v63  ;;  %v3172_v63 = vld [vmem:[%s4692_s1 + $0x354] ss:$8 sps:$4 sm:$0xff]  }
  0x41   : > { %1483 = vmatpush2.bf16.msra.mxu0 %v3126_v4  ;;  %v3159_v4 = vld [vmem:[%s4692_s1 + $0x240] ss:$8 sps:$4 sm:$0xff]  }
  0x42   : > { %1636 = vmatpush2.bf16.msra.mxu1 %v3127_v5  ;;  %1484 = vmatprep.subr.bf16.mxu0 %v3128_v6  ;;  %v295_v5 = vor.u32 %v294_v60, %v290_v56  ;;  %v409_v6 = vrot.slane %v407_v61, 1  ;;  %v3200_v60 = vld [vmem:[%s4692_s1 + $0x310] ss:$8 sps:$4 sm:$0xff]   ;;  %v3208_v61 = vld [vmem:[%s4692_s1 + $0x304] ss:$8 sps:$4 sm:$0xff]  }
  0x43   : > { %1637 = vmatprep.subr.bf16.mxu1 %v3130_v7  ;;  %v3169_v7 = vld [vmem:[%s4692_s1 + $0x234] ss:$8 sps:$4 sm:$0xff]  }
  0x45   : > { %1485 = vmatpush2.bf16.msra.mxu0 %v3132_v13  ;;  %v3167_v13 = vld [vmem:[%s4692_s1 + $0x230] ss:$8 sps:$4 sm:$0xff]  }
  0x46   : > { %1638 = vmatpush2.bf16.msra.mxu1 %v3133_v14  ;;  %1486 = vmatprep.subr.bf16.mxu0 %v3134_v15  ;;  %v3176_v14 = vld [vmem:[%s4692_s1 + $0x340] ss:$8 sps:$4 sm:$0xff]  }
  0x47   : > { %1639 = vmatprep.subr.bf16.mxu1 %v3136_v16  ;;  %v3668_v16 = vsel %vm3515_vm2, %v295_v5, %v409_v6  ;;  %v3197_v5 = vld [vmem:[%s4692_s1 + $0x2f0] ss:$8 sps:$4 sm:$0xff]   ;;  %v3206_v6 = vld [vmem:[%s4692_s1 + $0x300] ss:$8 sps:$4 sm:$0xff]  }
  0x49   : > { %1487 = vmatpush2.bf16.msra.mxu0 %v3138_v21  ;;  %v3175_v21 = vld [vmem:[%s4692_s1 + $0x224] ss:$8 sps:$4 sm:$0xff]  }
  0x4a   : > { %1640 = vmatpush2.bf16.msra.mxu1 %v3139_v22  ;;  %1762 = vmatprep.subr.bf16.mxu0 %v3145_v25  ;;  %v3186_v22 = vld [vmem:[%s4692_s1 + $0x334] ss:$8 sps:$4 sm:$0xff]   ;;  %v3173_v25 = vld [vmem:[%s4692_s1 + $0x220] ss:$8 sps:$4 sm:$0xff]  }
  0x4b   : > { %1915 = vmatprep.subr.bf16.mxu1 %v3156_v29  ;;  %v182_v29 = vld [vmem:[%s3468_s30 + $0x30] sm:$0xf] }
  0x4c   : > { %1489 = vmatmul.mubr.bf16.vlgmr.msra.gmra.mxu0 %v3487_v52  ;;  %v178_v52 = vld [vmem:[%s3468_s30 + $0x20] sm:$0xf] }
  0x4d   : > { %1642 = vmatmul.mubr.bf16.vlgmr.msra.gmra.mxu1 %v512_v33  ;;  %1763 = vmatpush1.bf16.msra.mxu0 %v3143_v34  ;;  %v3628_v62 = vcombine.low %v178_v52, %v179_v53  ;;  %v3652_v9 = vcombine.low %v178_v52, %v178_v52  ;;  %v183_v33 = vld [vmem:[%s3468_s30 + $0x34] sm:$0xf]  ;;  %v3194_v34 = vld [vmem:[%s4692_s1 + $0x324] ss:$8 sps:$4 sm:$0xff]   ;;  %v184_v52 = vld [vmem:[%s3468_s30 + $0x38] sm:$0xf] }
  0x4e   : > { %1498 = vmatprep.mubr.bf16.mxu0 %v3583_v37  ;;  %1764 = vmatprep.subr.bf16.mxu0 %v3148_v36  ;;  %v3181_v36 = vld [vmem:[%s4692_s1 + $0x210] ss:$8 sps:$4 sm:$0xff]   ;;  %v185_v53 = vld [vmem:[%s3468_s30 + $0x3c] sm:$0xf] }
  0x4f   : > { %1651 = vmatprep.mubr.bf16.mxu1 %v3552_v20  ;;  %1916 = vmatpush1.bf16.msra.mxu1 %v3154_v41  ;;  %v299_v8 = vshll.u32 %v3628_v62, 16  ;;  %v297_v15 = vshrl.u32 %v3628_v62, 16  ;;  %v411_v18 = vshll.u32 %v3652_v9, 16  ;;  %v304_v41 = vshrl.u32 %v3671_v19, 16 }
  0x50   : > { %1917 = vmatprep.subr.bf16.mxu1 %v3164_v42  ;;  %v308_v42 = vrot.slane %v306_v32, 1  ;;  %v485_v47 = vrot.slane %v3628_v62, 1  ;;  %v499_v48 = vrot.slane %v3652_v9, 1  ;;  %v486_v9 = vrot.slane %v3671_v19, 1  ;;  %v3222_v32 = vld [vmem:[%s4692_s1 + $0x3e0] ss:$8 sps:$4 sm:$0xff]  }
  0x51   : > { %1765 = vmatpush1.bf16.msra.mxu0 %v3146_v43  ;;  %v301_v17 = vrot.slane %v299_v8, 1  ;;  %v413_v31 = vrot.slane %v411_v18, 1  ;;  %v3714_v43 = vcombine.low %v182_v29, %v183_v33  ;;  %v3216_v8 = vld [vmem:[%s4692_s1 + $0x3f4] ss:$8 sps:$4 sm:$0xff]   ;;  %v3221_v33 = vld [vmem:[%s4692_s1 + $0x2c4] ss:$8 sps:$4 sm:$0xff]  }
  0x52   : > { %1766 = vmatprep.subr.bf16.mxu0 %v3153_v46  ;;  %v3202_v46 = vld [vmem:[%s4692_s1 + $0x314] ss:$8 sps:$4 sm:$0xff]  }
  0x53   : > { %1918 = vmatpush1.bf16.msra.mxu1 %v3162_v51  ;;  %v302_v30 = vor.u32 %v301_v17, %v297_v15  ;;  %v3734_v51 = vcombine.low %v182_v29, %v182_v29  ;;  %v313_v56 = vshll.u32 %v3714_v43, 16  ;;  %v186_v15 = vld [vmem:[%s3468_s30 + $0x40] sm:$0xf] }
  0x54   : > { %1499 = vmatmul.mubr.bf16.gmra.mxu0 %v3497_v57  ;;  %v3178_v57 = vld [vmem:[%s4692_s1 + $0x344] ss:$8 sps:$4 sm:$0xff]   ;;  %1919 = vmatprep.subr.bf16.mxu1 %v3172_v63  ;;  %v3749_v63 = vsel %vm509_vm3, %v485_v47, %v499_v48  ;;  %v3219_v48 = vld [vmem:[%s4692_s1 + $0x2c0] ss:$8 sps:$4 sm:$0xff]  }
  0x55   : > { %1652 = vmatmul.mubr.bf16.gmra.mxu1 %v3614_v54  ;;  %1767 = vmatpush1.bf16.msra.mxu0 %v3151_v55  ;;  %v3711_v39 = vsel %vm3515_vm2, %v302_v30, %v413_v31  ;;  %v309_v55 = vor.u32 %v308_v42, %v304_v41  ;;  %v419_v1 = vshll.u32 %v3734_v51, 16  ;;  %v3211_v31 = vld [vmem:[%s4692_s1 + $0x2d0] ss:$8 sps:$4 sm:$0xff]   ;;  %v501_v38 = vrot.slane %v3734_v51, 1  ;;  %v188_v41 = vld [vmem:[%s3468_s30 + $0x48] sm:$0xf] }
  0x56   : > { %1508 = vmatprep.mubr.bf16.mxu0 %v3622_v58  ;;  %1661 = vmatprep.mubr.bf16.mxu1 %v3586_v40  ;;  %v3235_v51 = vld [vmem:[%s4692_s1 + $0x3c4] ss:$8 sps:$4 sm:$0xff]  }
  0x57   : > { %1768 = vmatprep.subr.bf16.mxu0 %v3161_v59  ;;  %1920 = vmatpush1.bf16.msra.mxu1 %v3170_v0  ;;  %v3199_v59 = vld [vmem:[%s4692_s1 + $0x2f4] ss:$8 sps:$4 sm:$0xff]   ;;  %v311_v0 = vshrl.u32 %v3714_v43, 16  ;;  %v3755_v3 = vsel %vm3515_vm2, %v309_v55, %v417_v50  ;;  %v3230_v50 = vld [vmem:[%s4692_s1 + $0x3d0] ss:$8 sps:$4 sm:$0xff]  }
  0x58   : > { %1921 = vmatprep.subr.bf16.mxu1 %v3178_v57  ;;  %v3757_v57 = vcombine.low %v184_v52, %v185_v53 }
  0x59   : > { %1769 = vmatpush1.bf16.msra.mxu0 %v3159_v4  ;;  %v315_v4 = vrot.slane %v313_v56, 1 }
  0x5a   : > { %1770 = vmatprep.subr.bf16.mxu0 %v3169_v7  ;;  %v3205_v7 = vld [vmem:[%s4692_s1 + $0x2e4] ss:$8 sps:$4 sm:$0xff]   ;;  %v320_v18 = vshll.u32 %v3757_v57, 16 }
  0x5b   : > { %1922 = vmatpush1.bf16.msra.mxu1 %v3176_v14  ;;  %v3780_v14 = vcombine.low %v184_v52, %v184_v52  ;;  %v316_v17 = vor.u32 %v315_v4, %v311_v0  ;;  %v3233_v0 = vld [vmem:[%s4692_s1 + $0x3c0] ss:$8 sps:$4 sm:$0xff]   ;;  %v3243_v4 = vld [vmem:[%s4692_s1 + $0x3b4] ss:$8 sps:$4 sm:$0xff]  }
  0x5c   : > { %1509 = vmatmul.mubr.bf16.gmra.mxu0 %v3552_v20  ;;  %1923 = vmatprep.subr.bf16.mxu1 %v3186_v22  ;;  %v3214_v22 = vld [vmem:[%s4692_s1 + $0x3f0] ss:$8 sps:$4 sm:$0xff]   ;;  %v322_v30 = vrot.slane %v320_v18, 1  ;;  %v3249_v18 = vld [vmem:[%s4692_s1 + $0x3a4] ss:$8 sps:$4 sm:$0xff]  }
  0x5d   : > { %1662 = vmatmul.mubr.bf16.gmra.mxu1 %v3657_v12  ;;  %1518 = vmatprep.mubr.bf16.mxu0 %v3668_v16 }
  0x5e   : > { %1671 = vmatprep.mubr.bf16.mxu1 %v3628_v62  ;;  %1771 = vmatpush1.bf16.msra.mxu0 %v3167_v13  ;;  %v421_v13 = vrot.slane %v419_v1, 1  ;;  %v3238_v1 = vld [vmem:[%s4692_s1 + $0x2a4] ss:$8 sps:$4 sm:$0xff]  }
  0x5f   : > { %1772 = vmatprep.subr.bf16.mxu0 %v3175_v21  ;;  %1924 = vmatpush1.bf16.msra.mxu1 %v3184_v27  ;;  %v187_v21 = vld [vmem:[%s3468_s30 + $0x44] sm:$0xf]  ;;  %v423_v27 = vshll.u32 %v3780_v14, 16 }
  0x60   : > { %1925 = vmatprep.subr.bf16.mxu1 %v3194_v34  ;;  %v3799_v28 = vcombine.low %v186_v15, %v187_v21  ;;  %v3803_v29 = vsel %vm3515_vm2, %v316_v17, %v421_v13  ;;  %v3232_v34 = vld [vmem:[%s4692_s1 + $0x3d4] ss:$8 sps:$4 sm:$0xff]   ;;  %v3241_v17 = vld [vmem:[%s4692_s1 + $0x3b0] ss:$8 sps:$4 sm:$0xff]  }
  0x61   : > { %v425_v42 = vrot.slane %v423_v27, 1  ;;  %v191_v13 = vld [vmem:[%s3468_s30 + $0x54] sm:$0xf] }
  0x62   : > { %1773 = vmatpush1.bf16.msra.mxu0 %v3173_v25  ;;  %v3795_v25 = vsel %vm509_vm3, %v486_v9, %v500_v11  ;;  %v3870_v9 = vcombine.low %v188_v41, %v188_v41 }
  0x63   : > { %1774 = vmatprep.subr.bf16.mxu0 %v3183_v26  ;;  %1926 = vmatpush1.bf16.msra.mxu1 %v3192_v44  ;;  %v318_v26 = vshrl.u32 %v3757_v57, 16  ;;  %v327_v44 = vshll.u32 %v3799_v28, 16 }
  0x64   : > { %1519 = vmatmul.mubr.bf16.gmra.mxu0 %v3586_v40  ;;  %1927 = vmatprep.subr.bf16.mxu1 %v3202_v46  ;;  %v189_v46 = vld [vmem:[%s3468_s30 + $0x4c] sm:$0xf] }
  0x65   : > { %1672 = vmatmul.mubr.bf16.gmra.mxu1 %v3703_v35  ;;  %1528 = vmatprep.mubr.bf16.mxu0 %v3711_v39  ;;  %v323_v47 = vor.u32 %v322_v30, %v318_v26  ;;  %v3844_v55 = vcombine.low %v188_v41, %v189_v46  ;;  %v3244_v30 = vld [vmem:[%s4692_s1 + $0x290] ss:$8 sps:$4 sm:$0xff]  }
  0x66   : > { %1681 = vmatprep.mubr.bf16.mxu1 %v3671_v19  ;;  %1775 = vmatpush1.bf16.msra.mxu0 %v3181_v36  ;;  %v487_v36 = vrot.slane %v3714_v43, 1  ;;  %v192_v46 = vld [vmem:[%s3468_s30 + $0x58] sm:$0xf] }
  0x67   : > { %1776 = vmatprep.subr.bf16.mxu0 %v3191_v45  ;;  %1928 = vmatpush1.bf16.msra.mxu1 %v3200_v60  ;;  %v3825_v45 = vcombine.low %v186_v15, %v186_v15  ;;  %v3848_v56 = vsel %vm3515_vm2, %v323_v47, %v425_v42  ;;  %v329_v60 = vrot.slane %v327_v44, 1  ;;  %v3236_v15 = vld [vmem:[%s4692_s1 + $0x2a0] ss:$8 sps:$4 sm:$0xff]   ;;  %v332_v26 = vshrl.u32 %v3844_v55, 16  ;;  %v3252_v47 = vld [vmem:[%s4692_s1 + $0x390] ss:$8 sps:$4 sm:$0xff]  }
  0x68   : > { %1929 = vmatprep.subr.bf16.mxu1 %v3208_v61  ;;  %v3841_v52 = vsel %vm509_vm3, %v487_v36, %v501_v38  ;;  %v3227_v61 = vld [vmem:[%s4692_s1 + $0x2b0] ss:$8 sps:$4 sm:$0xff]  }
  0x69   : > { %v427_v53 = vshll.u32 %v3825_v45, 16  ;;  %v503_v36 = vrot.slane %v3825_v45, 1  ;;  %v3260_v45 = vld [vmem:[%s4692_s1 + $0x384] ss:$8 sps:$4 sm:$0xff]  }
  0x6a   : > { %1777 = vmatpush1.bf16.msra.mxu0 %v3189_v49  ;;  %v3229_v49 = vld [vmem:[%s4692_s1 + $0x2b4] ss:$8 sps:$4 sm:$0xff]  }
  0x6b   : > { %1778 = vmatprep.subr.bf16.mxu0 %v3199_v59  ;;  %1930 = vmatpush1.bf16.msra.mxu1 %v3206_v6  ;;  %v325_v59 = vshrl.u32 %v3799_v28, 16  ;;  %v502_v6 = vrot.slane %v3780_v14, 1  ;;  %v3246_v14 = vld [vmem:[%s4692_s1 + $0x294] ss:$8 sps:$4 sm:$0xff]  }
  0x6c   : > { %1529 = vmatmul.mubr.bf16.gmra.mxu0 %v3628_v62  ;;  %1931 = vmatprep.subr.bf16.mxu1 %v3216_v8  ;;  %v334_v8 = vshll.u32 %v3844_v55, 16 }
  0x6d   : > { %1682 = vmatmul.mubr.bf16.gmra.mxu1 %v3749_v63  ;;  %1538 = vmatprep.mubr.bf16.mxu0 %v3755_v3  ;;  %v330_v11 = vor.u32 %v329_v60, %v325_v59 }
  0x6e   : > { %1691 = vmatprep.mubr.bf16.mxu1 %v3714_v43  ;;  %1779 = vmatpush2.bf16.msra.mxu0 %v3197_v5  ;;  %v488_v5 = vrot.slane %v3757_v57, 1  ;;  %v336_v27 = vrot.slane %v334_v8, 1 }
  0x6f   : > { %1780 = vmatprep.subr.bf16.mxu0 %v3205_v7  ;;  %1932 = vmatpush2.bf16.msra.mxu1 %v3214_v22  ;;  %v429_v7 = vrot.slane %v427_v53, 1  ;;  %v431_v22 = vshll.u32 %v3870_v9, 16 }
  0x70   : > { %1933 = vmatprep.subr.bf16.mxu1 %v3224_v24  ;;  %v3887_v21 = vsel %vm509_vm3, %v488_v5, %v502_v6  ;;  %v337_v42 = vor.u32 %v336_v27, %v332_v26  ;;  %v504_v5 = vrot.slane %v3870_v9, 1  ;;  %v3964_v27 = vld [vmem:[%s3468_s30 + $0x60] sm:$0xf] }
  0x71   : > { %v3894_v24 = vsel %vm3515_vm2, %v330_v11, %v429_v7  ;;  %v433_v38 = vrot.slane %v431_v22, 1 }
  0x72   : > { %1781 = vmatpush2.bf16.msra.mxu0 %v3203_v10  ;;  %v190_v10 = vld [vmem:[%s3468_s30 + $0x50] sm:$0xf] }
  0x73   : > { %1782 = vmatprep.subr.bf16.mxu0 %v3213_v23  ;;  %1934 = vmatpush2.bf16.msra.mxu1 %v3222_v32  ;;  %v3890_v23 = vcombine.low %v190_v10, %v191_v13  ;;  %v3254_v32 = vld [vmem:[%s4692_s1 + $0x394] ss:$8 sps:$4 sm:$0xff]   ;;  %v2867_v44 = vcombine.low %v190_v10, %v190_v10  ;;  %v3936_v59 = vsel %vm3515_vm2, %v337_v42, %v433_v38  ;;  %v3266_v42 = vld [vmem:[%s4692_s1 + $0x464] ss:$8 sps:$4 sm:$0xff]  }
  0x74   : > { %1539 = vmatmul.mubr.bf16.gmra.mxu0 %v3671_v19  ;;  %1935 = vmatprep.subr.bf16.mxu1 %v3232_v34  ;;  %v489_v34 = vrot.slane %v3799_v28, 1  ;;  %v2868_v10 = vcombine.low %v192_v46, %v192_v46 }
  0x75   : > { %1692 = vmatmul.mubr.bf16.gmra.mxu1 %v3795_v25  ;;  %1548 = vmatprep.mubr.bf16.mxu0 %v3803_v29  ;;  %v341_v41 = vshll.u32 %v3890_v23, 16  ;;  %v339_v53 = vshrl.u32 %v3890_v23, 16 }
  0x76   : > { %1701 = vmatprep.mubr.bf16.mxu1 %v3757_v57  ;;  %1783 = vmatpush2.bf16.msra.mxu0 %v3211_v31  ;;  %v3247_v31 = vld [vmem:[%s4692_s1 + $0x3a0] ss:$8 sps:$4 sm:$0xff]   ;;  %v439_v9 = vshll.u32 %v2868_v10, 16 }
  0x77   : > { %1784 = vmatprep.subr.bf16.mxu0 %v3221_v33  ;;  %1936 = vmatpush2.bf16.msra.mxu1 %v3230_v50  ;;  %v3257_v33 = vld [vmem:[%s4692_s1 + $0x284] ss:$8 sps:$4 sm:$0xff]   ;;  %v3263_v50 = vld [vmem:[%s4692_s1 + $0x474] ss:$8 sps:$4 sm:$0xff]   ;;  %v343_v60 = vrot.slane %v341_v41, 1 }
  0x78   : > { %1937 = vmatprep.subr.bf16.mxu1 %v3235_v51  ;;  %v3931_v51 = vsel %vm509_vm3, %v489_v34, %v503_v36  ;;  %v441_v26 = vrot.slane %v439_v9, 1  ;;  %v506_v36 = vrot.slane %v2868_v10, 1  ;;  %v3261_v41 = vld [vmem:[%s4692_s1 + $0x470] ss:$8 sps:$4 sm:$0xff]  }
  0x79   : > { %v344_v6 = vor.u32 %v343_v60, %v339_v53 }
  0x7a   : > { %1785 = vmatpush2.bf16.msra.mxu0 %v3219_v48  ;;  %v3255_v48 = vld [vmem:[%s4692_s1 + $0x280] ss:$8 sps:$4 sm:$0xff]  }
  0x7b   : > { %1786 = vmatprep.subr.bf16.mxu0 %v3229_v49  ;;  %1938 = vmatpush2.bf16.msra.mxu1 %v3233_v0  ;;  %v193_v49 = vld [vmem:[%s3468_s30 + $0x5c] sm:$0xf] }
  0x7c   : > { %1549 = vmatmul.mubr.bf16.gmra.mxu0 %v3714_v43  ;;  %1939 = vmatprep.subr.bf16.mxu1 %v3243_v4  ;;  %v3938_v0 = vcombine.low %v192_v46, %v193_v49  ;;  %v490_v4 = vrot.slane %v3844_v55, 1  ;;  %v3270_v46 = vld [vmem:[%s4692_s1 + $0x440] ss:$8 sps:$4 sm:$0xff]   ;;  %v3281_v49 = vld [vmem:[%s4692_s1 + $0x414] ss:$8 sps:$4 sm:$0xff]  }
  0x7d   : > { %1702 = vmatmul.mubr.bf16.gmra.mxu1 %v3841_v52  ;;  %1558 = vmatprep.mubr.bf16.mxu0 %v3848_v56 }
  0x7e   : > { %1711 = vmatprep.mubr.bf16.mxu1 %v3799_v28  ;;  %1787 = vmatpush2.bf16.msra.mxu0 %v3227_v61  ;;  %v435_v61 = vshll.u32 %v2867_v44, 16  ;;  %v348_v8 = vshll.u32 %v3938_v0, 16  ;;  %v3951_v11 = vsel %vm509_vm3, %v490_v4, %v504_v5  ;;  %v492_v34 = vrot.slane %v3938_v0, 1 }
  0x7f   : > { %1788 = vmatprep.subr.bf16.mxu0 %v3238_v1  ;;  %1940 = vmatpush2.bf16.msra.mxu1 %v3241_v17  ;;  %v3258_v1 = vld [vmem:[%s4692_s1 + $0x380] ss:$8 sps:$4 sm:$0xff]  }
  0x80   : > { %1941 = vmatprep.subr.bf16.mxu1 %v3249_v18  ;;  %v437_v7 = vrot.slane %v435_v61, 1  ;;  %v350_v17 = vrot.slane %v348_v8, 1  ;;  %v505_v18 = vrot.slane %v2867_v44, 1  ;;  %v3983_v38 = vsel %vm509_vm3, %v492_v34, %v506_v36  ;;  %v3269_v44 = vld [vmem:[%s4692_s1 + $0x454] ss:$8 sps:$4 sm:$0xff]  }
  0x82   : > { %1789 = vmatpush2.bf16.msra.mxu0 %v3236_v15  ;;  %v3955_v13 = vsel %vm3515_vm2, %v344_v6, %v437_v7  ;;  %v346_v15 = vshrl.u32 %v3938_v0, 16 }
  0x83   : > { %1790 = vmatprep.subr.bf16.mxu0 %v3246_v14  ;;  %1942 = vmatpush2.bf16.msra.mxu1 %v3247_v31  ;;  %v491_v14 = vrot.slane %v3890_v23, 1 }
  0x84   : > { %1559 = vmatmul.mubr.bf16.gmra.mxu0 %v3757_v57  ;;  %1943 = vmatprep.subr.bf16.mxu1 %v3254_v32  ;;  %v351_v22 = vor.u32 %v350_v17, %v346_v15  ;;  %v724_v15 = vld [vmem:[%s4693_s2] sm:$0x3] }
  0x85   : > { %1712 = vmatmul.mubr.bf16.gmra.mxu1 %v3887_v21  ;;  %1568 = vmatprep.mubr.bf16.mxu0 %v3894_v24  ;;  %v3968_v31 = vsel %vm509_vm3, %v491_v14, %v505_v18 }
  0x86   : > { %1721 = vmatprep.mubr.bf16.mxu1 %v3844_v55  ;;  %1791 = vmatpush2.bf16.msra.mxu0 %v3244_v30  ;;  %v195_v30 = vld [vmem:[%s3468_s30 + $0x64] sm:$0xf] }
  0x87   : > { %1792 = vmatprep.subr.bf16.mxu0 %v3257_v33  ;;  %1944 = vmatpush2.bf16.msra.mxu1 %v3252_v47  ;;  %v3971_v32 = vcombine.low %v3964_v27, %v195_v30  ;;  %v3975_v33 = vsel %vm3515_vm2, %v351_v22, %v441_v26  ;;  %v3275_v47 = vld [vmem:[%s4692_s1 + $0x434] ss:$8 sps:$4 sm:$0xff]  }
  0x88   : > { %1945 = vmatprep.subr.bf16.mxu1 %v3260_v45  ;;  %v3283_v45 = vld [vmem:[%s4692_s1 + $0x400] ss:$8 sps:$4 sm:$0xff]  }
  0x8a   : > { %1793 = vmatpush2.bf16.msra.mxu0 %v3255_v48  ;;  %v3276_v48 = vld [vmem:[%s4692_s1 + $0x420] ss:$8 sps:$4 sm:$0xff]  }
  0x8b   : > { %2068 = vmatprep.subr.bf16.mxu0 %v3263_v50  ;;  %1946 = vmatpush2.bf16.msra.mxu1 %v3258_v1 }
  0x8c   : > { %1569 = vmatmul.mubr.bf16.gmra.mxu0 %v3799_v28  ;;  %3017 = vmatprep.subr.bf16.mxu1 %v3263_v50 }
  0x8d   : > { %1722 = vmatmul.mubr.bf16.gmra.mxu1 %v3931_v51  ;;  %1578 = vmatprep.mubr.bf16.mxu0 %v3936_v59 }
  0x8e   : > { %1731 = vmatprep.mubr.bf16.mxu1 %v3890_v23 }
  0x94   : > { %1579 = vmatmul.mubr.bf16.gmra.mxu0 %v3844_v55 }
  0x95   : > { %1732 = vmatmul.mubr.bf16.gmra.mxu1 %v3951_v11  ;;  %1588 = vmatprep.mubr.bf16.mxu0 %v3955_v13 }
  0x96   : > { %1741 = vmatprep.mubr.bf16.mxu1 %v3938_v0 }
  0x9c   : > { %1589 = vmatmul.mubr.bf16.gmra.mxu0 %v3890_v23 }
  0x9d   : > { %1742 = vmatmul.mubr.bf16.gmra.mxu1 %v3968_v31  ;;  %1598 = vmatprep.mubr.bf16.mxu0 %v3975_v33 }
  0x9e   : > { %1751 = vmatprep.mubr.bf16.mxu1 %v3971_v32 }
  0xa4   : > { %1599 = vmatmul.mubr.bf16.gmra.mxu0 %v3938_v0 }
  0xa5   : > { %1752 = vmatmul.mubr.bf16.gmra.mxu1 %v3983_v38  ;;  %1794 = vmatprep.mubr.bf16.mxu0 %v3614_v54  ;;  %v3264_v54 = vld [vmem:[%s4692_s1 + $0x460] ss:$8 sps:$4 sm:$0xff]  }
  0xa6   : > { %1947 = vmatprep.mubr.bf16.mxu1 %v3622_v58 }
  0xac   : > { %1795 = vmatmul.mubr.bf16.vlgmr.msra.gmra.mxu0 %v3583_v37  ;;  %v3272_v37 = vld [vmem:[%s4692_s1 + $0x444] ss:$8 sps:$4 sm:$0xff]  }
  0xad   : > { %1948 = vmatmul.mubr.bf16.vlgmr.msra.gmra.mxu1 %v3552_v20  ;;  %2069 = vmatpush1.bf16.msra.mxu0 %v3261_v41  ;;  %v3267_v20 = vld [vmem:[%s4692_s1 + $0x450] ss:$8 sps:$4 sm:$0xff]  }
  0xae   : > { %1804 = vmatprep.mubr.bf16.mxu0 %v3657_v12  ;;  %1957 = vmatprep.mubr.bf16.mxu1 %v3668_v16 }
  0xaf   : > { %2070 = vmatprep.subr.bf16.mxu0 %v3266_v42  ;;  %3025 = vmatpush1.bf16.msra.mxu1 %v3261_v41 }
  0xb0   : > { %3018 = vmatprep.subr.bf16.mxu1 %v3266_v42 }
  0xb1   : > { %2071 = vmatpush1.bf16.msra.mxu0 %v3264_v54 }
  0xb2   : > { %2072 = vmatprep.subr.bf16.mxu0 %v3269_v44 }
  0xb3   : > { %3026 = vmatpush1.bf16.msra.mxu1 %v3264_v54 }
  0xb4   : > { %1805 = vmatmul.mubr.bf16.gmra.mxu0 %v3622_v58  ;;  %3019 = vmatprep.subr.bf16.mxu1 %v3269_v44  ;;  %v3278_v58 = vld [vmem:[%s4692_s1 + $0x424] ss:$8 sps:$4 sm:$0xff]  }
  0xb5   : > { %1958 = vmatmul.mubr.bf16.gmra.mxu1 %v3586_v40  ;;  %1814 = vmatprep.mubr.bf16.mxu0 %v3703_v35  ;;  %v3273_v40 = vld [vmem:[%s4692_s1 + $0x430] ss:$8 sps:$4 sm:$0xff]  }
  0xb6   : > { %1967 = vmatprep.mubr.bf16.mxu1 %v3711_v39  ;;  %2073 = vmatpush1.bf16.msra.mxu0 %v3267_v20 }
  0xb7   : > { %2074 = vmatprep.subr.bf16.mxu0 %v3272_v37  ;;  %3027 = vmatpush1.bf16.msra.mxu1 %v3267_v20 }
  0xb8   : > { %3020 = vmatprep.subr.bf16.mxu1 %v3272_v37 }
  0xba   : > { %2075 = vmatpush1.bf16.msra.mxu0 %v3270_v46 }
  0xbb   : > { %2076 = vmatprep.subr.bf16.mxu0 %v3275_v47  ;;  %3028 = vmatpush1.bf16.msra.mxu1 %v3270_v46 }
  0xbc   : > { %1815 = vmatmul.mubr.bf16.gmra.mxu0 %v3668_v16  ;;  %3021 = vmatprep.subr.bf16.mxu1 %v3275_v47  ;;  %v3285_v16 = vld [vmem:[%s4692_s1 + $0x404] ss:$8 sps:$4 sm:$0xff]  }
  0xbd   : > { %1968 = vmatmul.mubr.bf16.gmra.mxu1 %v3628_v62  ;;  %1824 = vmatprep.mubr.bf16.mxu0 %v3749_v63  ;;  %v3279_v62 = vld [vmem:[%s4692_s1 + $0x410] ss:$8 sps:$4 sm:$0xff]  }
  0xbe   : > { %1977 = vmatprep.mubr.bf16.mxu1 %v3755_v3  ;;  %2077 = vmatpush1.bf16.msra.mxu0 %v3273_v40 }
  0xbf   : > { %2078 = vmatprep.subr.bf16.mxu0 %v3278_v58  ;;  %3029 = vmatpush1.bf16.msra.mxu1 %v3273_v40 }
  0xc0   : > { %3022 = vmatprep.subr.bf16.mxu1 %v3278_v58 }
  0xc2   : > { %2079 = vmatpush1.bf16.msra.mxu0 %v3276_v48 }
  0xc3   : > { %2080 = vmatprep.subr.bf16.mxu0 %v3281_v49  ;;  %3030 = vmatpush1.bf16.msra.mxu1 %v3276_v48 }
  0xc4   : > { %1825 = vmatmul.mubr.bf16.gmra.mxu0 %v3711_v39  ;;  %3023 = vmatprep.subr.bf16.mxu1 %v3281_v49  ;;  %v2869_v39 = vcombine.low %v3964_v27, %v3964_v27 }
  0xc5   : > { %1978 = vmatmul.mubr.bf16.gmra.mxu1 %v3671_v19  ;;  %1834 = vmatprep.mubr.bf16.mxu0 %v3795_v25  ;;  %v355_v19 = vshll.u32 %v3971_v32, 16 }
  0xc6   : > { %1987 = vmatprep.mubr.bf16.mxu1 %v3803_v29  ;;  %2081 = vmatpush1.bf16.msra.mxu0 %v3279_v62  ;;  %v507_v4 = vrot.slane %v2869_v39, 1 }
  0xc7   : > { %2082 = vmatprep.subr.bf16.mxu0 %v3285_v16  ;;  %3031 = vmatpush1.bf16.msra.mxu1 %v3279_v62 }
  0xc8   : > { %3024 = vmatprep.subr.bf16.mxu1 %v3285_v16 }
  0xca   : > { %2083 = vmatpush1.bf16.msra.mxu0 %v3283_v45 }
  0xcb   : > { %3032 = vmatpush1.bf16.msra.mxu1 %v3283_v45 }
  0xcc   : > { %1835 = vmatmul.mubr.bf16.gmra.mxu0 %v3755_v3  ;;  %v197_v3 = vld [vmem:[%s3468_s30 + $0x6c] sm:$0xf] }
  0xcd   : > { %1988 = vmatmul.mubr.bf16.gmra.mxu1 %v3714_v43  ;;  %1844 = vmatprep.mubr.bf16.mxu0 %v3841_v52  ;;  %v196_v43 = vld [vmem:[%s3468_s30 + $0x68] sm:$0xf] }
  0xce   : > { %1997 = vmatprep.mubr.bf16.mxu1 %v3848_v56  ;;  %v4079_v53 = vcombine.low %v196_v43, %v196_v43 }
  0xd4   : > { %1845 = vmatmul.mubr.bf16.gmra.mxu0 %v3803_v29  ;;  %v443_v29 = vshll.u32 %v2869_v39, 16 }
  0xd5   : > { %1998 = vmatmul.mubr.bf16.gmra.mxu1 %v3757_v57  ;;  %1854 = vmatprep.mubr.bf16.mxu0 %v3887_v21  ;;  %v353_v57 = vshrl.u32 %v3971_v32, 16 }
  0xd6   : > { %2007 = vmatprep.mubr.bf16.mxu1 %v3894_v24 }
  0xdc   : > { %1855 = vmatmul.mubr.bf16.gmra.mxu0 %v3848_v56  ;;  %v4072_v56 = vcombine.low %v196_v43, %v197_v3 }
  0xdd   : > { %2008 = vmatmul.mubr.bf16.gmra.mxu1 %v3799_v28  ;;  %1864 = vmatprep.mubr.bf16.mxu0 %v3931_v51  ;;  %v357_v28 = vrot.slane %v355_v19, 1 }
  0xde   : > { %2017 = vmatprep.mubr.bf16.mxu1 %v3936_v59  ;;  %v362_v50 = vshll.u32 %v4072_v56, 16  ;;  %v360_v61 = vshrl.u32 %v4072_v56, 16 }
  0xe0   : > { %v364_v1 = vrot.slane %v362_v50, 1 }
  0xe2   : > { %v365_v5 = vor.u32 %v364_v1, %v360_v61 }
  0xe4   : > { %1865 = vmatmul.mubr.bf16.gmra.mxu0 %v3894_v24  ;;  %v445_v24 = vrot.slane %v443_v29, 1 }
  0xe5   : > { %2018 = vmatmul.mubr.bf16.gmra.mxu1 %v3844_v55  ;;  %1874 = vmatprep.mubr.bf16.mxu0 %v3951_v11  ;;  %v358_v55 = vor.u32 %v357_v28, %v353_v57 }
  0xe6   : > { %2027 = vmatprep.mubr.bf16.mxu1 %v3955_v13 }
  0xe7   : > { %v479_v60 = vsel %vm3515_vm2, %v358_v55, %v445_v24 }
  0xec   : > { %1875 = vmatmul.mubr.bf16.gmra.mxu0 %v3936_v59  ;;  %v447_v59 = vshll.u32 %v4079_v53, 16 }
  0xed   : > { %2028 = vmatmul.mubr.bf16.gmra.mxu1 %v3890_v23  ;;  %1884 = vmatprep.mubr.bf16.mxu0 %v3968_v31  ;;  %v493_v23 = vrot.slane %v3971_v32, 1 }
  0xee   : > { %2037 = vmatprep.mubr.bf16.mxu1 %v3975_v33  ;;  %v449_v6 = vrot.slane %v447_v59, 1 }
  0xef   : > { %v4090_v7 = vsel %vm509_vm3, %v493_v23, %v507_v4 }
  0xf0   : > { %v480_v8 = vsel %vm3515_vm2, %v365_v5, %v449_v6 }
  0xf4   : > { %1885 = vmatmul.mubr.bf16.gmra.mxu0 %v3955_v13  ;;  %v3296_v13 = vmov 0  }
  0xf5   : > { %2038 = vmatmul.mubr.bf16.gmra.mxu1 %v3938_v0  ;;  %1894 = vmatprep.mubr.bf16.mxu0 %v3983_v38  ;;  %v4695_v0 = vlaneseq }
  0xf6   : > { %2047 = vmatprep.mubr.bf16.mxu1 %v479_v60 }
  0xf7   : > { %v4098_v10 = vshrl.u32 %v4695_v0, 7 }
  0xf9   : > { %v728_v2 = vsub.s32 0, %v4098_v10  ;;  %v732_v17 = vsub.s32 1, %v4098_v10 }
  0xfb   : > { %v4108_v9 = vrot.slane %v724_v15, %v728_v2  ;;  %v4110_v14 = vrot.slane %v724_v15, %v732_v17 }
  0xfc   : > { %1895 = vmatmul.mubr.bf16.gmra.mxu0 %v3975_v33 }
  0xfd   : > { %2048 = vmatmul.mubr.bf16.gmra.mxu1 %v3971_v32  ;;  %1904 = vmatprep.mubr.bf16.mxu0 %v4090_v7 }
  0xfe   : > { %2057 = vmatprep.mubr.bf16.mxu1 %v480_v8 }
 0x104   : > { %1905 = vmatmul.mubr.bf16.gmra.mxu0 %v479_v60 }
 0x105   : > { %2058 = vmatmul.mubr.bf16.gmra.mxu1 %v4072_v56  ;;  %2100 = vmatprep.mubr.bf16.mxu0 %v3296_v13 }
 0x106   : > { %2160 = vmatprep.mubr.bf16.mxu1 %v3296_v13 }
 0x10c   : > { %v1490_v18 = vpop.f32.mrf.mxu0  ;;  %2101 = vmatmul.mubr.bf16.vlgmr.msra.gmra.mxu0 %v3657_v12 }
 0x10d   : > { %v1643_v22 = vpop.f32.mrf.mxu1  ;;  %2161 = vmatmul.mubr.bf16.vlgmr.msra.gmra.mxu1 %v3931_v51  ;;  %v1491_v26 = vadd.f32 %v1490_v18, %v4108_v9  ;;  %2110 = vmatprep.mubr.bf16.mxu0 %v3296_v13 }
 0x10e   : > { %2170 = vmatprep.mubr.bf16.mxu1 %v3296_v13  ;;  %v1492_v27 = vpop.f32.mrf.mxu0 }
 0x10f   : > { %v1645_v30 = vpop.f32.mrf.mxu1  ;;  %v4117_v32 = vadd.f32 %v1643_v22, %v1491_v26  ;;  %v1493_v33 = vadd.f32 %v1492_v27, %v4110_v14 }
 0x110   : > { %v1494_v34 = vpop.f32.mrf.mxu0 }
 0x111   : > { %v1647_v36 = vpop.f32.mrf.mxu1  ;;  %v4120_v41 = vadd.f32 %v1645_v30, %v1493_v33  ;;  %v1495_v12 = vadd.f32 %v1494_v34, %v4108_v9 }
 0x112   : > { %v1496_v42 = vpop.f32.mrf.mxu0 }
 0x113   : > { %v1649_v51 = vpop.f32.mrf.mxu1  ;;  %v4123_v54 = vadd.f32 %v1647_v36, %v1495_v12  ;;  %v1497_v44 = vadd.f32 %v1496_v42, %v4110_v14 }
 0x114   : > { %v1500_v20 = vpop.f32.mrf.mxu0  ;;  %2111 = vmatmul.mubr.bf16.gmra.mxu0 %v3703_v35 }
 0x115   : > { %v1653_v37 = vpop.f32.mrf.mxu1  ;;  %2171 = vmatmul.mubr.bf16.gmra.mxu1 %v3951_v11  ;;  %v4128_v46 = vadd.f32 %v1649_v51, %v1497_v44  ;;  %v1501_v47 = vadd.f32 %v1500_v20, %v4108_v9  ;;  %2120 = vmatprep.mubr.bf16.mxu0 %v3296_v13 }
 0x116   : > { %2180 = vmatprep.mubr.bf16.mxu1 %v3296_v13  ;;  %v1502_v40 = vpop.f32.mrf.mxu0 }
 0x117   : > { %v1655_v58 = vpop.f32.mrf.mxu1  ;;  %v4133_v48 = vadd.f32 %v1653_v37, %v1501_v47  ;;  %v1503_v49 = vadd.f32 %v1502_v40, %v4110_v14  ;;  %v494_v37 = vrot.slane %v4072_v56, 1  ;;  %v508_v47 = vrot.slane %v4079_v53, 1 }
 0x118   : > { %v1504_v62 = vpop.f32.mrf.mxu0 }
 0x119   : > { %v1657_v16 = vpop.f32.mrf.mxu1  ;;  %v4136_v45 = vadd.f32 %v1655_v58, %v1503_v49  ;;  %v1505_v35 = vadd.f32 %v1504_v62, %v4108_v9 }
 0x11a   : > { %v1506_v11 = vpop.f32.mrf.mxu0 }
 0x11b   : > { %v1659_v19 = vpop.f32.mrf.mxu1  ;;  %v4139_v39 = vadd.f32 %v1657_v16, %v1505_v35  ;;  %v1507_v43 = vadd.f32 %v1506_v11, %v4110_v14  ;;  %v564_v11 = vsel %vm509_vm3, %v494_v37, %v508_v47 }
 0x11c   : > { %v1510_v3 = vpop.f32.mrf.mxu0  ;;  %2121 = vmatmul.mubr.bf16.gmra.mxu0 %v3749_v63 }
 0x11d   : > { %v1663_v57 = vpop.f32.mrf.mxu1  ;;  %2181 = vmatmul.mubr.bf16.gmra.mxu1 %v3968_v31  ;;  %v4144_v28 = vadd.f32 %v1659_v19, %v1507_v43  ;;  %v1511_v29 = vadd.f32 %v1510_v3, %v4108_v9  ;;  %2130 = vmatprep.mubr.bf16.mxu0 %v3296_v13 }
 0x11e   : > { %2190 = vmatprep.mubr.bf16.mxu1 %v3296_v13  ;;  %v1512_v55 = vpop.f32.mrf.mxu0 }
 0x11f   : > { %v1665_v24 = vpop.f32.mrf.mxu1  ;;  %v4149_v50 = vadd.f32 %v1663_v57, %v1511_v29  ;;  %v1513_v60 = vadd.f32 %v1512_v55, %v4110_v14 }
 0x120   : > { %v1514_v61 = vpop.f32.mrf.mxu0 }
 0x121   : > { %v1667_v1 = vpop.f32.mrf.mxu1  ;;  %v4152_v59 = vadd.f32 %v1665_v24, %v1513_v60  ;;  %v1515_v63 = vadd.f32 %v1514_v61, %v4108_v9 }
 0x122   : > { %v1516_v31 = vpop.f32.mrf.mxu0 }
 0x123   : > { %v1669_v23 = vpop.f32.mrf.mxu1  ;;  %v4155_v4 = vadd.f32 %v1667_v1, %v1515_v63  ;;  %v1517_v5 = vadd.f32 %v1516_v31, %v4110_v14 }
 0x124   : > { %v1520_v6 = vpop.f32.mrf.mxu0  ;;  %2131 = vmatmul.mubr.bf16.gmra.mxu0 %v3795_v25 }
 0x125   : > { %v1673_v8 = vpop.f32.mrf.mxu1  ;;  %2191 = vmatmul.mubr.bf16.gmra.mxu1 %v3983_v38  ;;  %v4160_v2 = vadd.f32 %v1669_v23, %v1517_v5  ;;  %v1521_v15 = vadd.f32 %v1520_v6, %v4108_v9  ;;  %2140 = vmatprep.mubr.bf16.mxu0 %v3296_v13 }
 0x126   : > { %2200 = vmatprep.mubr.bf16.mxu1 %v3296_v13  ;;  %v1522_v17 = vpop.f32.mrf.mxu0 }
 0x127   : > { %v1675_v18 = vpop.f32.mrf.mxu1  ;;  %v4165_v22 = vadd.f32 %v1673_v8, %v1521_v15  ;;  %v1523_v26 = vadd.f32 %v1522_v17, %v4110_v14 }
 0x128   : > { %v1524_v27 = vpop.f32.mrf.mxu0 }
 0x129   : > { %v1677_v30 = vpop.f32.mrf.mxu1  ;;  %v4168_v33 = vadd.f32 %v1675_v18, %v1523_v26  ;;  %v1525_v25 = vadd.f32 %v1524_v27, %v4108_v9 }
 0x12a   : > { %v1526_v38 = vpop.f32.mrf.mxu0 }
 0x12b   : > { %v1679_v34 = vpop.f32.mrf.mxu1  ;;  %v4171_v36 = vadd.f32 %v1677_v30, %v1525_v25  ;;  %v1527_v12 = vadd.f32 %v1526_v38, %v4110_v14 }
 0x12c   : > { %v1530_v42 = vpop.f32.mrf.mxu0  ;;  %2141 = vmatmul.mubr.bf16.gmra.mxu0 %v3841_v52 }
 0x12d   : > { %v1683_v51 = vpop.f32.mrf.mxu1  ;;  %2201 = vmatmul.mubr.bf16.gmra.mxu1 %v4090_v7  ;;  %v4176_v44 = vadd.f32 %v1679_v34, %v1527_v12  ;;  %v1531_v20 = vadd.f32 %v1530_v42, %v4108_v9  ;;  %2150 = vmatprep.mubr.bf16.mxu0 %v3296_v13 }
 0x12e   : > { %2210 = vmatprep.mubr.bf16.mxu1 %v3296_v13  ;;  %v1532_v40 = vpop.f32.mrf.mxu0 }
 0x12f   : > { %v1685_v58 = vpop.f32.mrf.mxu1  ;;  %v4183_v49 = vadd.f32 %v1683_v51, %v1531_v20  ;;  %v1533_v52 = vadd.f32 %v1532_v40, %v4110_v14 }
 0x130   : > { %v1534_v62 = vpop.f32.mrf.mxu0 }
 0x131   : > { %v1687_v7 = vpop.f32.mrf.mxu1  ;;  %v4186_v16 = vadd.f32 %v1685_v58, %v1533_v52  ;;  %v1535_v35 = vadd.f32 %v1534_v62, %v4108_v9 }
 0x132   : > { %v1536_v19 = vpop.f32.mrf.mxu0 }
 0x133   : > { %v1689_v13 = vpop.f32.mrf.mxu1  ;;  %v4190_v43 = vadd.f32 %v1687_v7, %v1535_v35  ;;  %v1537_v56 = vadd.f32 %v1536_v19, %v4110_v14 }
 0x134   : > { %v1540_v53 = vpop.f32.mrf.mxu0  ;;  %2151 = vmatmul.mubr.bf16.gmra.mxu0 %v3887_v21 }
 0x135   : > { %v1693_v3 = vpop.f32.mrf.mxu1  ;;  %2211 = vmatmul.mubr.bf16.gmra.mxu1 %v564_v11  ;;  %v4194_v57 = vadd.f32 %v1689_v13, %v1537_v56  ;;  %v1541_v29 = vadd.f32 %v1540_v53, %v4108_v9 }
 0x136   : > { %v1542_v55 = vpop.f32.mrf.mxu0 }
 0x137   : > { %v1695_v24 = vpop.f32.mrf.mxu1  ;;  %v4197_v60 = vadd.f32 %v1693_v3, %v1541_v29  ;;  %v1543_v61 = vadd.f32 %v1542_v55, %v4110_v14 }
 0x138   : > { %v1544_v1 = vpop.f32.mrf.mxu0 }
 0x139   : > { %v1697_v63 = vpop.f32.mrf.mxu1  ;;  %v4200_v31 = vadd.f32 %v1695_v24, %v1543_v61  ;;  %v1545_v23 = vadd.f32 %v1544_v1, %v4108_v9 }
 0x13a   : > { %v1546_v5 = vpop.f32.mrf.mxu0 }
 0x13b   : > { %v1699_v6 = vpop.f32.mrf.mxu1  ;;  %v4203_v21 = vadd.f32 %v1697_v63, %v1545_v23  ;;  %v1547_v8 = vadd.f32 %v1546_v5, %v4110_v14 }
 0x13c   : > { %v1550_v15 = vpop.f32.mrf.mxu0 }
 0x13d   : > { %v1703_v17 = vpop.f32.mrf.mxu1  ;;  %v4206_v18 = vadd.f32 %v1699_v6, %v1547_v8  ;;  %v1551_v26 = vadd.f32 %v1550_v15, %v4108_v9 }
 0x13e   : > { %v1552_v27 = vpop.f32.mrf.mxu0 }
 0x13f   : > { %v1705_v30 = vpop.f32.mrf.mxu1  ;;  %v4209_v25 = vadd.f32 %v1703_v17, %v1551_v26  ;;  %v1553_v38 = vadd.f32 %v1552_v27, %v4110_v14 }
 0x140   : > { %v1554_v34 = vpop.f32.mrf.mxu0 }
 0x141   : > { %v1707_v12 = vpop.f32.mrf.mxu1  ;;  %v4212_v42 = vadd.f32 %v1705_v30, %v1553_v38  ;;  %v1555_v51 = vadd.f32 %v1554_v34, %v4108_v9 }
 0x142   : > { %v1556_v20 = vpop.f32.mrf.mxu0 }
 0x143   : > { %v1709_v37 = vpop.f32.mrf.mxu1  ;;  %v4215_v47 = vadd.f32 %v1707_v12, %v1555_v51  ;;  %v1557_v40 = vadd.f32 %v1556_v20, %v4110_v14 }
 0x144   : > { %v1560_v58 = vpop.f32.mrf.mxu0 }
 0x145   : > { %v1713_v52 = vpop.f32.mrf.mxu1  ;;  %v4218_v62 = vadd.f32 %v1709_v37, %v1557_v40  ;;  %v1561_v7 = vadd.f32 %v1560_v58, %v4108_v9 }
 0x146   : > { %v1562_v35 = vpop.f32.mrf.mxu0 }
 0x147   : > { %v1715_v11 = vpop.f32.mrf.mxu1  ;;  %v4221_v19 = vadd.f32 %v1713_v52, %v1561_v7  ;;  %v1563_v13 = vadd.f32 %v1562_v35, %v4110_v14 }
 0x148   : > { %v1564_v56 = vpop.f32.mrf.mxu0 }
 0x149   : > { %v1717_v53 = vpop.f32.mrf.mxu1  ;;  %v4224_v3 = vadd.f32 %v1715_v11, %v1563_v13  ;;  %v1565_v29 = vadd.f32 %v1564_v56, %v4108_v9 }
 0x14a   : > { %v1566_v55 = vpop.f32.mrf.mxu0 }
 0x14b   : > { %v1719_v24 = vpop.f32.mrf.mxu1  ;;  %v4227_v61 = vadd.f32 %v1717_v53, %v1565_v29  ;;  %v1567_v1 = vadd.f32 %v1566_v55, %v4110_v14 }
 0x14c   : > { %v1570_v63 = vpop.f32.mrf.mxu0 }
 0x14d   : > { %v1723_v23 = vpop.f32.mrf.mxu1  ;;  %v4230_v5 = vadd.f32 %v1719_v24, %v1567_v1  ;;  %v1571_v6 = vadd.f32 %v1570_v63, %v4108_v9 }
 0x14e   : > { %v1572_v8 = vpop.f32.mrf.mxu0 }
 0x14f   : > { %v1725_v15 = vpop.f32.mrf.mxu1  ;;  %v4233_v17 = vadd.f32 %v1723_v23, %v1571_v6  ;;  %v1573_v26 = vadd.f32 %v1572_v8, %v4110_v14 }
 0x150   : > { %v1574_v27 = vpop.f32.mrf.mxu0 }
 0x151   : > { %v1727_v30 = vpop.f32.mrf.mxu1  ;;  %v4236_v38 = vadd.f32 %v1725_v15, %v1573_v26  ;;  %v1575_v34 = vadd.f32 %v1574_v27, %v4108_v9 }
 0x152   : > { %v1576_v12 = vpop.f32.mrf.mxu0 }
 0x153   : > { %v1729_v51 = vpop.f32.mrf.mxu1  ;;  %v4239_v20 = vadd.f32 %v1727_v30, %v1575_v34  ;;  %v1577_v37 = vadd.f32 %v1576_v12, %v4110_v14 }
 0x154   : > { %v1580_v40 = vpop.f32.mrf.mxu0 }
 0x155   : > { %v1733_v58 = vpop.f32.mrf.mxu1  ;;  %v4242_v52 = vadd.f32 %v1729_v51, %v1577_v37  ;;  %v1581_v7 = vadd.f32 %v1580_v40, %v4108_v9 }
 0x156   : > { %v1582_v35 = vpop.f32.mrf.mxu0 }
 0x157   : > { %v1735_v11 = vpop.f32.mrf.mxu1  ;;  %v4245_v13 = vadd.f32 %v1733_v58, %v1581_v7  ;;  %v1583_v56 = vadd.f32 %v1582_v35, %v4110_v14 }
 0x158   : > { %v1584_v53 = vpop.f32.mrf.mxu0 }
 0x159   : > { %v1737_v29 = vpop.f32.mrf.mxu1  ;;  %v4248_v55 = vadd.f32 %v1735_v11, %v1583_v56  ;;  %v1585_v24 = vadd.f32 %v1584_v53, %v4108_v9 }
 0x15a   : > { %v1586_v1 = vpop.f32.mrf.mxu0 }
 0x15b   : > { %v1739_v63 = vpop.f32.mrf.mxu1  ;;  %v4251_v23 = vadd.f32 %v1737_v29, %v1585_v24  ;;  %v1587_v6 = vadd.f32 %v1586_v1, %v4110_v14 }
 0x15c   : > { %v1590_v8 = vpop.f32.mrf.mxu0 }
 0x15d   : > { %v1743_v15 = vpop.f32.mrf.mxu1  ;;  %v4254_v26 = vadd.f32 %v1739_v63, %v1587_v6  ;;  %v1591_v27 = vadd.f32 %v1590_v8, %v4108_v9 }
 0x15e   : > { %v1592_v30 = vpop.f32.mrf.mxu0 }
 0x15f   : > { %4698 = vst [vmem:[#allocation2_spill] sm:$0xff] %v4254_v26  ;;  %v1745_v34 = vpop.f32.mrf.mxu1  ;;  %v4257_v12 = vadd.f32 %v1743_v15, %v1591_v27  ;;  %v1593_v51 = vadd.f32 %v1592_v30, %v4110_v14 }
 0x160   : > { %v1594_v37 = vpop.f32.mrf.mxu0 }
 0x161   : > { %4699 = vst [vmem:[#allocation3_spill] sm:$0xff] %v4257_v12  ;;  %v1747_v40 = vpop.f32.mrf.mxu1  ;;  %v4260_v58 = vadd.f32 %v1745_v34, %v1593_v51  ;;  %v1595_v7 = vadd.f32 %v1594_v37, %v4108_v9 }
 0x162   : > { %v1596_v35 = vpop.f32.mrf.mxu0 }
 0x163   : > { %4700 = vst [vmem:[#allocation4_spill] sm:$0xff] %v4260_v58  ;;  %v1749_v11 = vpop.f32.mrf.mxu1  ;;  %v4263_v56 = vadd.f32 %v1747_v40, %v1595_v7  ;;  %v1597_v53 = vadd.f32 %v1596_v35, %v4110_v14 }
 0x164   : > { %v1600_v29 = vpop.f32.mrf.mxu0 }
 0x165   : > { %4701 = vst [vmem:[#allocation5_spill] sm:$0xff] %v4263_v56  ;;  %v1753_v24 = vpop.f32.mrf.mxu1  ;;  %v4266_v1 = vadd.f32 %v1749_v11, %v1597_v53  ;;  %v1601_v63 = vadd.f32 %v1600_v29, %v4108_v9 }
 0x166   : > { %v1602_v6 = vpop.f32.mrf.mxu0 }
 0x167   : > { %4702 = vst [vmem:[#allocation6_spill] sm:$0xff] %v4266_v1  ;;  %v1755_v8 = vpop.f32.mrf.mxu1  ;;  %v4269_v15 = vadd.f32 %v1753_v24, %v1601_v63  ;;  %v1603_v27 = vadd.f32 %v1602_v6, %v4110_v14 }
 0x168   : > { %v1604_v30 = vpop.f32.mrf.mxu0 }
 0x169   : > { %4703 = vst [vmem:[#allocation7_spill] sm:$0xff] %v4269_v15  ;;  %v1757_v34 = vpop.f32.mrf.mxu1  ;;  %v4272_v51 = vadd.f32 %v1755_v8, %v1603_v27  ;;  %v1605_v37 = vadd.f32 %v1604_v30, %v4108_v9 }
 0x16a   : > { %v1606_v40 = vpop.f32.mrf.mxu0 }
 0x16b   : > { %4704 = vst [vmem:[#allocation8_spill] sm:$0xff] %v4272_v51  ;;  %v1759_v7 = vpop.f32.mrf.mxu1  ;;  %v4275_v35 = vadd.f32 %v1757_v34, %v1605_v37  ;;  %v1607_v11 = vadd.f32 %v1606_v40, %v4110_v14 }
 0x16c   : > { %v1796_v53 = vpop.f32.mrf.mxu0 }
 0x16d   : > { %4705 = vst [vmem:[#allocation9_spill] sm:$0xff] %v4275_v35  ;;  %v1949_v29 = vpop.f32.mrf.mxu1  ;;  %v4278_v0 = vadd.f32 %v1759_v7, %v1607_v11  ;;  %v1797_v24 = vadd.f32 %v1796_v53, %v4117_v32 }
 0x16e   : > { %v1798_v63 = vpop.f32.mrf.mxu0 }
 0x16f   : > { %4706 = vst [vmem:[#allocation10_spill] sm:$0xff] %v4278_v0  ;;  %v1951_v6 = vpop.f32.mrf.mxu1  ;;  %v4281_v15 = vadd.f32 %v1949_v29, %v1797_v24  ;;  %v1799_v8 = vadd.f32 %v1798_v63, %v4120_v41 }
 0x170   : > { %v1800_v27 = vpop.f32.mrf.mxu0 }
 0x171   : > { %v1953_v9 = vpop.f32.mrf.mxu1  ;;  %v4284_v30 = vadd.f32 %v1951_v6, %v1799_v8  ;;  %v1801_v34 = vadd.f32 %v1800_v27, %v4123_v54 }
 0x172   : > { %v1802_v37 = vpop.f32.mrf.mxu0 }
 0x173   : > { %v1955_v14 = vpop.f32.mrf.mxu1  ;;  %v4287_v40 = vadd.f32 %v1953_v9, %v1801_v34  ;;  %v1803_v7 = vadd.f32 %v1802_v37, %v4128_v46 }
 0x174   : > { %v1806_v11 = vpop.f32.mrf.mxu0 }
 0x175   : > { %v1959_v32 = vpop.f32.mrf.mxu1  ;;  %v4290_v53 = vadd.f32 %v1955_v14, %v1803_v7  ;;  %v1807_v29 = vadd.f32 %v1806_v11, %v4133_v48 }
 0x176   : > { %v1808_v24 = vpop.f32.mrf.mxu0 }
 0x177   : > { %4707 = vst [vmem:[#allocation11_spill] sm:$0xff] %v4290_v53  ;;  %v1961_v41 = vpop.f32.mrf.mxu1  ;;  %v4293_v63 = vadd.f32 %v1959_v32, %v1807_v29  ;;  %v1809_v6 = vadd.f32 %v1808_v24, %v4136_v45 }
 0x178   : > { %v1810_v8 = vpop.f32.mrf.mxu0 }
 0x179   : > { %4708 = vst [vmem:[#allocation12_spill] sm:$0xff] %v4293_v63  ;;  %v1963_v54 = vpop.f32.mrf.mxu1  ;;  %v4296_v27 = vadd.f32 %v1961_v41, %v1809_v6  ;;  %v1811_v9 = vadd.f32 %v1810_v8, %v4139_v39 }
 0x17a   : > { %v1812_v34 = vpop.f32.mrf.mxu0 }
 0x17b   : > { %4709 = vst [vmem:[#allocation13_spill] sm:$0xff] %v4296_v27  ;;  %v1965_v46 = vpop.f32.mrf.mxu1  ;;  %v4299_v37 = vadd.f32 %v1963_v54, %v1811_v9  ;;  %v1813_v14 = vadd.f32 %v1812_v34, %v4144_v28 }
 0x17c   : > { %v1816_v7 = vpop.f32.mrf.mxu0 }
 0x17d   : > { %4710 = vst [vmem:[#allocation14_spill] sm:$0xff] %v4299_v37  ;;  %v1969_v48 = vpop.f32.mrf.mxu1  ;;  %v4302_v11 = vadd.f32 %v1965_v46, %v1813_v14  ;;  %v1817_v32 = vadd.f32 %v1816_v7, %v4149_v50 }
 0x17e   : > { %v1818_v29 = vpop.f32.mrf.mxu0 }
 0x17f   : > { %4711 = vst [vmem:[#allocation15_spill] sm:$0xff] %v4302_v11  ;;  %v1971_v45 = vpop.f32.mrf.mxu1  ;;  %v4305_v24 = vadd.f32 %v1969_v48, %v1817_v32  ;;  %v1819_v41 = vadd.f32 %v1818_v29, %v4152_v59  ;;  %v4760_v11 = vld [vmem:[#allocation3_spill] sm:$0xff] }
 0x180   : > { %v1820_v6 = vpop.f32.mrf.mxu0 }
 0x181   : > { %4712 = vst [vmem:[#allocation16_spill] sm:$0xff] %v4305_v24  ;;  %v1973_v39 = vpop.f32.mrf.mxu1  ;;  %v4308_v8 = vadd.f32 %v1971_v45, %v1819_v41  ;;  %v1821_v54 = vadd.f32 %v1820_v6, %v4155_v4 }
 0x182   : > { %v1822_v9 = vpop.f32.mrf.mxu0 }
 0x183   : > { %4713 = vst [vmem:[#allocation17_spill] sm:$0xff] %v4308_v8  ;;  %v1975_v28 = vpop.f32.mrf.mxu1  ;;  %v4311_v34 = vadd.f32 %v1973_v39, %v1821_v54  ;;  %v1823_v46 = vadd.f32 %v1822_v9, %v4160_v2  ;;  %v4450_v8 = vadd.s32 88, %v4098_v10 }
 0x184   : > { %v1826_v14 = vpop.f32.mrf.mxu0 }
 0x185   : > { %4714 = vst [vmem:[#allocation18_spill] sm:$0xff] %v4311_v34  ;;  %v1979_v50 = vpop.f32.mrf.mxu1  ;;  %v4314_v7 = vadd.f32 %v1975_v28, %v1823_v46  ;;  %v1827_v48 = vadd.f32 %v1826_v14, %v4165_v22 }
 0x186   : > { %v1828_v32 = vpop.f32.mrf.mxu0 }
 0x187   : > { %4715 = vst [vmem:[#allocation19_spill] sm:$0xff] %v4314_v7  ;;  %v1981_v59 = vpop.f32.mrf.mxu1  ;;  %v4317_v29 = vadd.f32 %v1979_v50, %v1827_v48  ;;  %v1829_v45 = vadd.f32 %v1828_v32, %v4168_v33 }
 0x188   : > { %v1830_v41 = vpop.f32.mrf.mxu0 }
 0x189   : > { %4716 = vst [vmem:[#allocation20_spill] sm:$0xff] %v4317_v29  ;;  %v1983_v4 = vpop.f32.mrf.mxu1  ;;  %v4320_v6 = vadd.f32 %v1981_v59, %v1829_v45  ;;  %v1831_v39 = vadd.f32 %v1830_v41, %v4171_v36  ;;  %v2283_v29 = vadd.s32 104, %v4098_v10 }
 0x18a   : > { %v1832_v54 = vpop.f32.mrf.mxu0 }
 0x18b   : > { %4717 = vst [vmem:[#allocation21_spill] sm:$0xff] %v4320_v6  ;;  %v1985_v2 = vpop.f32.mrf.mxu1  ;;  %v4323_v9 = vadd.f32 %v1983_v4, %v1831_v39  ;;  %v1833_v28 = vadd.f32 %v1832_v54, %v4176_v44 }
 0x18c   : > { %v1836_v46 = vpop.f32.mrf.mxu0 }
 0x18d   : > { %4718 = vst [vmem:[#allocation22_spill] sm:$0xff] %v4323_v9  ;;  %v1989_v22 = vpop.f32.mrf.mxu1  ;;  %v4326_v14 = vadd.f32 %v1985_v2, %v1833_v28  ;;  %v1837_v50 = vadd.f32 %v1836_v46, %v4183_v49 }
 0x18e   : > { %v1838_v48 = vpop.f32.mrf.mxu0 }
 0x18f   : > { %4719 = vst [vmem:[#allocation23_spill] sm:$0xff] %v4326_v14  ;;  %v1991_v33 = vpop.f32.mrf.mxu1  ;;  %v4329_v32 = vadd.f32 %v1989_v22, %v1837_v50  ;;  %v1839_v59 = vadd.f32 %v1838_v48, %v4186_v16 }
 0x190   : > { %v1840_v45 = vpop.f32.mrf.mxu0 }
 0x191   : > { %4720 = vst [vmem:[#allocation24_spill] sm:$0xff] %v4329_v32  ;;  %v1993_v36 = vpop.f32.mrf.mxu1  ;;  %v4332_v41 = vadd.f32 %v1991_v33, %v1839_v59  ;;  %v1841_v4 = vadd.f32 %v1840_v45, %v4190_v43 }
 0x192   : > { %v1842_v39 = vpop.f32.mrf.mxu0 }
 0x193   : > { %4721 = vst [vmem:[#allocation25_spill] sm:$0xff] %v4332_v41  ;;  %v1995_v44 = vpop.f32.mrf.mxu1  ;;  %v4335_v54 = vadd.f32 %v1993_v36, %v1841_v4  ;;  %v1843_v2 = vadd.f32 %v1842_v39, %v4194_v57 }
 0x194   : > { %v1846_v28 = vpop.f32.mrf.mxu0 }
 0x195   : > { %4722 = vst [vmem:[#allocation26_spill] sm:$0xff] %v4335_v54  ;;  %v1999_v49 = vpop.f32.mrf.mxu1  ;;  %v4338_v46 = vadd.f32 %v1995_v44, %v1843_v2  ;;  %v1847_v22 = vadd.f32 %v1846_v28, %v4197_v60 }
 0x196   : > { %v1848_v50 = vpop.f32.mrf.mxu0 }
 0x197   : > { %4723 = vst [vmem:[#allocation27_spill] sm:$0xff] %v4338_v46  ;;  %v2001_v16 = vpop.f32.mrf.mxu1  ;;  %v4341_v48 = vadd.f32 %v1999_v49, %v1847_v22  ;;  %v1849_v33 = vadd.f32 %v1848_v50, %v4200_v31 }
 0x198   : > { %v1850_v59 = vpop.f32.mrf.mxu0 }
 0x199   : > { %4724 = vst [vmem:[#allocation28_spill] sm:$0xff] %v4341_v48  ;;  %v2003_v43 = vpop.f32.mrf.mxu1  ;;  %v4344_v45 = vadd.f32 %v2001_v16, %v1849_v33  ;;  %v1851_v36 = vadd.f32 %v1850_v59, %v4203_v21 }
 0x19a   : > { %v1852_v4 = vpop.f32.mrf.mxu0 }
 0x19b   : > { %4725 = vst [vmem:[#allocation29_spill] sm:$0xff] %v4344_v45  ;;  %v2005_v57 = vpop.f32.mrf.mxu1  ;;  %v4347_v39 = vadd.f32 %v2003_v43, %v1851_v36  ;;  %v1853_v44 = vadd.f32 %v1852_v4, %v4206_v18 }
 0x19c   : > { %v1856_v2 = vpop.f32.mrf.mxu0 }
 0x19d   : > { %4726 = vst [vmem:[#allocation30_spill] sm:$0xff] %v4347_v39  ;;  %v2009_v60 = vpop.f32.mrf.mxu1  ;;  %v4350_v28 = vadd.f32 %v2005_v57, %v1853_v44  ;;  %v1857_v49 = vadd.f32 %v1856_v2, %v4209_v25 }
 0x19e   : > { %v1858_v22 = vpop.f32.mrf.mxu0 }
 0x19f   : > { %4727 = vst [vmem:[#allocation31_spill] sm:$0xff] %v4350_v28  ;;  %v2011_v31 = vpop.f32.mrf.mxu1  ;;  %v4353_v50 = vadd.f32 %v2009_v60, %v1857_v49  ;;  %v1859_v16 = vadd.f32 %v1858_v22, %v4212_v42 }
 0x1a0   : > { %v1860_v33 = vpop.f32.mrf.mxu0 }
 0x1a1   : > { %v2013_v21 = vpop.f32.mrf.mxu1  ;;  %v4356_v59 = vadd.f32 %v2011_v31, %v1859_v16  ;;  %v1861_v43 = vadd.f32 %v1860_v33, %v4215_v47 }
 0x1a2   : > { %v1862_v36 = vpop.f32.mrf.mxu0 }
 0x1a3   : > { %v4359_v18 = vpop.f32.mrf.mxu1  ;;  %v4361_v4 = vadd.f32 %v2013_v21, %v1861_v43  ;;  %v4364_v57 = vadd.f32 %v1862_v36, %v4218_v62 }
 0x1a4   : > { %v1866_v25 = vpop.f32.mrf.mxu0 }
 0x1a5   : > { %v4366_v44 = vpop.f32.mrf.mxu1  ;;  %v4369_v2 = vadd.f32 %v1866_v25, %v4221_v19 }
 0x1a6   : > { %v1868_v42 = vpop.f32.mrf.mxu0 }
 0x1a7   : > { %v4371_v60 = vpop.f32.mrf.mxu1  ;;  %v1869_v12 = vadd.f32 %v1868_v42, %v4224_v3 }
 0x1a8   : > { %v1870_v49 = vpop.f32.mrf.mxu0 }
 0x1a9   : > { %v4373_v22 = vpop.f32.mrf.mxu1 }
 0x1aa   : > { %v1872_v47 = vpop.f32.mrf.mxu0 }
 0x1ab   : > { %v4375_v31 = vpop.f32.mrf.mxu1 }
 0x1ac   : > { %v1876_v16 = vpop.f32.mrf.mxu0 }
 0x1ad   : > { %v4377_v33 = vpop.f32.mrf.mxu1  ;;  %v1877_v42 = vadd.f32 %v1876_v16, %v4233_v17 }
 0x1ae   : > { %v1878_v62 = vpop.f32.mrf.mxu0 }
 0x1af   : > { %v4379_v21 = vpop.f32.mrf.mxu1 }
 0x1b0   : > { %v1880_v43 = vpop.f32.mrf.mxu0 }
 0x1b1   : > { %v4381_v36 = vpop.f32.mrf.mxu1 }
 0x1b2   : > { %v4383_v19 = vpop.f32.mrf.mxu0 }
 0x1b3   : > { %v4385_v25 = vpop.f32.mrf.mxu1 }
 0x1b4   : > { %v4387_v28 = vpop.f32.mrf.mxu0 }
 0x1b5   : > { %v4389_v39 = vpop.f32.mrf.mxu1 }
 0x1b6   : > { %v1888_v45 = vpop.f32.mrf.mxu0 }
 0x1b7   : > { %v4391_v0 = vpop.f32.mrf.mxu1  ;;  %v1889_v17 = vadd.f32 %v1888_v45, %v4248_v55 }
 0x1b8   : > { %v1890_v48 = vpop.f32.mrf.mxu0 }
 0x1b9   : > { %v4393_v51 = vpop.f32.mrf.mxu1 }
 0x1ba   : > { %v4395_v46 = vpop.f32.mrf.mxu0 }
 0x1bb   : > { %4728 = vst [vmem:[#allocation32_spill] sm:$0xff] %v4395_v46  ;;  %v4397_v54 = vpop.f32.mrf.mxu1  ;;  %v1871_v46 = vadd.f32 %v1870_v49, %v4227_v61  ;;  %v4471_v61 = vadd.s32 184, %v4098_v10  ;;  %v1879_v49 = vadd.f32 %v1878_v62, %v4236_v38  ;;  %v1891_v38 = vadd.f32 %v1890_v48, %v4251_v23 }
 0x1bc   : > { %4729 = vst [vmem:[#allocation33_spill] sm:$0xff] %v4397_v54  ;;  %v4399_v35 = vpop.f32.mrf.mxu0 }
 0x1bd   : > { %4730 = vst [vmem:[#allocation34_spill] sm:$0xff] %v4399_v35  ;;  %v4401_v41 = vpop.f32.mrf.mxu1  ;;  %v2024_v3 = vadd.f32 %v4373_v22, %v1871_v46  ;;  %v4501_v55 = vadd.f32 %v4379_v21, %v1879_v49  ;;  %v4754_v21 = vld [vmem:[#allocation12_spill] sm:$0xff] }
 0x1be   : > { %4731 = vst [vmem:[#allocation35_spill] sm:$0xff] %v4401_v41  ;;  %v4403_v32 = vpop.f32.mrf.mxu0 }
 0x1bf   : > { %4732 = vst [vmem:[#allocation36_spill] sm:$0xff] %v4403_v32  ;;  %v4405_v14 = vpop.f32.mrf.mxu1  ;;  %v2389_v32 = vand.u32 15, %v2283_v29  ;;  %v4444_v29 = vadd.s32 72, %v4098_v10 }
 0x1c0   : > { %4733 = vst [vmem:[#allocation37_spill] sm:$0xff] %v4405_v14  ;;  %v4407_v9 = vpop.f32.mrf.mxu0  ;;  %v2271_v14 = vadd.s32 8, %v4098_v10 }
 0x1c1   : > { %4734 = vst [vmem:[#allocation38_spill] sm:$0xff] %v4407_v9  ;;  %v4409_v6 = vpop.f32.mrf.mxu1  ;;  %v2273_v9 = vadd.s32 24, %v4098_v10  ;;  %vm4456_vm4 = vcmp.lt.s32.totalorder %v2389_v32, 12 }
 0x1c2   : > { %4735 = vst [vmem:[#allocation39_spill] sm:$0xff] %v4409_v6  ;;  %v4411_v1 = vpop.f32.mrf.mxu0  ;;  %v2285_v6 = vadd.s32 120, %v4098_v10  ;;  %v2305_v24 = vand.u32 15, %v2271_v14  ;;  %v1881_v14 = vadd.f32 %v1880_v43, %v4239_v20 }
 0x1c3   : > { %4736 = vst [vmem:[#allocation40_spill] sm:$0xff] %v4411_v1  ;;  %v4413_v56 = vpop.f32.mrf.mxu1  ;;  %v4428_v1 = vadd.s32 40, %v4098_v10  ;;  %v2319_v35 = vand.u32 15, %v2273_v9  ;;  %v1883_v9 = vadd.f32 %v4383_v19, %v4242_v52 }
 0x1c4   : > { %4737 = vst [vmem:[#allocation41_spill] sm:$0xff] %v4413_v56  ;;  %v4416_v7 = vpop.f32.mrf.mxu0  ;;  %v2403_v26 = vand.u32 15, %v2285_v6  ;;  %v2016_v6 = vadd.f32 %v4359_v18, %v4364_v57  ;;  %v1887_v18 = vadd.f32 %v4387_v28, %v4245_v13  ;;  %vm4492_vm5 = vcmp.lt.s32.totalorder %v2305_v24, 12 }
 0x1c5   : > { %4738 = vst [vmem:[#allocation42_spill] sm:$0xff] %v4416_v7  ;;  %v4418_v58 = vpop.f32.mrf.mxu1  ;;  %v4447_v7 = vadd.s32 168, %v4098_v10  ;;  %v2333_v37 = vand.u32 15, %v4428_v1  ;;  %v4498_v13 = vadd.f32 %v4377_v33, %v1877_v42  ;;  %v4504_v23 = vadd.f32 %v4381_v36, %v1881_v14 }
 0x1c6   : > { %4739 = vst [vmem:[#allocation43_spill] sm:$0xff] %v4418_v58  ;;  %v4420_v34 = vpop.f32.mrf.mxu0  ;;  %v4435_v58 = vadd.s32 136, %v4098_v10  ;;  %vm4507_vm6 = vcmp.lt.s32.totalorder %v2319_v35, 12  ;;  %vm4511_vm7 = vcmp.lt.s32.totalorder %v2403_v26, 12  ;;  %v4516_v24 = vadd.f32 %v4385_v25, %v1883_v9  ;;  %v4755_v25 = vld [vmem:[#allocation13_spill] sm:$0xff]  ;;  %v4756_v9 = vld [vmem:[#allocation11_spill] sm:$0xff] }
 0x1c7   : > { %4740 = vst [vmem:[#allocation44_spill] sm:$0xff] %v4420_v34  ;;  %v4422_v41 = vpop.f32.mrf.mxu1  ;;  %v4438_v34 = vadd.s32 56, %v4098_v10  ;;  %v4520_v28 = vadd.f32 %v4389_v39, %v1887_v18  ;;  %v4526_v35 = vadd.f32 %v4393_v51, %v1891_v38  ;;  %vm4542_vm8 = vcmp.lt.s32.totalorder %v2333_v37, 12 }
 0x1c8   : > { %4741 = vst [vmem:[#allocation45_spill] sm:$0xff] %v4422_v41  ;;  %v4430_v56 = vpop.f32.mrf.mxu0  ;;  %v4441_v41 = vadd.s32 152, %v4098_v10  ;;  %v2417_v63 = vand.u32 15, %v4435_v58  ;;  %v4767_v58 = vld [vmem:[#allocation16_spill] sm:$0xff] }
 0x1c9   : > { %4742 = vst [vmem:[#allocation46_spill] sm:$0xff] %v4430_v56  ;;  %v4432_v54 = vpop.f32.mrf.mxu1 }
 0x1ca   : > { %4743 = vst [vmem:[#allocation47_spill] sm:$0xff] %v4432_v54  ;;  %v4452_v56 = vpop.f32.mrf.mxu0  ;;  %vm4548_vm9 = vcmp.lt.s32.totalorder %v2417_v63, 12 }
 0x1cb   : > { %4744 = vst [vmem:[#allocation48_spill] sm:$0xff] %v4452_v56  ;;  %v4454_v54 = vpop.f32.mrf.mxu1 }
 0x1cc   : > { %4745 = vst [vmem:[#allocation49_spill] sm:$0xff] %v4454_v54  ;;  %v2102_v53 = vpop.f32.mrf.mxu0  ;;  %v1873_v54 = vadd.f32 %v1872_v47, %v4230_v5  ;;  %v2020_v5 = vadd.f32 %v4366_v44, %v4369_v2  ;;  %v2022_v47 = vadd.f32 %v4371_v60, %v1869_v12 }
 0x1cd   : > { %v2162_v27 = vpop.f32.mrf.mxu1  ;;  %v2103_v12 = vadd.f32 %v2102_v53, %v4281_v15 }
 0x1ce   : > { %v2104_v56 = vpop.f32.mrf.mxu0  ;;  %v2163_v20 = vadd.f32 %v2162_v27, %v4353_v50  ;;  %v2026_v44 = vadd.f32 %v4375_v31, %v1873_v54  ;;  %v4523_v50 = vadd.f32 %v4391_v0, %v1889_v17 }
 0x1cf   : > { %v2164_v32 = vpop.f32.mrf.mxu1  ;;  %v2105_v46 = vadd.f32 %v2104_v56, %v4284_v30  ;;  %v2221_v60 = vmax.f32 %v2103_v12, 0.0  ;;  %v4771_v56 = vand.u32 15, %v4438_v34  ;;  %v4774_v30 = vand.u32 15, %v4441_v41 }
 0x1d0   : > { %v2106_v57 = vpop.f32.mrf.mxu0  ;;  %v2165_v27 = vadd.f32 %v2164_v32, %v4356_v59  ;;  %v2245_v26 = vmax.f32 %v2163_v20, 0.0 }
 0x1d1   : > { %v2166_v16 = vpop.f32.mrf.mxu1  ;;  %v2107_v54 = vadd.f32 %v2106_v57, %v4287_v40  ;;  %v2222_v22 = vmax.f32 %v2105_v46, 0.0  ;;  %v4758_v46 = vld [vmem:[#allocation2_spill] sm:$0xff]  ;;  %vm4576_vm10 = vcmp.lt.s32.totalorder %v4771_v56, 12  ;;  %vm4582_vm11 = vcmp.lt.s32.totalorder %v4774_v30, 12 }
 0x1d2   : > { %v2167_v52 = vadd.f32 %v2166_v16, %v4361_v4  ;;  %v2108_v15 = vpop.f32.mrf.mxu0  ;;  %v2246_v33 = vmax.f32 %v2165_v27, 0.0  ;;  %v4757_v16 = vld [vmem:[#allocation14_spill] sm:$0xff] }
 0x1d3   : > { %v2168_v53 = vpop.f32.mrf.mxu1  ;;  %v2223_v19 = vmax.f32 %v2107_v54, 0.0 }
 0x1d4   : > { %v2247_v48 = vmax.f32 %v2167_v52, 0.0  ;;  %v2169_v45 = vadd.f32 %v2168_v53, %v2016_v6  ;;  %v2112_v59 = vpop.f32.mrf.mxu0  ;;  %v2109_v6 = vadd.f32 %v2108_v15, %v4756_v9  ;;  %v4759_v52 = vld [vmem:[#allocation32_spill] sm:$0xff]  ;;  %v4761_v53 = vld [vmem:[#allocation34_spill] sm:$0xff] }
 0x1d5   : > { %v2172_v4 = vpop.f32.mrf.mxu1  ;;  %v2113_v39 = vadd.f32 %v2112_v59, %v4754_v21  ;;  %v1893_v27 = vadd.f32 %v4759_v52, %v4758_v46  ;;  %v1897_v54 = vadd.f32 %v4761_v53, %v4760_v11  ;;  %v4770_v53 = vld [vmem:[#allocation18_spill] sm:$0xff] }
 0x1d6   : > { %v2680_v31 = vsel %vm4456_vm4, %v2247_v48, -inf  ;;  %v2248_v40 = vmax.f32 %v2169_v45, 0.0  ;;  %v2173_v43 = vadd.f32 %v2172_v4, %v2020_v5  ;;  %v2114_v36 = vpop.f32.mrf.mxu0 }
 0x1d7   : > { %v2712_v62 = vmax.f32 %v2680_v31, %v2245_v26  ;;  %v2174_v0 = vpop.f32.mrf.mxu1  ;;  %v2115_v14 = vadd.f32 %v2114_v36, %v4755_v25  ;;  %v2225_v49 = vmax.f32 %v2113_v39, 0.0 }
 0x1d8   : > { %v2681_v51 = vsel %vm4456_vm4, %v2248_v40, -inf  ;;  %v2175_v32 = vadd.f32 %v2174_v0, %v2022_v47  ;;  %v2249_v18 = vmax.f32 %v2173_v43, 0.0  ;;  %v2116_v17 = vpop.f32.mrf.mxu0  ;;  %v4788_v40 = vld [vmem:[#allocation37_spill] sm:$0xff] }
 0x1d9   : > { %v2741_v42 = vmax.f32 %v2681_v51, %v2246_v33  ;;  %v2176_v38 = vpop.f32.mrf.mxu1  ;;  %v2226_v20 = vmax.f32 %v2115_v14, 0.0  ;;  %v2117_v5 = vadd.f32 %v2116_v17, %v4757_v16  ;;  %v2702_v48 = vmax.f32 %v2221_v60, %v2225_v49 }
 0x1da   : > { %v2250_v57 = vmax.f32 %v2175_v32, 0.0  ;;  %v2177_v12 = vadd.f32 %v2176_v38, %v2024_v3  ;;  %v2714_v47 = vmax.f32 %v2712_v62, %v2249_v18  ;;  %v2118_v45 = vpop.f32.mrf.mxu0  ;;  %v2656_v60 = vsel %vm4492_vm5, %v2223_v19, -inf  ;;  %v4769_v18 = vld [vmem:[#allocation33_spill] sm:$0xff] }
 0x1db   : > { %v2178_v15 = vpop.f32.mrf.mxu1  ;;  %v2731_v26 = vmax.f32 %v2222_v22, %v2226_v20  ;;  %v2227_v4 = vmax.f32 %v2117_v5, 0.0  ;;  %v2224_v33 = vmax.f32 %v2109_v6, 0.0  ;;  %v4766_v22 = vld [vmem:[#allocation15_spill] sm:$0xff]  ;;  %v4768_v6 = vld [vmem:[#allocation17_spill] sm:$0xff]  ;;  %v4564_v17 = vadd.f32 %v4769_v18, %v1893_v27 }
 0x1dc   : > { %v2743_v59 = vmax.f32 %v2741_v42, %v2250_v57  ;;  %v2251_v31 = vmax.f32 %v2177_v12, 0.0  ;;  %v2119_v62 = vadd.f32 %v2118_v45, %v4766_v22  ;;  %v2179_v21 = vadd.f32 %v2178_v15, %v2026_v44  ;;  %v2122_v39 = vpop.f32.mrf.mxu0 }
 0x1dd   : > { %v2182_v43 = vpop.f32.mrf.mxu1  ;;  %v2660_v1 = vsel %vm4507_vm6, %v2227_v4, -inf  ;;  %v2123_v63 = vadd.f32 %v2122_v39, %v4767_v58  ;;  %v2657_v38 = vsel %vm4492_vm5, %v2224_v33, -inf  ;;  %v4780_v33 = vld [vmem:[#allocation19_spill] sm:$0xff] }
 0x1de   : > { %v2684_v37 = vsel %vm4511_vm7, %v2251_v31, -inf  ;;  %v2183_v36 = vadd.f32 %v2182_v43, %v4498_v13  ;;  %v2703_v0 = vmax.f32 %v2656_v60, %v2660_v1  ;;  %v2228_v25 = vmax.f32 %v2119_v62, 0.0  ;;  %v2124_v14 = vpop.f32.mrf.mxu0  ;;  %v4778_v31 = vld [vmem:[#allocation4_spill] sm:$0xff] }
 0x1df   : > { %v2716_v51 = vmax.f32 %v2714_v47, %v2684_v37  ;;  %v2252_v19 = vmax.f32 %v2179_v21, 0.0  ;;  %v2184_v32 = vpop.f32.mrf.mxu1  ;;  %v2229_v9 = vmax.f32 %v2123_v63, 0.0  ;;  %v2125_v42 = vadd.f32 %v2124_v14, %v4768_v6  ;;  %v4779_v60 = vld [vmem:[#allocation36_spill] sm:$0xff]  ;;  %v4784_v14 = vld [vmem:[#allocation6_spill] sm:$0xff] }
 0x1e0   : > { %v2253_v44 = vmax.f32 %v2183_v36, 0.0  ;;  %v2185_v49 = vadd.f32 %v2184_v32, %v4501_v55  ;;  %v2661_v13 = vsel %vm4507_vm6, %v2228_v25, -inf  ;;  %v2126_v57 = vpop.f32.mrf.mxu0  ;;  %v4781_v63 = vld [vmem:[#allocation20_spill] sm:$0xff]  ;;  %v4783_v25 = vld [vmem:[#allocation38_spill] sm:$0xff] }
 0x1e1   : > { %v2685_v20 = vsel %vm4511_vm7, %v2252_v19, -inf  ;;  %v2186_v16 = vpop.f32.mrf.mxu1  ;;  %v2732_v5 = vmax.f32 %v2657_v38, %v2661_v13  ;;  %v2704_v46 = vmax.f32 %v2702_v48, %v2229_v9  ;;  %v2230_v11 = vmax.f32 %v2125_v42, 0.0  ;;  %v4777_v48 = vld [vmem:[#allocation35_spill] sm:$0xff]  ;;  %v4785_v32 = vld [vmem:[#allocation40_spill] sm:$0xff] }
 0x1e2   : > { %v2745_v12 = vmax.f32 %v2743_v59, %v2685_v20  ;;  %v2718_v52 = vmax.f32 %v2716_v51, %v2253_v44  ;;  %v2254_v55 = vmax.f32 %v2185_v49, 0.0  ;;  %v2127_v27 = vadd.f32 %v2126_v57, %v4770_v53  ;;  %v2128_v2 = vpop.f32.mrf.mxu0  ;;  %v4782_v51 = vld [vmem:[#allocation5_spill] sm:$0xff] }
 0x1e3   : > { %v2187_v47 = vadd.f32 %v2186_v16, %v4504_v23  ;;  %v2188_v45 = vpop.f32.mrf.mxu1  ;;  %v4587_v4 = vadd.f32 %v4777_v48, %v1897_v54  ;;  %v1899_v23 = vadd.f32 %v4779_v60, %v4778_v31  ;;  %v2129_v22 = vadd.f32 %v2128_v2, %v4780_v33  ;;  %v4789_v2 = vld [vmem:[#allocation39_spill] sm:$0xff] }
 0x1e4   : > { %v2189_v34 = vadd.f32 %v2188_v45, %v4516_v24  ;;  %v2733_v62 = vmax.f32 %v2731_v26, %v2230_v11  ;;  %v2747_v21 = vmax.f32 %v2745_v12, %v2254_v55  ;;  %v2231_v39 = vmax.f32 %v2127_v27, 0.0  ;;  %v2132_v1 = vpop.f32.mrf.mxu0  ;;  %v4786_v11 = vld [vmem:[#allocation21_spill] sm:$0xff] }
 0x1e5   : > { %v2255_v43 = vmax.f32 %v2187_v47, 0.0  ;;  %v2192_v41 = vpop.f32.mrf.mxu1  ;;  %v2232_v37 = vmax.f32 %v2129_v22, 0.0  ;;  %v2133_v36 = vadd.f32 %v2132_v1, %v4781_v63  ;;  %v1901_v19 = vadd.f32 %v4783_v25, %v4782_v51  ;;  %v4799_v1 = vld [vmem:[#allocation23_spill] sm:$0xff] }
 0x1e6   : > { %v2256_v58 = vmax.f32 %v2189_v34, 0.0  ;;  %v2193_v54 = vadd.f32 %v2192_v41, %v4520_v28  ;;  %v1903_v9 = vadd.f32 %v4785_v32, %v4784_v14  ;;  %v2664_v24 = vsel %vm4542_vm8, %v2231_v39, -inf  ;;  %v2134_v44 = vpop.f32.mrf.mxu0  ;;  %v4798_v39 = vld [vmem:[#allocation42_spill] sm:$0xff] }
 0x1e7   : > { %v2688_v26 = vsel %vm4548_vm9, %v2255_v43, -inf  ;;  %v2194_v6 = vpop.f32.mrf.mxu1  ;;  %v4603_v42 = vmax.f32 %v2703_v0, %v2664_v24  ;;  %v2665_v28 = vsel %vm4542_vm8, %v2232_v37, -inf  ;;  %v2233_v20 = vmax.f32 %v2133_v36, 0.0  ;;  %v4787_v0 = vld [vmem:[#allocation22_spill] sm:$0xff]  ;;  %v4800_v24 = vld [vmem:[#allocation24_spill] sm:$0xff] }
 0x1e8   : > { %v2720_v49 = vmax.f32 %v2718_v52, %v2688_v26  ;;  %v2689_v18 = vsel %vm4548_vm9, %v2256_v58, -inf  ;;  %v4609_v38 = vmax.f32 %v2732_v5, %v2665_v28  ;;  %v2257_v57 = vmax.f32 %v2193_v54, 0.0  ;;  %v2136_v16 = vpop.f32.mrf.mxu0 }
 0x1e9   : > { %v2749_v13 = vmax.f32 %v2747_v21, %v2689_v18  ;;  %v2196_v12 = vpop.f32.mrf.mxu1  ;;  %v2135_v55 = vadd.f32 %v2134_v44, %v4786_v11  ;;  %v2195_v53 = vadd.f32 %v2194_v6, %v4523_v50  ;;  %v2137_v27 = vadd.f32 %v2136_v16, %v4787_v0  ;;  %v4797_v21 = vld [vmem:[#allocation7_spill] sm:$0xff]  ;;  %v4801_v44 = vld [vmem:[#allocation25_spill] sm:$0xff] }
 0x1ea   : > { %v2197_v52 = vadd.f32 %v2196_v12, %v4526_v35  ;;  %v2052_v47 = vadd.f32 %v4788_v40, %v1899_v23  ;;  %v2054_v3 = vadd.f32 %v4789_v2, %v1901_v19  ;;  %v2706_v45 = vmax.f32 %v2704_v46, %v2233_v20  ;;  %v2138_v56 = vpop.f32.mrf.mxu0  ;;  %v4796_v46 = vld [vmem:[#allocation41_spill] sm:$0xff] }
 0x1eb   : > { %v2722_v5 = vmax.f32 %v2720_v49, %v2257_v57  ;;  %v2198_v30 = vpop.f32.mrf.mxu1  ;;  %v2234_v48 = vmax.f32 %v2135_v55, 0.0  ;;  %v2258_v31 = vmax.f32 %v2195_v53, 0.0  ;;  %v2235_v60 = vmax.f32 %v2137_v27, 0.0  ;;  %v4802_v49 = vld [vmem:[#allocation43_spill] sm:$0xff]  ;;  %v4803_v18 = vld [vmem:[#allocation9_spill] sm:$0xff] }
 0x1ec   : > { %v2259_v33 = vmax.f32 %v2197_v52, 0.0  ;;  %v4790_v22 = vand.u32 15, %v4444_v29  ;;  %v4793_v35 = vand.u32 15, %v4447_v7  ;;  %v2056_v34 = vadd.f32 %v4796_v46, %v1903_v9  ;;  %v2142_v29 = vpop.f32.mrf.mxu0  ;;  %v4805_v52 = vld [vmem:[#allocation26_spill] sm:$0xff]  ;;  %v4807_v46 = vld [vmem:[#allocation8_spill] sm:$0xff] }
 0x1ed   : > { %v1907_v43 = vadd.f32 %v4798_v39, %v4797_v21  ;;  %v2139_v41 = vadd.f32 %v2138_v56, %v4799_v1  ;;  %v2199_v37 = vadd.f32 %v2198_v30, %v4564_v17  ;;  %v2202_v58 = vpop.f32.mrf.mxu1  ;;  %v2735_v63 = vmax.f32 %v2733_v62, %v2234_v48  ;;  %v4806_v30 = vld [vmem:[#allocation27_spill] sm:$0xff]  ;;  %v4808_v21 = vld [vmem:[#allocation44_spill] sm:$0xff] }
 0x1ee   : > { %vm4619_vm12 = vcmp.lt.s32.totalorder %v4790_v22, 12  ;;  %vm4625_vm13 = vcmp.lt.s32.totalorder %v4793_v35, 12  ;;  %v2751_v36 = vmax.f32 %v2749_v13, %v2258_v31  ;;  %v2668_v7 = vsel %vm4576_vm10, %v2235_v60, -inf  ;;  %v2144_v32 = vpop.f32.mrf.mxu0  ;;  %v4804_v13 = vld [vmem:[#allocation46_spill] sm:$0xff] }
 0x1ef   : > { %v2692_v54 = vsel %vm4582_vm11, %v2259_v33, -inf  ;;  %v2707_v51 = vmax.f32 %v4603_v42, %v2668_v7  ;;  %v2236_v19 = vmax.f32 %v2139_v41, 0.0  ;;  %v2260_v14 = vmax.f32 %v2199_v37, 0.0  ;;  %v2204_v9 = vpop.f32.mrf.mxu1  ;;  %v4809_v41 = vld [vmem:[#allocation28_spill] sm:$0xff]  ;;  %v4810_v37 = vld [vmem:[#allocation47_spill] sm:$0xff] }
 0x1f0   : > { %v2713_v25 = vmax.f32 %v2692_v54, %v2722_v5  ;;  %v2143_v26 = vadd.f32 %v2142_v29, %v4800_v24  ;;  %v2203_v17 = vadd.f32 %v2202_v58, %v4587_v4  ;;  %v2145_v62 = vadd.f32 %v2144_v32, %v4801_v44  ;;  %v2146_v16 = vpop.f32.mrf.mxu0  ;;  %v4812_v58 = vld [vmem:[#allocation48_spill] sm:$0xff] }
 0x1f1   : > { %v2205_v6 = vadd.f32 %v2204_v9, %v2052_v47  ;;  %v2060_v28 = vadd.f32 %v4802_v49, %v1907_v43  ;;  %v1911_v20 = vadd.f32 %v4804_v13, %v4803_v18  ;;  %v2669_v42 = vsel %vm4576_vm10, %v2236_v19, -inf  ;;  %v2206_v12 = vpop.f32.mrf.mxu1  ;;  %v4814_v18 = vld [vmem:[#allocation29_spill] sm:$0xff] }
 0x1f2   : > { %v2693_v57 = vsel %vm4582_vm11, %v2260_v14, -inf  ;;  %v2736_v11 = vmax.f32 %v4609_v38, %v2669_v42  ;;  %v2237_v4 = vmax.f32 %v2143_v26, 0.0  ;;  %v2261_v53 = vmax.f32 %v2203_v17, 0.0  ;;  %v2148_v2 = vpop.f32.mrf.mxu0 }
 0x1f3   : > { %v2742_v55 = vmax.f32 %v2693_v57, %v2751_v36  ;;  %v2238_v0 = vmax.f32 %v2145_v62, 0.0  ;;  %v2262_v27 = vmax.f32 %v2205_v6, 0.0  ;;  %v2147_v40 = vadd.f32 %v2146_v16, %v4805_v52  ;;  %v2208_v5 = vpop.f32.mrf.mxu1  ;;  %v4813_v6 = vld [vmem:[#allocation45_spill] sm:$0xff] }
 0x1f4   : > { %v2207_v47 = vadd.f32 %v2206_v12, %v2054_v3  ;;  %v2708_v56 = vmax.f32 %v2706_v45, %v2237_v4  ;;  %v2715_v15 = vmax.f32 %v2713_v25, %v2261_v53  ;;  %v2149_v48 = vadd.f32 %v2148_v2, %v4806_v30  ;;  %v2152_v38 = vpop.f32.mrf.mxu0  ;;  %v4811_v45 = vld [vmem:[#allocation10_spill] sm:$0xff]  ;;  %v4816_v57 = vld [vmem:[#allocation49_spill] sm:$0xff] }
 0x1f5   : > { %v2209_v59 = vadd.f32 %v2208_v5, %v2056_v34  ;;  %v2737_v31 = vmax.f32 %v2735_v63, %v2238_v0  ;;  %v2744_v60 = vmax.f32 %v2742_v55, %v2262_v27  ;;  %v2239_v33 = vmax.f32 %v2147_v40, 0.0  ;;  %v2212_v35 = vpop.f32.mrf.mxu1  ;;  %v4820_v40 = vld [vmem:[#allocation31_spill] sm:$0xff] }
 0x1f6   : > { %v2263_v22 = vmax.f32 %v2207_v47, 0.0  ;;  %v1909_v39 = vadd.f32 %v4808_v21, %v4807_v46  ;;  %v2240_v43 = vmax.f32 %v2149_v48, 0.0  ;;  %v2153_v3 = vadd.f32 %v2152_v38, %v4809_v41  ;;  %v2154_v7 = vpop.f32.mrf.mxu0 }
 0x1f7   : > { %v2264_v1 = vmax.f32 %v2209_v59, 0.0  ;;  %v2064_v29 = vadd.f32 %v4810_v37, %v1911_v20  ;;  %v1913_v36 = vadd.f32 %v4812_v58, %v4811_v45  ;;  %v2672_v34 = vsel %vm4619_vm12, %v2239_v33, -inf  ;;  %v2214_v54 = vpop.f32.mrf.mxu1  ;;  %v4815_v20 = vld [vmem:[#allocation30_spill] sm:$0xff] }
 0x1f8   : > { %v2696_v63 = vsel %vm4625_vm13, %v2263_v22, -inf  ;;  %v2709_v25 = vmax.f32 %v2707_v51, %v2672_v34  ;;  %v2673_v14 = vsel %vm4619_vm12, %v2240_v43, -inf  ;;  %v2241_v26 = vmax.f32 %v2153_v3, 0.0  ;;  %v2156_v44 = vpop.f32.mrf.mxu0 }
 0x1f9   : > { %v2717_v19 = vmax.f32 %v2715_v15, %v2696_v63  ;;  %v2697_v32 = vsel %vm4625_vm13, %v2264_v1, -inf  ;;  %v2738_v9 = vmax.f32 %v2736_v11, %v2673_v14  ;;  %v2213_v17 = vadd.f32 %v2212_v35, %v2060_v28  ;;  %v2216_v62 = vpop.f32.mrf.mxu1 }
 0x1fa   : > { %v2746_v24 = vmax.f32 %v2744_v60, %v2697_v32  ;;  %v2062_v49 = vadd.f32 %v4813_v6, %v1909_v39  ;;  %v2155_v13 = vadd.f32 %v2154_v7, %v4814_v18  ;;  %v2157_v42 = vadd.f32 %v2156_v44, %v4815_v20  ;;  %v2158_v11 = vpop.f32.mrf.mxu0 }
 0x1fb   : > { %v2217_v51 = vadd.f32 %v2216_v62, %v2064_v29  ;;  %v2066_v16 = vadd.f32 %v4816_v57, %v1913_v36  ;;  %v2710_v50 = vmax.f32 %v2708_v56, %v2241_v26  ;;  %v4817_v12 = vand.u32 15, %v4450_v8  ;;  %v2218_v55 = vpop.f32.mrf.mxu1 }
 0x1fc   : > { %v2459_v28 = vand.u32 15, %v4471_v61  ;;  %v2242_v4 = vmax.f32 %v2155_v13, 0.0  ;;  %v2215_v53 = vadd.f32 %v2214_v54, %v2062_v49  ;;  %v2243_v0 = vmax.f32 %v2157_v42, 0.0 }
 0x1fd   : > { %vm4672_vm14 = vcmp.lt.s32.totalorder %v4817_v12, 12  ;;  %v2719_v27 = vmax.f32 %v2717_v19, %v2710_v50  ;;  %v2265_v52 = vmax.f32 %v2213_v17, 0.0  ;;  %v2159_v47 = vadd.f32 %v2158_v11, %v4820_v40 }
 0x1fe   : > { %v2219_v2 = vadd.f32 %v2218_v55, %v2066_v16  ;;  %v2739_v5 = vmax.f32 %v2737_v31, %v2242_v4  ;;  %v2676_v8 = vsel %vm4672_vm14, %v2243_v0, -inf  ;;  %v2267_v56 = vmax.f32 %v2217_v51, 0.0 }
 0x1ff   : > { %v2721_v15 = vmax.f32 %v2719_v27, %v2265_v52  ;;  %v2711_v30 = vmax.f32 %v2709_v25, %v2676_v8  ;;  %vm2605_vm15 = vcmp.lt.s32.totalorder %v2459_v28, 12  ;;  %v2244_v48 = vmax.f32 %v2159_v47, 0.0 }
 0x200   : > { %v2748_v61 = vmax.f32 %v2746_v24, %v2739_v5  ;;  %v2266_v59 = vmax.f32 %v2215_v53, 0.0  ;;  %v2268_v22 = vmax.f32 %v2219_v2, 0.0  ;;  %v2700_v35 = vsel %vm2605_vm15, %v2267_v56, -inf }
 0x201   : > { %v2723_v60 = vmax.f32 %v2721_v15, %v2711_v30  ;;  %v2677_v33 = vsel %vm4672_vm14, %v2244_v48, -inf  ;;  %v3297_v45 = vmov 1966171168   ;;  %v4821_v26 = vlaneseq }
 0x202   : > { %v2750_v38 = vmax.f32 %v2748_v61, %v2266_v59  ;;  %v2740_v46 = vmax.f32 %v2738_v9, %v2677_v33  ;;  %v2701_v43 = vsel %vm2605_vm15, %v2268_v22, -inf  ;;  %v2764_v58 = vunpack.c.l.s4 %v3297_v45 }
 0x203   : > { %v2724_v21 = vmax.f32 %v2700_v35, %v2723_v60  ;;  %vm2780_vm0 = vcmp.lt.s32.totalorder %v4821_v26, 256 }
 0x204   : > { %v2752_v31 = vmax.f32 %v2750_v38, %v2740_v46  ;;  %v2765_v54 = vunpack.c.0.s8 %v2764_v58 }
 0x205   : > { %v2725_v39 = vrot.slane %v2724_v21, 4 }
 0x206   : > { %v2753_v1 = vmax.f32 %v2701_v43, %v2752_v31  ;;  %v2768_v32 = vsub.s32 %v2765_v54, %v4098_v10 }
 0x207   : > { %v2726_v41 = vmax.f32 %v2724_v21, %v2725_v39 }
 0x208   : > { %v2754_v3 = vrot.slane %v2753_v1, 4 }
 0x209   : > { %v2727_v37 = vrot.slane %v2726_v41, 2 }
 0x20a   : > { %v2755_v29 = vmax.f32 %v2753_v1, %v2754_v3 }
 0x20b   : > { %v2728_v36 = vmax.f32 %v2726_v41, %v2727_v37 }
 0x20c   : > { %v2756_v34 = vrot.slane %v2755_v29, 2 }
 0x20d   : > { %v2729_v63 = vrot.slane %v2728_v36, 1 }
 0x20e   : > { %v2757_v7 = vmax.f32 %v2755_v29, %v2756_v34 }
 0x20f   : > { %v2730_v19 = vmax.f32 %v2728_v36, %v2729_v63 }
 0x210   : > { %v2758_v25 = vrot.slane %v2757_v7, 1 }
 0x212   : > { %v2759_v14 = vmax.f32 %v2757_v7, %v2758_v25 }
 0x214   : > { %v2762_v9 = vcombine.low %v2730_v19, %v2759_v14 }
 0x216   : > { %v2769_v24 = vrot.slane %v2762_v9, %v2768_v32 }
 0x218   : > { %v2776_v17 = vrot.slane %v2769_v24, %v2768_v32 }
 0x21a   : > { %2782 = vst.msk [vmem:[%s168_s18] sm:$0x3] %vm2780_vm0, %v2776_v17 }
 0x21b PF: > { %s13_s12 = sadd.s32 1, %s3294_s12  }
 0x21c   : > { %p10_p4 = scmp.ge.s32.totalorder %s13_s12, 4  }
 0x21e   :  { %12 = sbr.rel (!%p10_p4) target bundleno = 1 (0x1), region = 62 }

// kernel: squeeze.1
= control target key start
LH: loop header
LB: loop body
LE: loop exit
PB: predicated region body
PF: predicated region fallthrough
CT: control target
= control target key end

     0   :  { %vm12_vm0 = vcmask 130048   ;;  %s78_s12 = smov 80   ;;  %s79_s15 = smov 96   ;;  %s136_s0 = inlined_call_operand.vmem [shape: f32[2,192], index: 0, kind: input, shape index: {}]   ;;  %s137_s1 = inlined_call_operand.vmem [shape: f32[2,12,16], index: 1, kind: output, shape index: {}]  }
   0x1   :  { %v61_v0 = vld [vmem:[%s136_s0 + $0x2] sm:$0x3]  ;;  %v9_v1 = vld [vmem:[%s136_s0] sm:$0x3]  ;;  %s77_s0 = smov 112   ;;  %s80_s16 = smov 64  }
   0x2   :  { %8 = vst [vmem:[#allocation0 + $0x8] sm:$0x3] %v61_v0  ;;  %10 = vst [vmem:[#allocation0] sm:$0x3] %v9_v1  ;;  %s81_s17 = smov 48   ;;  %s82_s18 = smov 32  }
   0x3   :  { %s83_s19 = smov 16  }
   0x9   :  { %v19_v2 = vld.sshfl [vmem:[#allocation0] sm:$0xff pattern:$0x99999180]  }
   0xa   :  { %v15_v3 = vld [vmem:[#allocation0 + $0x8] sm:$0x3]   ;;  %20 = vrot.lane.b32.xlu0 %v19_v2, %s77_s0  ;;  %32 = vrot.lane.b32.xlu1 %v19_v2, %s78_s12  ;;  %v37_v4 = vld [vmem:[#allocation0] sm:$0x3]  }
   0xb   :  { %62 = vst.msk [vmem:[%s137_s1 + $0x8] ss:$16 sm:$0x3] %vm12_vm0, %v15_v3   ;;  %v11_v5 = vld [vmem:[#allocation0] sm:$0x3]  }
   0xc   :  { %13 = vst.msk [vmem:[%s137_s1] ss:$16 sm:$0x3] %vm12_vm0, %v11_v5   ;;  %v43_v6 = vld [vmem:[#allocation0] sm:$0x3]  }
   0xd   :  { %v49_v7 = vld [vmem:[#allocation0] sm:$0x3]  }
   0xe   :  { %26 = vrot.lane.b32.xlu0 %v19_v2, %s79_s15  ;;  %38 = vrot.lane.b32.xlu1 %v37_v4, %s80_s16  ;;  %v55_v8 = vld [vmem:[#allocation0] sm:$0x3]  }
  0x12   :  { %44 = vrot.lane.b32.xlu0 %v43_v6, %s81_s17  ;;  %50 = vrot.lane.b32.xlu1 %v49_v7, %s82_s18 }
  0x16   :  { %56 = vrot.lane.b32.xlu0 %v55_v8, %s83_s19 }
  0x7c   :  { %v21_v9 = vpop.permute.xlu0 %20   ;;  %v33_v10 = vpop.permute.xlu1 %32  }
  0x7d   :  { %63 = vst.msk [vmem:[%s137_s1 + $0x1] ss:$8 sm:$0xf] %vm12_vm0, %v21_v9   ;;  %65 = vst.msk [vmem:[%s137_s1 + $0x3] ss:$8 sm:$0xf] %vm12_vm0, %v33_v10  }
  0x80   :  { %v27_v11 = vpop.permute.xlu0 %26   ;;  %v39_v12 = vpop.permute.xlu1 %38  }
  0x81   :  { %64 = vst.msk [vmem:[%s137_s1 + $0x2] ss:$8 sm:$0xf] %vm12_vm0, %v27_v11   ;;  %66 = vst.msk [vmem:[%s137_s1 + $0x4] ss:$16 sm:$0x3] %vm12_vm0, %v39_v12  }
  0x84   :  { %v45_v13 = vpop.permute.xlu0 %44   ;;  %v51_v14 = vpop.permute.xlu1 %50  }
  0x85   :  { %67 = vst.msk [vmem:[%s137_s1 + $0x5] ss:$16 sm:$0x3] %vm12_vm0, %v45_v13   ;;  %68 = vst.msk [vmem:[%s137_s1 + $0x6] ss:$16 sm:$0x3] %vm12_vm0, %v51_v14  }
  0x88   :  { %v57_v15 = vpop.permute.xlu0 %56  }
  0x89   :  { %69 = vst.msk [vmem:[%s137_s1 + $0x7] ss:$16 sm:$0x3] %vm12_vm0, %v57_v15  }

</bundles_post_ra>
